<compile_context>
chip_gen: v6e
topology: v6e:2x2x1
jax: 0.10.0
libtpu: 0.0.40
codegen_flags: <defaults>
</compile_context>

<pallas_src>
import functools

import jax
import jax.numpy as jnp
from jax.experimental import pallas as pl
from jax.experimental.pallas import tpu as pltpu


NCPAD = 128        # fc2 output padded to a full 128-lane vreg; sliced after
CONV1_GROUP = 8    # pixels packed per matmul row for conv1 (Cin == 1)


# ----------------------------------------------------------------------------
# Fused conv3x3(pad=1) + 2x2 max-pool + bias + ReLU kernel (TB images / step)
# ----------------------------------------------------------------------------
def _conv_relu_pool_kernel(x_ref, w_ref, b_ref, o_ref):
    """x_ref : (4, R, K) bf16  pool-parity im2col; R = TB * pooled pixels,
                               K = 9*Cin (taps folded into the contraction).
       w_ref : (K, C)   bf16  tap-folded conv weights.
       b_ref : (1, C)   f32   bias.
       o_ref : (R, C)   bf16  pooled + bias + ReLU output.
    """
    w = w_ref[...]

    def parity(p):
        # Full-depth MXU matmul for one pool parity, f32 accumulation.
        return jnp.dot(x_ref[p], w, preferred_element_type=jnp.float32)

    # 2x2 max pool == elementwise max over the 4 pool parities; bias / ReLU
    # commute with the max, so they are applied once on the pooled tile.
    pooled = jnp.maximum(jnp.maximum(parity(0), parity(1)),
                         jnp.maximum(parity(2), parity(3)))
    o_ref[...] = jnp.maximum(pooled + b_ref[...], 0.0).astype(o_ref.dtype)


def conv_relu_pool(x4, w, b, tb):
    """x4: (4, B, M, K) bf16 pool-parity im2col -> (B, M, Cout) bf16."""
    _, B, M, K = x4.shape
    C = w.shape[1]
    grid = (B // tb,)
    out = pl.pallas_call(
        _conv_relu_pool_kernel,
        out_shape=jax.ShapeDtypeStruct((B * M, C), jnp.bfloat16),
        grid=grid,
        in_specs=[
            pl.BlockSpec((4, tb * M, K), lambda i: (0, i, 0)),
            pl.BlockSpec((K, C), lambda i: (0, 0)),
            pl.BlockSpec((1, C), lambda i: (0, 0)),
        ],
        out_specs=pl.BlockSpec((tb * M, C), lambda i: (i, 0)),
        compiler_params=pltpu.CompilerParams(
            dimension_semantics=("parallel",)),
    )(x4.reshape(4, B * M, K), w, b.reshape(1, C))
    return out.reshape(B, M, C)


# ----------------------------------------------------------------------------
# Fused FC1 (+ReLU) + FC2 head, M-tiled over the batch
# ----------------------------------------------------------------------------
def _fc_head_kernel(x_ref, w1_ref, b1_ref, w2_ref, b2_ref, o_ref):
    h = jnp.dot(x_ref[...], w1_ref[...], preferred_element_type=jnp.float32)
    h = jnp.maximum(h + b1_ref[...], 0.0)
    out = jnp.dot(h.astype(jnp.bfloat16), w2_ref[...],
                  preferred_element_type=jnp.float32)
    o_ref[...] = (out + b2_ref[...]).astype(o_ref.dtype)


def fc_head(x, w1, b1, w2, b2, tb):
    """x: (B, K) bf16; w1: (K, H) bf16; w2: (H, N) bf16 -> (B, N) f32."""
    B, K = x.shape
    H = w1.shape[1]
    N = w2.shape[1]
    grid = (B // tb,)
    return pl.pallas_call(
        _fc_head_kernel,
        out_shape=jax.ShapeDtypeStruct((B, N), jnp.float32),
        grid=grid,
        in_specs=[
            pl.BlockSpec((tb, K), lambda i: (i, 0)),
            pl.BlockSpec((K, H), lambda i: (0, 0)),
            pl.BlockSpec((1, H), lambda i: (0, 0)),
            pl.BlockSpec((H, N), lambda i: (0, 0)),
            pl.BlockSpec((1, N), lambda i: (0, 0)),
        ],
        out_specs=pl.BlockSpec((tb, N), lambda i: (i, 0)),
        compiler_params=pltpu.CompilerParams(
            dimension_semantics=("parallel",)),
    )(x, w1, b1.reshape(1, H), w2, b2.reshape(1, N))


# ----------------------------------------------------------------------------
# Wrapper-side staging: pool-parity im2col (taps folded into the last dim)
# ----------------------------------------------------------------------------
def pool_parity_im2col(p, group=1):
    """p: (B, H, W, C) -> (4, B, (H//2)*(W//2)//group, group*9*C) bf16.

    Entry [py*2+px, b, m, (dy*3+dx)*C + c] (before grouping) equals the
    zero-padded input at [b, 2u+py+dy, 2v+px+dx, c] with m = u*(W//2) + v,
    so each pool parity's 3x3 conv becomes ONE full-K matmul in the kernel.
    """
    B, H, W, C = p.shape
    Hh, Wh = H // 2, W // 2
    pp = jnp.pad(p, ((0, 0), (1, 1), (1, 1), (0, 0)))
    slab = [[pp[:, oy::2, ox::2, :][:, :Hh, :Wh, :] for ox in range(4)]
            for oy in range(4)]
    groups = []
    for py in range(2):
        for px in range(2):
            taps = [slab[py + dy][px + dx]
                    for dy in range(3) for dx in range(3)]
            groups.append(jnp.concatenate(taps, axis=-1))    # (B, Hh, Wh, 9C)
    x = jnp.stack(groups, axis=0)                            # (4, B, Hh, Wh, 9C)
    x = x.reshape(4, B, Hh * Wh, 9 * C)
    if group > 1:
        x = x.reshape(4, B, (Hh * Wh) // group, group * 9 * C)
    return x.astype(jnp.bfloat16)


# ----------------------------------------------------------------------------
# Parameters
# ----------------------------------------------------------------------------
def init_params_torch_layout(key, num_classes):
    """Parameters in the PyTorch CustomCNN layout."""
    ks = jax.random.split(key, 10)
    f32 = jnp.float32
    return {
        "conv1_w": 0.30 * jax.random.normal(ks[0], (32, 1, 3, 3), f32),
        "conv1_b": 0.20 * jax.random.normal(ks[1], (32,), f32),
        "conv2_w": 0.08 * jax.random.normal(ks[2], (64, 32, 3, 3), f32),
        "conv2_b": 0.10 * jax.random.normal(ks[3], (64,), f32),
        "conv3_w": 0.06 * jax.random.normal(ks[4], (128, 64, 3, 3), f32),
        "conv3_b": 0.10 * jax.random.normal(ks[5], (128,), f32),
        "fc1_w": 0.03 * jax.random.normal(ks[6], (128, 128 * 4 * 4), f32),
        "fc1_b": 0.05 * jax.random.normal(ks[7], (128,), f32),
        "fc2_w": 0.15 * jax.random.normal(ks[8], (num_classes, 128), f32),
        "fc2_b": 0.05 * jax.random.normal(ks[9], (num_classes,), f32),
    }


def prepare_params(p, num_classes):
    """One-time re-layout: tap-folded (9*Cin, Cout) conv weights (bf16),
    conv1 packed block-diagonally over 8 pixels, fc1 rows permuted to the
    NHWC flatten order, fc2 padded to 128 lanes."""
    def conv_w(w):
        co, ci = w.shape[0], w.shape[1]
        # (Cout, Cin, 3, 3) -> (3, 3, Cin, Cout) -> (9*Cin, Cout); row index
        # is (dy*3 + dx)*Cin + c, matching pool_parity_im2col's column order.
        return jnp.transpose(w, (2, 3, 1, 0)).reshape(9 * ci, co)

    w1 = conv_w(p["conv1_w"])                                     # (9, 32)
    w1_blk = jnp.kron(jnp.eye(CONV1_GROUP, dtype=w1.dtype), w1)   # (72, 256)
    b1_blk = jnp.tile(p["conv1_b"], CONV1_GROUP)                  # (256,)

    # fc1: PyTorch input index = c*16 + pix; our flatten order is pix*128 + c.
    fc1 = p["fc1_w"].reshape(128, 128, 16)                        # (out, c, pix)
    fc1 = jnp.transpose(fc1, (2, 1, 0)).reshape(16 * 128, 128)

    fc2 = jnp.zeros((128, NCPAD), jnp.float32)
    fc2 = fc2.at[:, :num_classes].set(p["fc2_w"].T)
    b2 = jnp.zeros((NCPAD,), jnp.float32).at[:num_classes].set(p["fc2_b"])

    return {
        "conv1_w": w1_blk.astype(jnp.bfloat16),
        "conv1_b": b1_blk.astype(jnp.float32),
        "conv2_w": conv_w(p["conv2_w"]).astype(jnp.bfloat16),
        "conv2_b": p["conv2_b"].astype(jnp.float32),
        "conv3_w": conv_w(p["conv3_w"]).astype(jnp.bfloat16),
        "conv3_b": p["conv3_b"].astype(jnp.float32),
        "fc1_w": fc1.astype(jnp.bfloat16),
        "fc1_b": p["fc1_b"].astype(jnp.float32),
        "fc2_w": fc2.astype(jnp.bfloat16),
        "fc2_b": b2,
    }


# ----------------------------------------------------------------------------
# Full forward pass (CustomCNN)
# ----------------------------------------------------------------------------
def custom_cnn_forward(x_nchw, params, *, num_classes, tb=8):
    """x_nchw: (B, 1, 32, 32) f32 -> logits (B, num_classes) f32."""
    B = x_nchw.shape[0]
    tb = min(tb, B)
    Bp = ((B + tb - 1) // tb) * tb
    x = x_nchw
    if Bp != B:
        x = jnp.pad(x, ((0, Bp - B), (0, 0), (0, 0), (0, 0)))
    x = jnp.transpose(x, (0, 2, 3, 1))                       # NCHW -> NHWC

    # conv1: K = 8 pixels * 9 taps = 72, N = 8 pixels * 32 ch = 256 (block-diag)
    x1 = pool_parity_im2col(x, group=CONV1_GROUP)            # (4, Bp, 32, 72)
    p1 = conv_relu_pool(x1, params["conv1_w"], params["conv1_b"], tb)
    p1 = p1.reshape(Bp, 16, 16, 32)                          # NHWC, 16x16x32

    # conv2: K = 9*32 = 288
    x2 = pool_parity_im2col(p1)                              # (4, Bp, 64, 288)
    p2 = conv_relu_pool(x2, params["conv2_w"], params["conv2_b"], tb)
    p2 = p2.reshape(Bp, 8, 8, 64)                            # 8x8x64

    # conv3: K = 9*64 = 576
    x3 = pool_parity_im2col(p2)                              # (4, Bp, 16, 576)
    p3 = conv_relu_pool(x3, params["conv3_w"], params["conv3_b"], tb)
    # p3: (Bp, 16, 128) == NHWC-flattened (pix, channel) feature

    feat = p3.reshape(Bp, 16 * 128)                          # (Bp, 2048) bf16
    logits = fc_head(feat, params["fc1_w"], params["fc1_b"],
                     params["fc2_w"], params["fc2_b"], tb)   # (Bp, 128) f32
    return logits[:B, :num_classes]


# ----------------------------------------------------------------------------
# Pure-JAX reference (PyTorch semantics) for a loose bf16-tolerance check
# ----------------------------------------------------------------------------
def reference_forward(x_nchw, tp):
    def conv(x, w, b):
        y = jax.lax.conv_general_dilated(
            x, w, (1, 1), ((1, 1), (1, 1)),
            dimension_numbers=("NCHW", "OIHW", "NCHW"))
        return jnp.maximum(y + b[None, :, None, None], 0.0)

    def pool(x):
        return jax.lax.reduce_window(x, -jnp.inf, jax.lax.max,
                                     (1, 1, 2, 2), (1, 1, 2, 2), "VALID")

    x = pool(conv(x_nchw, tp["conv1_w"], tp["conv1_b"]))
    x = pool(conv(x, tp["conv2_w"], tp["conv2_b"]))
    x = pool(conv(x, tp["conv3_w"], tp["conv3_b"]))
    x = x.reshape(x.shape[0], -1)                            # NCHW flatten
    h = jnp.maximum(x @ tp["fc1_w"].T + tp["fc1_b"], 0.0)
    return h @ tp["fc2_w"].T + tp["fc2_b"]


if __name__ == "__main__":
    num_classes = 10  # stands in for len(train_dataset.classes)
    key = jax.random.PRNGKey(0)
    k_params, k_x = jax.random.split(key)

    torch_params = init_params_torch_layout(k_params, num_classes)
    params = prepare_params(torch_params, num_classes)

    # grayscale 32x32 images, "Normalize((0.5,), (0.5,))"-style range
    x = jax.random.uniform(k_x, (2, 1, 32, 32), jnp.float32,
                           minval=-1.0, maxval=1.0)

    fwd = jax.jit(functools.partial(custom_cnn_forward,
                                    num_classes=num_classes))
    logits = jax.block_until_ready(fwd(x, params))

    assert logits.shape == (2, num_classes), logits.shape
    assert bool(jnp.all(jnp.isfinite(logits)))

    # Loose tolerance: conv/fc run in bf16 on the MXU with f32 accumulation.
    ref = reference_forward(x, torch_params)
    err = float(jnp.max(jnp.abs(logits - ref)))
    scale = float(jnp.max(jnp.abs(ref)))
    assert err <= 0.1 * scale + 0.05, (err, scale)

    print("KERNEL_OK")
</pallas_src>

<mosaic_0001>
module attributes {stable_mosaic.version = 11 : i64} {
  func.func @_conv_relu_pool_kernel(%arg0: i32, %arg1: memref<4x64x72xbf16, #tpu.memory_space<vmem>>, %arg2: memref<72x256xbf16, #tpu.memory_space<vmem>>, %arg3: memref<1x256xf32, #tpu.memory_space<vmem>>, %arg4: memref<64x256xbf16, #tpu.memory_space<vmem>>) attributes {dimension_semantics = [#tpu.dimension_semantics<parallel>], iteration_bounds = array<i64: 1>, scalar_prefetch = 0 : i64, scratch_operands = 0 : i64, tpu.core_type = #tpu.core_type<tc>, window_params = [{transform_indices = @transform_0, window_bounds = array<i64: 4, 64, 72>}, {pipeline_mode = #tpu.pipeline_mode<synchronous>, transform_indices = @transform_1, window_bounds = array<i64: 72, 256>}, {pipeline_mode = #tpu.pipeline_mode<synchronous>, transform_indices = @transform_2, window_bounds = array<i64: 1, 256>}, {transform_indices = @transform_3, window_bounds = array<i64: 64, 256>}]} {
    %c0 = arith.constant 0 : index
    %c0_0 = arith.constant 0 : index
    %0 = vector.load %arg2[%c0, %c0_0] : memref<72x256xbf16, #tpu.memory_space<vmem>>, vector<72x256xbf16>
    %c0_1 = arith.constant 0 : index
    %c0_2 = arith.constant 0 : index
    %c0_3 = arith.constant 0 : index
    %1 = vector.load %arg1[%c0_1, %c0_2, %c0_3] : memref<4x64x72xbf16, #tpu.memory_space<vmem>>, vector<1x64x72xbf16>
    %2 = vector.shape_cast %1 : vector<1x64x72xbf16> to vector<64x72xbf16>
    %cst = arith.constant dense<0.000000e+00> : vector<64x256xf32>
    %3 = tpu.matmul %2, %0, %cst {dimension_numbers = #tpu.dot_dimension_numbers<[1], [0], [0], [1], [0, 0, 1, 1], [], []>} : vector<64x72xbf16>, vector<72x256xbf16>, vector<64x256xf32> -> vector<64x256xf32>
    %c1 = arith.constant 1 : index
    %c0_4 = arith.constant 0 : index
    %c0_5 = arith.constant 0 : index
    %4 = vector.load %arg1[%c1, %c0_4, %c0_5] : memref<4x64x72xbf16, #tpu.memory_space<vmem>>, vector<1x64x72xbf16>
    %5 = vector.shape_cast %4 : vector<1x64x72xbf16> to vector<64x72xbf16>
    %cst_6 = arith.constant dense<0.000000e+00> : vector<64x256xf32>
    %6 = tpu.matmul %5, %0, %cst_6 {dimension_numbers = #tpu.dot_dimension_numbers<[1], [0], [0], [1], [0, 0, 1, 1], [], []>} : vector<64x72xbf16>, vector<72x256xbf16>, vector<64x256xf32> -> vector<64x256xf32>
    %7 = arith.maximumf %3, %6 : vector<64x256xf32>
    %c2 = arith.constant 2 : index
    %c0_7 = arith.constant 0 : index
    %c0_8 = arith.constant 0 : index
    %8 = vector.load %arg1[%c2, %c0_7, %c0_8] : memref<4x64x72xbf16, #tpu.memory_space<vmem>>, vector<1x64x72xbf16>
    %9 = vector.shape_cast %8 : vector<1x64x72xbf16> to vector<64x72xbf16>
    %cst_9 = arith.constant dense<0.000000e+00> : vector<64x256xf32>
    %10 = tpu.matmul %9, %0, %cst_9 {dimension_numbers = #tpu.dot_dimension_numbers<[1], [0], [0], [1], [0, 0, 1, 1], [], []>} : vector<64x72xbf16>, vector<72x256xbf16>, vector<64x256xf32> -> vector<64x256xf32>
    %c3 = arith.constant 3 : index
    %c0_10 = arith.constant 0 : index
    %c0_11 = arith.constant 0 : index
    %11 = vector.load %arg1[%c3, %c0_10, %c0_11] : memref<4x64x72xbf16, #tpu.memory_space<vmem>>, vector<1x64x72xbf16>
    %12 = vector.shape_cast %11 : vector<1x64x72xbf16> to vector<64x72xbf16>
    %cst_12 = arith.constant dense<0.000000e+00> : vector<64x256xf32>
    %13 = tpu.matmul %12, %0, %cst_12 {dimension_numbers = #tpu.dot_dimension_numbers<[1], [0], [0], [1], [0, 0, 1, 1], [], []>} : vector<64x72xbf16>, vector<72x256xbf16>, vector<64x256xf32> -> vector<64x256xf32>
    %14 = arith.maximumf %10, %13 : vector<64x256xf32>
    %15 = arith.maximumf %7, %14 : vector<64x256xf32>
    %c0_13 = arith.constant 0 : index
    %c0_14 = arith.constant 0 : index
    %16 = vector.load %arg3[%c0_13, %c0_14] : memref<1x256xf32, #tpu.memory_space<vmem>>, vector<1x256xf32>
    %17 = vector.broadcast %16 : vector<1x256xf32> to vector<64x256xf32>
    %18 = arith.addf %15, %17 : vector<64x256xf32>
    %cst_15 = arith.constant 0.000000e+00 : f32
    %19 = vector.broadcast %cst_15 : f32 to vector<64x256xf32>
    %20 = arith.maximumf %18, %19 : vector<64x256xf32>
    %21 = arith.truncf %20 : vector<64x256xf32> to vector<64x256xbf16>
    %c0_16 = arith.constant 0 : index
    %c0_17 = arith.constant 0 : index
    %22 = vector.load %arg4[%c0_16, %c0_17] : memref<64x256xbf16, #tpu.memory_space<vmem>>, vector<64x256xbf16>
    tpu.vector_store %arg4[%c0_16, %c0_17], %21 {strides = array<i32>} : memref<64x256xbf16, #tpu.memory_space<vmem>>, vector<64x256xbf16>,
    return
  }
  func.func @transform_0(%arg0: i32) -> (i32, i32, i32) {
    %c0_i32 = arith.constant 0 : i32
    %c0_i32_0 = arith.constant 0 : i32
    %c0_i32_1 = arith.constant 0 : i32
    return %c0_i32, %arg0, %c0_i32_0 : i32, i32, i32
  }
  func.func @transform_1(%arg0: i32) -> (i32, i32) {
    %c0_i32 = arith.constant 0 : i32
    %c0_i32_0 = arith.constant 0 : i32
    %c0_i32_1 = arith.constant 0 : i32
    return %c0_i32, %c0_i32_0 : i32, i32
  }
  func.func @transform_2(%arg0: i32) -> (i32, i32) {
    %c0_i32 = arith.constant 0 : i32
    %c0_i32_0 = arith.constant 0 : i32
    %c0_i32_1 = arith.constant 0 : i32
    return %c0_i32, %c0_i32_0 : i32, i32
  }
  func.func @transform_3(%arg0: i32) -> (i32, i32) {
    %c0_i32 = arith.constant 0 : i32
    %c0_i32_0 = arith.constant 0 : i32
    return %arg0, %c0_i32 : i32, i32
  }
}

module attributes {stable_mosaic.version = 11 : i64} {
  func.func @_conv_relu_pool_kernel(%arg0: i32, %arg1: memref<4x128x288xbf16, #tpu.memory_space<vmem>>, %arg2: memref<288x64xbf16, #tpu.memory_space<vmem>>, %arg3: memref<1x64xf32, #tpu.memory_space<vmem>>, %arg4: memref<128x64xbf16, #tpu.memory_space<vmem>>) attributes {dimension_semantics = [#tpu.dimension_semantics<parallel>], iteration_bounds = array<i64: 1>, scalar_prefetch = 0 : i64, scratch_operands = 0 : i64, tpu.core_type = #tpu.core_type<tc>, window_params = [{transform_indices = @transform_0, window_bounds = array<i64: 4, 128, 288>}, {pipeline_mode = #tpu.pipeline_mode<synchronous>, transform_indices = @transform_1, window_bounds = array<i64: 288, 64>}, {pipeline_mode = #tpu.pipeline_mode<synchronous>, transform_indices = @transform_2, window_bounds = array<i64: 1, 64>}, {transform_indices = @transform_3, window_bounds = array<i64: 128, 64>}]} {
    %c0 = arith.constant 0 : index
    %c0_0 = arith.constant 0 : index
    %0 = vector.load %arg2[%c0, %c0_0] : memref<288x64xbf16, #tpu.memory_space<vmem>>, vector<288x64xbf16>
    %c0_1 = arith.constant 0 : index
    %c0_2 = arith.constant 0 : index
    %c0_3 = arith.constant 0 : index
    %1 = vector.load %arg1[%c0_1, %c0_2, %c0_3] : memref<4x128x288xbf16, #tpu.memory_space<vmem>>, vector<1x128x288xbf16>
    %2 = vector.shape_cast %1 : vector<1x128x288xbf16> to vector<128x288xbf16>
    %cst = arith.constant dense<0.000000e+00> : vector<128x64xf32>
    %3 = tpu.matmul %2, %0, %cst {dimension_numbers = #tpu.dot_dimension_numbers<[1], [0], [0], [1], [0, 0, 1, 1], [], []>} : vector<128x288xbf16>, vector<288x64xbf16>, vector<128x64xf32> -> vector<128x64xf32>
    %c1 = arith.constant 1 : index
    %c0_4 = arith.constant 0 : index
    %c0_5 = arith.constant 0 : index
    %4 = vector.load %arg1[%c1, %c0_4, %c0_5] : memref<4x128x288xbf16, #tpu.memory_space<vmem>>, vector<1x128x288xbf16>
    %5 = vector.shape_cast %4 : vector<1x128x288xbf16> to vector<128x288xbf16>
    %cst_6 = arith.constant dense<0.000000e+00> : vector<128x64xf32>
    %6 = tpu.matmul %5, %0, %cst_6 {dimension_numbers = #tpu.dot_dimension_numbers<[1], [0], [0], [1], [0, 0, 1, 1], [], []>} : vector<128x288xbf16>, vector<288x64xbf16>, vector<128x64xf32> -> vector<128x64xf32>
    %7 = arith.maximumf %3, %6 : vector<128x64xf32>
    %c2 = arith.constant 2 : index
    %c0_7 = arith.constant 0 : index
    %c0_8 = arith.constant 0 : index
    %8 = vector.load %arg1[%c2, %c0_7, %c0_8] : memref<4x128x288xbf16, #tpu.memory_space<vmem>>, vector<1x128x288xbf16>
    %9 = vector.shape_cast %8 : vector<1x128x288xbf16> to vector<128x288xbf16>
    %cst_9 = arith.constant dense<0.000000e+00> : vector<128x64xf32>
    %10 = tpu.matmul %9, %0, %cst_9 {dimension_numbers = #tpu.dot_dimension_numbers<[1], [0], [0], [1], [0, 0, 1, 1], [], []>} : vector<128x288xbf16>, vector<288x64xbf16>, vector<128x64xf32> -> vector<128x64xf32>
    %c3 = arith.constant 3 : index
    %c0_10 = arith.constant 0 : index
    %c0_11 = arith.constant 0 : index
    %11 = vector.load %arg1[%c3, %c0_10, %c0_11] : memref<4x128x288xbf16, #tpu.memory_space<vmem>>, vector<1x128x288xbf16>
    %12 = vector.shape_cast %11 : vector<1x128x288xbf16> to vector<128x288xbf16>
    %cst_12 = arith.constant dense<0.000000e+00> : vector<128x64xf32>
    %13 = tpu.matmul %12, %0, %cst_12 {dimension_numbers = #tpu.dot_dimension_numbers<[1], [0], [0], [1], [0, 0, 1, 1], [], []>} : vector<128x288xbf16>, vector<288x64xbf16>, vector<128x64xf32> -> vector<128x64xf32>
    %14 = arith.maximumf %10, %13 : vector<128x64xf32>
    %15 = arith.maximumf %7, %14 : vector<128x64xf32>
    %c0_13 = arith.constant 0 : index
    %c0_14 = arith.constant 0 : index
    %16 = vector.load %arg3[%c0_13, %c0_14] : memref<1x64xf32, #tpu.memory_space<vmem>>, vector<1x64xf32>
    %17 = vector.broadcast %16 : vector<1x64xf32> to vector<128x64xf32>
    %18 = arith.addf %15, %17 : vector<128x64xf32>
    %cst_15 = arith.constant 0.000000e+00 : f32
    %19 = vector.broadcast %cst_15 : f32 to vector<128x64xf32>
    %20 = arith.maximumf %18, %19 : vector<128x64xf32>
    %21 = arith.truncf %20 : vector<128x64xf32> to vector<128x64xbf16>
    %c0_16 = arith.constant 0 : index
    %c0_17 = arith.constant 0 : index
    %22 = vector.load %arg4[%c0_16, %c0_17] : memref<128x64xbf16, #tpu.memory_space<vmem>>, vector<128x64xbf16>
    tpu.vector_store %arg4[%c0_16, %c0_17], %21 {strides = array<i32>} : memref<128x64xbf16, #tpu.memory_space<vmem>>, vector<128x64xbf16>,
    return
  }
  func.func @transform_0(%arg0: i32) -> (i32, i32, i32) {
    %c0_i32 = arith.constant 0 : i32
    %c0_i32_0 = arith.constant 0 : i32
    %c0_i32_1 = arith.constant 0 : i32
    return %c0_i32, %arg0, %c0_i32_0 : i32, i32, i32
  }
  func.func @transform_1(%arg0: i32) -> (i32, i32) {
    %c0_i32 = arith.constant 0 : i32
    %c0_i32_0 = arith.constant 0 : i32
    %c0_i32_1 = arith.constant 0 : i32
    return %c0_i32, %c0_i32_0 : i32, i32
  }
  func.func @transform_2(%arg0: i32) -> (i32, i32) {
    %c0_i32 = arith.constant 0 : i32
    %c0_i32_0 = arith.constant 0 : i32
    %c0_i32_1 = arith.constant 0 : i32
    return %c0_i32, %c0_i32_0 : i32, i32
  }
  func.func @transform_3(%arg0: i32) -> (i32, i32) {
    %c0_i32 = arith.constant 0 : i32
    %c0_i32_0 = arith.constant 0 : i32
    return %arg0, %c0_i32 : i32, i32
  }
}

module attributes {stable_mosaic.version = 11 : i64} {
  func.func @_conv_relu_pool_kernel(%arg0: i32, %arg1: memref<4x32x576xbf16, #tpu.memory_space<vmem>>, %arg2: memref<576x128xbf16, #tpu.memory_space<vmem>>, %arg3: memref<1x128xf32, #tpu.memory_space<vmem>>, %arg4: memref<32x128xbf16, #tpu.memory_space<vmem>>) attributes {dimension_semantics = [#tpu.dimension_semantics<parallel>], iteration_bounds = array<i64: 1>, scalar_prefetch = 0 : i64, scratch_operands = 0 : i64, tpu.core_type = #tpu.core_type<tc>, window_params = [{transform_indices = @transform_0, window_bounds = array<i64: 4, 32, 576>}, {pipeline_mode = #tpu.pipeline_mode<synchronous>, transform_indices = @transform_1, window_bounds = array<i64: 576, 128>}, {pipeline_mode = #tpu.pipeline_mode<synchronous>, transform_indices = @transform_2, window_bounds = array<i64: 1, 128>}, {transform_indices = @transform_3, window_bounds = array<i64: 32, 128>}]} {
    %c0 = arith.constant 0 : index
    %c0_0 = arith.constant 0 : index
    %0 = vector.load %arg2[%c0, %c0_0] : memref<576x128xbf16, #tpu.memory_space<vmem>>, vector<576x128xbf16>
    %c0_1 = arith.constant 0 : index
    %c0_2 = arith.constant 0 : index
    %c0_3 = arith.constant 0 : index
    %1 = vector.load %arg1[%c0_1, %c0_2, %c0_3] : memref<4x32x576xbf16, #tpu.memory_space<vmem>>, vector<1x32x576xbf16>
    %2 = vector.shape_cast %1 : vector<1x32x576xbf16> to vector<32x576xbf16>
    %cst = arith.constant dense<0.000000e+00> : vector<32x128xf32>
    %3 = tpu.matmul %2, %0, %cst {dimension_numbers = #tpu.dot_dimension_numbers<[1], [0], [0], [1], [0, 0, 1, 1], [], []>} : vector<32x576xbf16>, vector<576x128xbf16>, vector<32x128xf32> -> vector<32x128xf32>
    %c1 = arith.constant 1 : index
    %c0_4 = arith.constant 0 : index
    %c0_5 = arith.constant 0 : index
    %4 = vector.load %arg1[%c1, %c0_4, %c0_5] : memref<4x32x576xbf16, #tpu.memory_space<vmem>>, vector<1x32x576xbf16>
    %5 = vector.shape_cast %4 : vector<1x32x576xbf16> to vector<32x576xbf16>
    %cst_6 = arith.constant dense<0.000000e+00> : vector<32x128xf32>
    %6 = tpu.matmul %5, %0, %cst_6 {dimension_numbers = #tpu.dot_dimension_numbers<[1], [0], [0], [1], [0, 0, 1, 1], [], []>} : vector<32x576xbf16>, vector<576x128xbf16>, vector<32x128xf32> -> vector<32x128xf32>
    %7 = arith.maximumf %3, %6 : vector<32x128xf32>
    %c2 = arith.constant 2 : index
    %c0_7 = arith.constant 0 : index
    %c0_8 = arith.constant 0 : index
    %8 = vector.load %arg1[%c2, %c0_7, %c0_8] : memref<4x32x576xbf16, #tpu.memory_space<vmem>>, vector<1x32x576xbf16>
    %9 = vector.shape_cast %8 : vector<1x32x576xbf16> to vector<32x576xbf16>
    %cst_9 = arith.constant dense<0.000000e+00> : vector<32x128xf32>
    %10 = tpu.matmul %9, %0, %cst_9 {dimension_numbers = #tpu.dot_dimension_numbers<[1], [0], [0], [1], [0, 0, 1, 1], [], []>} : vector<32x576xbf16>, vector<576x128xbf16>, vector<32x128xf32> -> vector<32x128xf32>
    %c3 = arith.constant 3 : index
    %c0_10 = arith.constant 0 : index
    %c0_11 = arith.constant 0 : index
    %11 = vector.load %arg1[%c3, %c0_10, %c0_11] : memref<4x32x576xbf16, #tpu.memory_space<vmem>>, vector<1x32x576xbf16>
    %12 = vector.shape_cast %11 : vector<1x32x576xbf16> to vector<32x576xbf16>
    %cst_12 = arith.constant dense<0.000000e+00> : vector<32x128xf32>
    %13 = tpu.matmul %12, %0, %cst_12 {dimension_numbers = #tpu.dot_dimension_numbers<[1], [0], [0], [1], [0, 0, 1, 1], [], []>} : vector<32x576xbf16>, vector<576x128xbf16>, vector<32x128xf32> -> vector<32x128xf32>
    %14 = arith.maximumf %10, %13 : vector<32x128xf32>
    %15 = arith.maximumf %7, %14 : vector<32x128xf32>
    %c0_13 = arith.constant 0 : index
    %c0_14 = arith.constant 0 : index
    %16 = vector.load %arg3[%c0_13, %c0_14] : memref<1x128xf32, #tpu.memory_space<vmem>>, vector<1x128xf32>
    %17 = vector.broadcast %16 : vector<1x128xf32> to vector<32x128xf32>
    %18 = arith.addf %15, %17 : vector<32x128xf32>
    %cst_15 = arith.constant 0.000000e+00 : f32
    %19 = vector.broadcast %cst_15 : f32 to vector<32x128xf32>
    %20 = arith.maximumf %18, %19 : vector<32x128xf32>
    %21 = arith.truncf %20 : vector<32x128xf32> to vector<32x128xbf16>
    %c0_16 = arith.constant 0 : index
    %c0_17 = arith.constant 0 : index
    %22 = vector.load %arg4[%c0_16, %c0_17] : memref<32x128xbf16, #tpu.memory_space<vmem>>, vector<32x128xbf16>
    tpu.vector_store %arg4[%c0_16, %c0_17], %21 {strides = array<i32>} : memref<32x128xbf16, #tpu.memory_space<vmem>>, vector<32x128xbf16>,
    return
  }
  func.func @transform_0(%arg0: i32) -> (i32, i32, i32) {
    %c0_i32 = arith.constant 0 : i32
    %c0_i32_0 = arith.constant 0 : i32
    %c0_i32_1 = arith.constant 0 : i32
    return %c0_i32, %arg0, %c0_i32_0 : i32, i32, i32
  }
  func.func @transform_1(%arg0: i32) -> (i32, i32) {
    %c0_i32 = arith.constant 0 : i32
    %c0_i32_0 = arith.constant 0 : i32
    %c0_i32_1 = arith.constant 0 : i32
    return %c0_i32, %c0_i32_0 : i32, i32
  }
  func.func @transform_2(%arg0: i32) -> (i32, i32) {
    %c0_i32 = arith.constant 0 : i32
    %c0_i32_0 = arith.constant 0 : i32
    %c0_i32_1 = arith.constant 0 : i32
    return %c0_i32, %c0_i32_0 : i32, i32
  }
  func.func @transform_3(%arg0: i32) -> (i32, i32) {
    %c0_i32 = arith.constant 0 : i32
    %c0_i32_0 = arith.constant 0 : i32
    return %arg0, %c0_i32 : i32, i32
  }
}

module attributes {stable_mosaic.version = 11 : i64} {
  func.func @_fc_head_kernel(%arg0: i32, %arg1: memref<2x2048xbf16, #tpu.memory_space<vmem>>, %arg2: memref<2048x128xbf16, #tpu.memory_space<vmem>>, %arg3: memref<1x128xf32, #tpu.memory_space<vmem>>, %arg4: memref<128x128xbf16, #tpu.memory_space<vmem>>, %arg5: memref<1x128xf32, #tpu.memory_space<vmem>>, %arg6: memref<2x128xf32, #tpu.memory_space<vmem>>) attributes {dimension_semantics = [#tpu.dimension_semantics<parallel>], iteration_bounds = array<i64: 1>, scalar_prefetch = 0 : i64, scratch_operands = 0 : i64, tpu.core_type = #tpu.core_type<tc>, window_params = [{transform_indices = @transform_0, window_bounds = array<i64: 2, 2048>}, {pipeline_mode = #tpu.pipeline_mode<synchronous>, transform_indices = @transform_1, window_bounds = array<i64: 2048, 128>}, {pipeline_mode = #tpu.pipeline_mode<synchronous>, transform_indices = @transform_2, window_bounds = array<i64: 1, 128>}, {pipeline_mode = #tpu.pipeline_mode<synchronous>, transform_indices = @transform_3, window_bounds = array<i64: 128, 128>}, {pipeline_mode = #tpu.pipeline_mode<synchronous>, transform_indices = @transform_4, window_bounds = array<i64: 1, 128>}, {transform_indices = @transform_5, window_bounds = array<i64: 2, 128>}]} {
    %c0 = arith.constant 0 : index
    %c0_0 = arith.constant 0 : index
    %0 = vector.load %arg1[%c0, %c0_0] : memref<2x2048xbf16, #tpu.memory_space<vmem>>, vector<2x2048xbf16>
    %c0_1 = arith.constant 0 : index
    %c0_2 = arith.constant 0 : index
    %1 = vector.load %arg2[%c0_1, %c0_2] : memref<2048x128xbf16, #tpu.memory_space<vmem>>, vector<2048x128xbf16>
    %cst = arith.constant dense<0.000000e+00> : vector<2x128xf32>
    %2 = tpu.matmul %0, %1, %cst {dimension_numbers = #tpu.dot_dimension_numbers<[1], [0], [0], [1], [0, 0, 1, 1], [], []>} : vector<2x2048xbf16>, vector<2048x128xbf16>, vector<2x128xf32> -> vector<2x128xf32>
    %c0_3 = arith.constant 0 : index
    %c0_4 = arith.constant 0 : index
    %3 = vector.load %arg3[%c0_3, %c0_4] : memref<1x128xf32, #tpu.memory_space<vmem>>, vector<1x128xf32>
    %4 = vector.broadcast %3 : vector<1x128xf32> to vector<2x128xf32>
    %5 = arith.addf %2, %4 : vector<2x128xf32>
    %cst_5 = arith.constant 0.000000e+00 : f32
    %6 = vector.broadcast %cst_5 : f32 to vector<2x128xf32>
    %7 = arith.maximumf %5, %6 : vector<2x128xf32>
    %8 = arith.truncf %7 : vector<2x128xf32> to vector<2x128xbf16>
    %c0_6 = arith.constant 0 : index
    %c0_7 = arith.constant 0 : index
    %9 = vector.load %arg4[%c0_6, %c0_7] : memref<128x128xbf16, #tpu.memory_space<vmem>>, vector<128x128xbf16>
    %cst_8 = arith.constant dense<0.000000e+00> : vector<2x128xf32>
    %10 = tpu.matmul %8, %9, %cst_8 {dimension_numbers = #tpu.dot_dimension_numbers<[1], [0], [0], [1], [0, 0, 1, 1], [], []>} : vector<2x128xbf16>, vector<128x128xbf16>, vector<2x128xf32> -> vector<2x128xf32>
    %c0_9 = arith.constant 0 : index
    %c0_10 = arith.constant 0 : index
    %11 = vector.load %arg5[%c0_9, %c0_10] : memref<1x128xf32, #tpu.memory_space<vmem>>, vector<1x128xf32>
    %12 = vector.broadcast %11 : vector<1x128xf32> to vector<2x128xf32>
    %13 = arith.addf %10, %12 : vector<2x128xf32>
    %c0_11 = arith.constant 0 : index
    %c0_12 = arith.constant 0 : index
    %14 = vector.load %arg6[%c0_11, %c0_12] : memref<2x128xf32, #tpu.memory_space<vmem>>, vector<2x128xf32>
    tpu.vector_store %arg6[%c0_11, %c0_12], %13 {strides = array<i32>} : memref<2x128xf32, #tpu.memory_space<vmem>>, vector<2x128xf32>,
    return
  }
  func.func @transform_0(%arg0: i32) -> (i32, i32) {
    %c0_i32 = arith.constant 0 : i32
    %c0_i32_0 = arith.constant 0 : i32
    return %arg0, %c0_i32 : i32, i32
  }
  func.func @transform_1(%arg0: i32) -> (i32, i32) {
    %c0_i32 = arith.constant 0 : i32
    %c0_i32_0 = arith.constant 0 : i32
    %c0_i32_1 = arith.constant 0 : i32
    return %c0_i32, %c0_i32_0 : i32, i32
  }
  func.func @transform_2(%arg0: i32) -> (i32, i32) {
    %c0_i32 = arith.constant 0 : i32
    %c0_i32_0 = arith.constant 0 : i32
    %c0_i32_1 = arith.constant 0 : i32
    return %c0_i32, %c0_i32_0 : i32, i32
  }
  func.func @transform_3(%arg0: i32) -> (i32, i32) {
    %c0_i32 = arith.constant 0 : i32
    %c0_i32_0 = arith.constant 0 : i32
    %c0_i32_1 = arith.constant 0 : i32
    return %c0_i32, %c0_i32_0 : i32, i32
  }
  func.func @transform_4(%arg0: i32) -> (i32, i32) {
    %c0_i32 = arith.constant 0 : i32
    %c0_i32_0 = arith.constant 0 : i32
    %c0_i32_1 = arith.constant 0 : i32
    return %c0_i32, %c0_i32_0 : i32, i32
  }
  func.func @transform_5(%arg0: i32) -> (i32, i32) {
    %c0_i32 = arith.constant 0 : i32
    %c0_i32_0 = arith.constant 0 : i32
    return %arg0, %c0_i32 : i32, i32
  }
}

</mosaic_0001>

<bundles_post_ra>
// kernel: custom_cnn_forward.4
= control target key start
LH: loop header
LB: loop body
LE: loop exit
PB: predicated region body
PF: predicated region fallthrough
CT: control target
= control target key end

     0   :  { %vm110_vm0 = vcmask 1043456   ;;  %v801_v1 = vmov 0   ;;  %vm97_vm1 = vcmask 588800   ;;  %v582_v51 = vlaneseq  ;;  %s1053_s1 = inlined_call_operand.vmem [shape: bf16[72,256], index: 1, kind: input, shape index: {}]   ;;  %s1054_s0 = inlined_call_operand.vmem [shape: bf16[4,64,72], index: 0, kind: input, shape index: {}]   ;;  %s1055_s2 = inlined_call_operand.vmem [shape: f32[1,256], index: 2, kind: input, shape index: {}]   ;;  %s1056_s3 = inlined_call_operand.vmem [shape: bf16[64,256], index: 3, kind: output, shape index: {}]  }
   0x1   :  { %v23_v0 = vld [vmem:[%s1053_s1 + $0x40] sm:$0xff]  ;;  %149 = vmatprep.mubr.bf16.mxu0 %v801_v1  ;;  %263 = vmatprep.mubr.bf16.mxu1 %v801_v1  ;;  %v773_v4 = vld [vmem:[%s1053_s1 + $0x34] ss:$8 sps:$4 sm:$0xff]   ;;  %v775_v6 = vld [vmem:[%s1053_s1 + $0x30] ss:$8 sps:$4 sm:$0xff]  }
   0x2   :  { %v697_v2 = vcombine.high %v23_v0, %v23_v0  ;;  %v696_v3 = vcombine.low %v23_v0, %v23_v0  ;;  %v776_v7 = vld [vmem:[%s1053_s1 + $0x24] ss:$8 sps:$4 sm:$0xff]   ;;  %v778_v8 = vld [vmem:[%s1053_s1 + $0x20] ss:$8 sps:$4 sm:$0xff]   ;;  %v779_v9 = vld [vmem:[%s1053_s1 + $0x14] ss:$8 sps:$4 sm:$0xff]  }
   0x3   :  { %v781_v10 = vld [vmem:[%s1053_s1 + $0x10] ss:$8 sps:$4 sm:$0xff]   ;;  %v782_v11 = vld [vmem:[%s1053_s1 + $0x4] ss:$8 sps:$4 sm:$0xff]   ;;  %v784_v12 = vld [vmem:[%s1053_s1] ss:$8 sps:$4 sm:$0xff]  }
   0x4   :  { %698 = vmatprep.subr.msk.bf16.mxu0 %vm110_vm0, %v697_v2  ;;  %715 = vmatprep.subr.msk.bf16.mxu1 %vm110_vm0, %v697_v2  ;;  %v112_v5 = vsel %vm110_vm0, %v696_v3, 0  ;;  %v785_v13 = vld [vmem:[%s1054_s0] sm:$0xff]   ;;  %v787_v15 = vld [vmem:[%s1054_s0 + $0x8] sm:$0xff]   ;;  %v789_v17 = vld [vmem:[%s1054_s0 + $0x10] sm:$0xff]   ;;  %v583_v56 = vshrl.u32 %v582_v51, 7 }
   0x5   :  { %124 = vmatpush1.bf16.msra.mxu0 %v112_v5  ;;  %238 = vmatpush1.bf16.msra.mxu1 %v112_v5  ;;  %v786_v14 = vld [vmem:[%s1054_s0 + $0x20] sm:$0xff]   ;;  %v788_v16 = vld [vmem:[%s1054_s0 + $0x28] sm:$0xff]   ;;  %v790_v18 = vld [vmem:[%s1054_s0 + $0x30] sm:$0xff]  }
   0x6   :  { %125 = vmatprep.subr.bf16.mxu0 %v773_v4  ;;  %239 = vmatprep.subr.bf16.mxu1 %v773_v4  ;;  %v791_v19 = vld [vmem:[%s1054_s0 + $0x18] sm:$0xff]   ;;  %v793_v21 = vld [vmem:[%s1054_s0 + $0x40] sm:$0xff]   ;;  %v795_v23 = vld [vmem:[%s1054_s0 + $0x48] sm:$0xff]   ;;  %v584_v61 = vsub.s32 0, %v583_v56 }
   0x7   :  { %v792_v20 = vld [vmem:[%s1054_s0 + $0x38] sm:$0xff]   ;;  %v794_v22 = vld [vmem:[%s1054_s0 + $0x60] sm:$0xff]   ;;  %v796_v24 = vld [vmem:[%s1054_s0 + $0x68] sm:$0xff]  }
   0x8   :  { %v797_v25 = vld [vmem:[%s1054_s0 + $0x50] sm:$0xff]   ;;  %v799_v27 = vld [vmem:[%s1054_s0 + $0x58] sm:$0xff]   ;;  %v580_v0 = vld [vmem:[%s1055_s2] sm:$0x3] }
   0x9   :  { %126 = vmatpush1.bf16.msra.mxu0 %v775_v6  ;;  %240 = vmatpush1.bf16.msra.mxu1 %v775_v6  ;;  %v798_v26 = vld [vmem:[%s1054_s0 + $0x70] sm:$0xff]   ;;  %v800_v28 = vld [vmem:[%s1054_s0 + $0x78] sm:$0xff]  }
   0xa   :  { %127 = vmatprep.subr.bf16.mxu0 %v776_v7  ;;  %241 = vmatprep.subr.bf16.mxu1 %v776_v7 }
   0xd   :  { %128 = vmatpush1.bf16.msra.mxu0 %v778_v8  ;;  %242 = vmatpush1.bf16.msra.mxu1 %v778_v8 }
   0xe   :  { %129 = vmatprep.subr.bf16.mxu0 %v779_v9  ;;  %243 = vmatprep.subr.bf16.mxu1 %v779_v9 }
  0x11   :  { %130 = vmatpush1.bf16.msra.mxu0 %v781_v10  ;;  %244 = vmatpush1.bf16.msra.mxu1 %v781_v10 }
  0x12   :  { %131 = vmatprep.subr.bf16.mxu0 %v782_v11  ;;  %245 = vmatprep.subr.bf16.mxu1 %v782_v11 }
  0x15   :  { %132 = vmatpush1.bf16.msra.mxu0 %v784_v12  ;;  %246 = vmatpush1.bf16.msra.mxu1 %v784_v12 }
  0x16   :  { %732 = vmatprep.subr.msk.bf16.mxu0 %vm110_vm0, %v697_v2  ;;  %749 = vmatprep.subr.msk.bf16.mxu1 %vm110_vm0, %v697_v2 }
  0x18   :  { %699 = vmatmul.mubr.msk.bf16.vlgmr.msra.gmra.mxu0 %vm97_vm1, %v785_v13  ;;  %716 = vmatmul.mubr.msk.bf16.vlgmr.msra.gmra.mxu1 %vm97_vm1, %v786_v14 }
  0x19   :  { %368 = vmatpush1.bf16.msra.mxu0 %v112_v5  ;;  %482 = vmatpush1.bf16.msra.mxu1 %v112_v5 }
  0x1a   :  { %159 = vmatprep.mubr.bf16.mxu0 %v801_v1  ;;  %273 = vmatprep.mubr.bf16.mxu1 %v801_v1 }
  0x1b   :  { %369 = vmatprep.subr.bf16.mxu0 %v773_v4  ;;  %483 = vmatprep.subr.bf16.mxu1 %v773_v4 }
  0x1d   :  { %370 = vmatpush1.bf16.msra.mxu0 %v775_v6  ;;  %484 = vmatpush1.bf16.msra.mxu1 %v775_v6  ;;  %v985_v6 = vrot.slane %v580_v0, %v584_v61 }
  0x1e   :  { %371 = vmatprep.subr.bf16.mxu0 %v776_v7  ;;  %485 = vmatprep.subr.bf16.mxu1 %v776_v7 }
  0x20   :  { %700 = vmatmul.mubr.msk.bf16.gmra.mxu0 %vm97_vm1, %v787_v15  ;;  %717 = vmatmul.mubr.msk.bf16.gmra.mxu1 %vm97_vm1, %v788_v16 }
  0x21   :  { %372 = vmatpush1.bf16.msra.mxu0 %v778_v8  ;;  %486 = vmatpush1.bf16.msra.mxu1 %v778_v8 }
  0x22   :  { %169 = vmatprep.mubr.bf16.mxu0 %v801_v1  ;;  %283 = vmatprep.mubr.bf16.mxu1 %v801_v1 }
  0x23   :  { %373 = vmatprep.subr.bf16.mxu0 %v779_v9  ;;  %487 = vmatprep.subr.bf16.mxu1 %v779_v9 }
  0x25   :  { %374 = vmatpush1.bf16.msra.mxu0 %v781_v10  ;;  %488 = vmatpush1.bf16.msra.mxu1 %v781_v10 }
  0x26   :  { %375 = vmatprep.subr.bf16.mxu0 %v782_v11  ;;  %489 = vmatprep.subr.bf16.mxu1 %v782_v11 }
  0x28   :  { %701 = vmatmul.mubr.msk.bf16.gmra.mxu0 %vm97_vm1, %v789_v17  ;;  %718 = vmatmul.mubr.msk.bf16.gmra.mxu1 %vm97_vm1, %v790_v18 }
  0x29   :  { %179 = vmatprep.mubr.bf16.mxu0 %v801_v1  ;;  %293 = vmatprep.mubr.bf16.mxu1 %v801_v1 }
  0x2a   :  { %376 = vmatpush1.bf16.msra.mxu0 %v784_v12  ;;  %490 = vmatpush1.bf16.msra.mxu1 %v784_v12 }
  0x30   :  { %702 = vmatmul.mubr.msk.bf16.gmra.mxu0 %vm97_vm1, %v791_v19  ;;  %719 = vmatmul.mubr.msk.bf16.gmra.mxu1 %vm97_vm1, %v792_v20 }
  0x31   :  { %393 = vmatprep.mubr.bf16.mxu0 %v801_v1  ;;  %507 = vmatprep.mubr.bf16.mxu1 %v801_v1 }
  0x38   :  { %733 = vmatmul.mubr.msk.bf16.vlgmr.msra.gmra.mxu0 %vm97_vm1, %v793_v21  ;;  %750 = vmatmul.mubr.msk.bf16.vlgmr.msra.gmra.mxu1 %vm97_vm1, %v794_v22 }
  0x39   :  { %403 = vmatprep.mubr.bf16.mxu0 %v801_v1  ;;  %517 = vmatprep.mubr.bf16.mxu1 %v801_v1 }
  0x40   :  { %734 = vmatmul.mubr.msk.bf16.gmra.mxu0 %vm97_vm1, %v795_v23  ;;  %751 = vmatmul.mubr.msk.bf16.gmra.mxu1 %vm97_vm1, %v796_v24 }
  0x41   :  { %413 = vmatprep.mubr.bf16.mxu0 %v801_v1  ;;  %527 = vmatprep.mubr.bf16.mxu1 %v801_v1 }
  0x48   :  { %735 = vmatmul.mubr.msk.bf16.gmra.mxu0 %vm97_vm1, %v797_v25  ;;  %752 = vmatmul.mubr.msk.bf16.gmra.mxu1 %vm97_vm1, %v798_v26 }
  0x49   :  { %423 = vmatprep.mubr.bf16.mxu0 %v801_v1  ;;  %537 = vmatprep.mubr.bf16.mxu1 %v801_v1  ;;  %v588_v1 = vsub.s32 1, %v583_v56 }
  0x4b   :  { %v987_v12 = vrot.slane %v580_v0, %v588_v1 }
  0x50   :  { %736 = vmatmul.mubr.msk.bf16.gmra.mxu0 %vm97_vm1, %v799_v27  ;;  %753 = vmatmul.mubr.msk.bf16.gmra.mxu1 %vm97_vm1, %v800_v28 }
  0xd8   :  { %v151_v29 = vpop.f32.mrf.mxu0  ;;  %v265_v30 = vpop.f32.mrf.mxu1 }
  0xd9   :  { %v304_v4 = vmax.f32 %v151_v29, %v265_v30 }
  0xda   :  { %v153_v31 = vpop.f32.mrf.mxu0  ;;  %v267_v32 = vpop.f32.mrf.mxu1 }
  0xdb   :  { %v305_v9 = vmax.f32 %v153_v31, %v267_v32 }
  0xdc   :  { %v155_v33 = vpop.f32.mrf.mxu0  ;;  %v269_v34 = vpop.f32.mrf.mxu1 }
  0xdd   :  { %v306_v15 = vmax.f32 %v155_v33, %v269_v34 }
  0xde   :  { %v157_v35 = vpop.f32.mrf.mxu0  ;;  %v271_v36 = vpop.f32.mrf.mxu1 }
  0xdf   :  { %v307_v21 = vmax.f32 %v157_v35, %v271_v36 }
  0xe0   :  { %v934_v37 = vpop.f32.mrf.mxu0  ;;  %v936_v38 = vpop.f32.mrf.mxu1 }
  0xe1   :  { %v308_v25 = vmax.f32 %v934_v37, %v936_v38 }
  0xe2   :  { %v938_v39 = vpop.f32.mrf.mxu0  ;;  %v940_v40 = vpop.f32.mrf.mxu1 }
  0xe3   :  { %v309_v56 = vmax.f32 %v938_v39, %v940_v40 }
  0xe4   :  { %v942_v41 = vpop.f32.mrf.mxu0  ;;  %v944_v42 = vpop.f32.mrf.mxu1 }
  0xe5   :  { %v310_v38 = vmax.f32 %v942_v41, %v944_v42 }
  0xe6   :  { %v946_v43 = vpop.f32.mrf.mxu0  ;;  %v948_v44 = vpop.f32.mrf.mxu1 }
  0xe7   :  { %v311_v39 = vmax.f32 %v946_v43, %v948_v44 }
  0xe8   :  { %v950_v45 = vpop.f32.mrf.mxu0  ;;  %v952_v46 = vpop.f32.mrf.mxu1 }
  0xea   :  { %v954_v47 = vpop.f32.mrf.mxu0  ;;  %v956_v48 = vpop.f32.mrf.mxu1 }
  0xec   :  { %v958_v49 = vpop.f32.mrf.mxu0  ;;  %v960_v50 = vpop.f32.mrf.mxu1 }
  0xee   :  { %v962_v52 = vpop.f32.mrf.mxu0  ;;  %v964_v53 = vpop.f32.mrf.mxu1 }
  0xf0   :  { %v966_v54 = vpop.f32.mrf.mxu0  ;;  %v968_v55 = vpop.f32.mrf.mxu1 }
  0xf2   :  { %v970_v57 = vpop.f32.mrf.mxu0  ;;  %v972_v58 = vpop.f32.mrf.mxu1 }
  0xf4   :  { %v974_v59 = vpop.f32.mrf.mxu0  ;;  %v976_v60 = vpop.f32.mrf.mxu1 }
  0xf6   :  { %v978_v62 = vpop.f32.mrf.mxu0  ;;  %v980_v63 = vpop.f32.mrf.mxu1 }
  0xf8   :  { %v395_v2 = vpop.f32.mrf.mxu0  ;;  %v509_v3 = vpop.f32.mrf.mxu1 }
  0xf9   :  { %v548_v5 = vmax.f32 %v395_v2, %v509_v3 }
  0xfa   :  { %v397_v7 = vpop.f32.mrf.mxu0  ;;  %v511_v8 = vpop.f32.mrf.mxu1 }
  0xfb   :  { %v564_v10 = vmax.f32 %v304_v4, %v548_v5  ;;  %v549_v11 = vmax.f32 %v397_v7, %v511_v8 }
  0xfc   :  { %v399_v13 = vpop.f32.mrf.mxu0  ;;  %v513_v14 = vpop.f32.mrf.mxu1 }
  0xfd   :  { %v592_v16 = vadd.f32 %v985_v6, %v564_v10  ;;  %v565_v17 = vmax.f32 %v305_v9, %v549_v11  ;;  %v550_v18 = vmax.f32 %v399_v13, %v513_v14  ;;  %v312_v13 = vmax.f32 %v950_v45, %v952_v46 }
  0xfe   :  { %v401_v19 = vpop.f32.mrf.mxu0  ;;  %v515_v20 = vpop.f32.mrf.mxu1  ;;  %v314_v45 = vmax.f32 %v958_v49, %v960_v50  ;;  %v315_v49 = vmax.f32 %v962_v52, %v964_v53  ;;  %v317_v52 = vmax.f32 %v970_v57, %v972_v58 }
  0xff   :  { %v593_v22 = vadd.f32 %v987_v12, %v565_v17  ;;  %v566_v23 = vmax.f32 %v306_v15, %v550_v18  ;;  %v551_v24 = vmax.f32 %v401_v19, %v515_v20  ;;  %v608_v26 = vmax.f32 %v592_v16, 0.0 }
 0x100   :  { %v405_v27 = vpop.f32.mrf.mxu0  ;;  %v519_v28 = vpop.f32.mrf.mxu1  ;;  %v313_v19 = vmax.f32 %v954_v47, %v956_v48 }
 0x101   :  { %v609_v29 = vmax.f32 %v593_v22, 0.0  ;;  %v594_v30 = vadd.f32 %v985_v6, %v566_v23  ;;  %v567_v31 = vmax.f32 %v307_v21, %v551_v24  ;;  %v552_v32 = vmax.f32 %v405_v27, %v519_v28 }
 0x102   :  { %v407_v33 = vpop.f32.mrf.mxu0  ;;  %v521_v34 = vpop.f32.mrf.mxu1 }
 0x103   :  { %v762_v51 = vpack.c.bf16 %v609_v29, %v608_v26  ;;  %v595_v35 = vadd.f32 %v987_v12, %v567_v31  ;;  %v568_v36 = vmax.f32 %v308_v25, %v552_v32  ;;  %v553_v61 = vmax.f32 %v407_v33, %v521_v34 }
 0x104   :  { %v409_v0 = vpop.f32.mrf.mxu0  ;;  %v523_v37 = vpop.f32.mrf.mxu1  ;;  %v610_v1 = vmax.f32 %v594_v30, 0.0 }
 0x105   :  { %672 = vst [vmem:[%s1056_s3] sm:$0xff] %v762_v51  ;;  %v611_v2 = vmax.f32 %v595_v35, 0.0  ;;  %v554_v3 = vmax.f32 %v409_v0, %v523_v37  ;;  %v596_v4 = vadd.f32 %v985_v6, %v568_v36  ;;  %v569_v5 = vmax.f32 %v309_v56, %v553_v61 }
 0x106   :  { %v411_v7 = vpop.f32.mrf.mxu0  ;;  %v525_v8 = vpop.f32.mrf.mxu1  ;;  %v316_v51 = vmax.f32 %v966_v54, %v968_v55 }
 0x107   :  { %v763_v40 = vpack.c.bf16 %v611_v2, %v610_v1  ;;  %v570_v9 = vmax.f32 %v310_v38, %v554_v3  ;;  %v555_v10 = vmax.f32 %v411_v7, %v525_v8  ;;  %v597_v41 = vadd.f32 %v987_v12, %v569_v5 }
 0x108   :  { %v415_v42 = vpop.f32.mrf.mxu0  ;;  %v529_v11 = vpop.f32.mrf.mxu1  ;;  %v612_v17 = vmax.f32 %v596_v4, 0.0  ;;  %v318_v4 = vmax.f32 %v974_v59, %v976_v60 }
 0x109   :  { %673 = vst [vmem:[%s1056_s3 + $0x8] sm:$0xff] %v763_v40  ;;  %v598_v14 = vadd.f32 %v985_v6, %v570_v9  ;;  %v571_v15 = vmax.f32 %v311_v39, %v555_v10  ;;  %v556_v16 = vmax.f32 %v415_v42, %v529_v11  ;;  %v613_v43 = vmax.f32 %v597_v41, 0.0 }
 0x10a   :  { %v417_v44 = vpop.f32.mrf.mxu0  ;;  %v531_v18 = vpop.f32.mrf.mxu1  ;;  %v319_v9 = vmax.f32 %v978_v62, %v980_v63 }
 0x10b   :  { %v599_v20 = vadd.f32 %v987_v12, %v571_v15  ;;  %v572_v21 = vmax.f32 %v312_v13, %v556_v16  ;;  %v557_v22 = vmax.f32 %v417_v44, %v531_v18  ;;  %v764_v46 = vpack.c.bf16 %v613_v43, %v612_v17 }
 0x10c   :  { %v614_v23 = vmax.f32 %v598_v14, 0.0  ;;  %v419_v24 = vpop.f32.mrf.mxu0  ;;  %v533_v25 = vpop.f32.mrf.mxu1 }
 0x10d   :  { %v615_v26 = vmax.f32 %v599_v20, 0.0  ;;  %v600_v27 = vadd.f32 %v985_v6, %v572_v21  ;;  %v573_v28 = vmax.f32 %v313_v19, %v557_v22  ;;  %v558_v29 = vmax.f32 %v419_v24, %v533_v25  ;;  %674 = vst [vmem:[%s1056_s3 + $0x10] sm:$0xff] %v764_v46 }
 0x10e   :  { %v421_v47 = vpop.f32.mrf.mxu0  ;;  %v535_v48 = vpop.f32.mrf.mxu1 }
 0x10f   :  { %v765_v30 = vpack.c.bf16 %v615_v26, %v614_v23  ;;  %v601_v31 = vadd.f32 %v987_v12, %v573_v28  ;;  %v574_v32 = vmax.f32 %v314_v45, %v558_v29  ;;  %v559_v50 = vmax.f32 %v421_v47, %v535_v48 }
 0x110   :  { %v425_v33 = vpop.f32.mrf.mxu0  ;;  %v539_v34 = vpop.f32.mrf.mxu1  ;;  %v616_v35 = vmax.f32 %v600_v27, 0.0 }
 0x111   :  { %675 = vst [vmem:[%s1056_s3 + $0x18] sm:$0xff] %v765_v30  ;;  %v617_v36 = vmax.f32 %v601_v31, 0.0  ;;  %v560_v56 = vmax.f32 %v425_v33, %v539_v34  ;;  %v602_v61 = vadd.f32 %v985_v6, %v574_v32  ;;  %v575_v0 = vmax.f32 %v315_v49, %v559_v50 }
 0x112   :  { %v427_v37 = vpop.f32.mrf.mxu0  ;;  %v541_v38 = vpop.f32.mrf.mxu1 }
 0x113   :  { %v766_v53 = vpack.c.bf16 %v617_v36, %v616_v35  ;;  %v576_v1 = vmax.f32 %v316_v51, %v560_v56  ;;  %v561_v2 = vmax.f32 %v427_v37, %v541_v38  ;;  %v603_v54 = vadd.f32 %v987_v12, %v575_v0 }
 0x114   :  { %v429_v55 = vpop.f32.mrf.mxu0  ;;  %v543_v3 = vpop.f32.mrf.mxu1  ;;  %v618_v39 = vmax.f32 %v602_v61, 0.0 }
 0x115   :  { %676 = vst [vmem:[%s1056_s3 + $0x20] sm:$0xff] %v766_v53  ;;  %v604_v5 = vadd.f32 %v985_v6, %v576_v1  ;;  %v577_v7 = vmax.f32 %v317_v52, %v561_v2  ;;  %v562_v8 = vmax.f32 %v429_v55, %v543_v3  ;;  %v619_v57 = vmax.f32 %v603_v54, 0.0 }
 0x116   :  { %v431_v58 = vpop.f32.mrf.mxu0  ;;  %v545_v40 = vpop.f32.mrf.mxu1 }
 0x117   :  { %v605_v10 = vadd.f32 %v987_v12, %v577_v7  ;;  %v578_v41 = vmax.f32 %v318_v4, %v562_v8  ;;  %v563_v42 = vmax.f32 %v431_v58, %v545_v40  ;;  %v767_v59 = vpack.c.bf16 %v619_v57, %v618_v39 }
 0x118   :  { %v620_v60 = vmax.f32 %v604_v5, 0.0 }
 0x119   :  { %v621_v11 = vmax.f32 %v605_v10, 0.0  ;;  %v606_v13 = vadd.f32 %v985_v6, %v578_v41  ;;  %v579_v14 = vmax.f32 %v319_v9, %v563_v42  ;;  %677 = vst [vmem:[%s1056_s3 + $0x28] sm:$0xff] %v767_v59 }
 0x11b   :  { %v768_v15 = vpack.c.bf16 %v621_v11, %v620_v60  ;;  %v607_v16 = vadd.f32 %v987_v12, %v579_v14  ;;  %v622_v62 = vmax.f32 %v606_v13, 0.0 }
 0x11d   :  { %678 = vst [vmem:[%s1056_s3 + $0x30] sm:$0xff] %v768_v15  ;;  %v623_v63 = vmax.f32 %v607_v16, 0.0 }
 0x11f   :  { %v769_v17 = vpack.c.bf16 %v623_v63, %v622_v62 }
 0x121   :  { %679 = vst [vmem:[%s1056_s3 + $0x38] sm:$0xff] %v769_v17 }

// kernel: custom_cnn_forward.5
= control target key start
LH: loop header
LB: loop body
LE: loop exit
PB: predicated region body
PF: predicated region fallthrough
CT: control target
= control target key end

     0   :  { %vm311_vm0 = vcmask 261120   ;;  %vm1794_vm1 = vcmask 519168   ;;  %s3590_s1 = inlined_call_operand.vmem [shape: bf16[288,64], index: 1, kind: input, shape index: {}]   ;;  %s3591_s0 = inlined_call_operand.vmem [shape: bf16[4,128,288], index: 0, kind: input, shape index: {}]   ;;  %s3592_s2 = inlined_call_operand.vmem [shape: f32[1,64], index: 2, kind: input, shape index: {}]   ;;  %s3593_s3 = inlined_call_operand.vmem [shape: bf16[128,64], index: 3, kind: output, shape index: {}]  }
   0x1   :  { %v2651_v0 = vld [vmem:[%s3590_s1 + $0x78] sm:$0xff]   ;;  %v2656_v1 = vld [vmem:[%s3590_s1 + $0x88] sm:$0xff]   ;;  %v2668_v3 = vld [vmem:[%s3590_s1 + $0x70] sm:$0xff]  }
   0x2   :  { %2090 = vmatprep.subr.bf16.mxu0 %v2651_v0  ;;  %v2662_v2 = vld [vmem:[%s3590_s1 + $0x38] sm:$0xff]   ;;  %2386 = vmatprep.subr.bf16.mxu1 %v2656_v1  ;;  %v2675_v4 = vld [vmem:[%s3590_s1 + $0x80] sm:$0xff]   ;;  %v2681_v5 = vld [vmem:[%s3590_s1 + $0x30] sm:$0xff]  }
   0x3   :  { %2091 = vmatpush3.bf16.msra.mxu0 %v2662_v2  ;;  %2387 = vmatpush3.bf16.msra.mxu1 %v2656_v1  ;;  %v2488_v6 = vld [vmem:[%s3591_s0 + $0x8] ss:$12 sps:$4 sm:$0xff]   ;;  %v2490_v8 = vld [vmem:[%s3591_s0 + $0x20] ss:$12 sps:$4 sm:$0xff]   ;;  %v2494_v12 = vld [vmem:[%s3591_s0 + $0x38] ss:$12 sps:$4 sm:$0xff]  }
   0x4   :  { %2092 = vmatprep.subr.bf16.mxu0 %v2668_v3  ;;  %2388 = vmatprep.subr.bf16.mxu1 %v2675_v4  ;;  %v2690_v7 = vld [vmem:[%s3590_s1 + $0x68] sm:$0xff]   ;;  %v2708_v10 = vld [vmem:[%s3590_s1 + $0x60] sm:$0xff]   ;;  %v2726_v13 = vld [vmem:[%s3590_s1 + $0x58] sm:$0xff]  }
   0x5   :  { %2390 = vmatprep.mubr.msk.bf16.mxu1 %vm311_vm0, %v2488_v6  ;;  %v2702_v9 = vld [vmem:[%s3590_s1 + $0x28] sm:$0xff]   ;;  %v2714_v11 = vld [vmem:[%s3590_s1 + $0x20] sm:$0xff]   ;;  %v2496_v14 = vld [vmem:[%s3591_s0 + $0x50] ss:$12 sps:$4 sm:$0xff]  }
   0x6   :  { %v2737_v15 = vld [vmem:[%s3590_s1 + $0x18] sm:$0xff]   ;;  %v2744_v16 = vld [vmem:[%s3590_s1 + $0x50] sm:$0xff]   ;;  %v2762_v19 = vld [vmem:[%s3590_s1 + $0x48] sm:$0xff]  }
   0x7   :  { %2093 = vmatpush3.bf16.msra.mxu0 %v2681_v5  ;;  %2389 = vmatpush3.bf16.msra.mxu1 %v2675_v4  ;;  %v2500_v17 = vld [vmem:[%s3591_s0 + $0x68] ss:$12 sps:$4 sm:$0xff]   ;;  %v2502_v20 = vld [vmem:[%s3591_s0 + $0x80] ss:$12 sps:$4 sm:$0xff]   ;;  %v2508_v23 = vld [vmem:[%s3591_s0 + $0x4] ss:$12 sps:$4 sm:$0xff]  }
   0x8   :  { %2094 = vmatprep.subr.bf16.mxu0 %v2690_v7  ;;  %2164 = vmatprep.subr.bf16.mxu1 %v2651_v0  ;;  %v2755_v18 = vld [vmem:[%s3590_s1 + $0x10] sm:$0xff]   ;;  %v2771_v21 = vld [vmem:[%s3590_s1 + $0x8] sm:$0xff]   ;;  %v2778_v22 = vld [vmem:[%s3590_s1 + $0x40] sm:$0xff]  }
   0x9   :  { %v2509_v24 = vld [vmem:[%s3591_s0 + $0x98] ss:$12 sps:$4 sm:$0xff]   ;;  %368 = vmatprep.mubr.bf16.mxu0 %v2508_v23  ;;  %v2506_v26 = vld [vmem:[%s3591_s0] ss:$12 sps:$4 sm:$0xff]   ;;  %v2510_v27 = vld [vmem:[%s3591_s0 + $0xb0] ss:$12 sps:$4 sm:$0xff]  }
   0xa   :  { %2391 = vmatmul.mubr.msk.bf16.vlgmr.msra.gmra.mxu1 %vm311_vm0, %v2490_v8  ;;  %v2794_v25 = vld [vmem:[%s3590_s1] sm:$0xff]   ;;  %v2511_v28 = vld [vmem:[%s3591_s0 + $0x1c] ss:$12 sps:$4 sm:$0xff]   ;;  %v2523_v36 = vld [vmem:[%s3591_s0 + $0x4c] ss:$12 sps:$4 sm:$0xff]  }
   0xb   :  { %2095 = vmatpush3.bf16.msra.mxu0 %v2702_v9  ;;  %2165 = vmatpush3.bf16.msra.mxu1 %v2662_v2  ;;  %v2515_v29 = vld [vmem:[%s3591_s0 + $0xc4] ss:$12 sps:$4 sm:$0xff]   ;;  %v2513_v30 = vld [vmem:[%s3591_s0 + $0xc0] ss:$12 sps:$4 sm:$0xff]   ;;  %v2519_v33 = vld [vmem:[%s3591_s0 + $0xdc] ss:$12 sps:$4 sm:$0xff]  }
   0xc   :  { %2096 = vmatprep.subr.bf16.mxu0 %v2708_v10  ;;  %2166 = vmatprep.subr.bf16.mxu1 %v2668_v3  ;;  %v2516_v31 = vld [vmem:[%s3591_s0 + $0x18] ss:$12 sps:$4 sm:$0xff]   ;;  %v2517_v32 = vld [vmem:[%s3591_s0 + $0x34] ss:$12 sps:$4 sm:$0xff]   ;;  %v2521_v34 = vld [vmem:[%s3591_s0 + $0x30] ss:$12 sps:$4 sm:$0xff]  }
   0xd   :  { %2394 = vmatprep.mubr.msk.bf16.mxu1 %vm311_vm0, %v2494_v12  ;;  %v2522_v35 = vld [vmem:[%s3591_s0 + $0xd8] ss:$12 sps:$4 sm:$0xff]   ;;  %v2525_v37 = vld [vmem:[%s3591_s0 + $0xf4] ss:$12 sps:$4 sm:$0xff]   ;;  %v2528_v39 = vld [vmem:[%s3591_s0 + $0xf0] ss:$12 sps:$4 sm:$0xff]  }
   0xe   :  { %v2527_v38 = vld [vmem:[%s3591_s0 + $0x48] ss:$12 sps:$4 sm:$0xff]   ;;  %v2529_v40 = vld [vmem:[%s3591_s0 + $0x64] ss:$12 sps:$4 sm:$0xff]   ;;  %v2531_v41 = vld [vmem:[%s3591_s0 + $0x10c] ss:$12 sps:$4 sm:$0xff]  }
   0xf   :  { %2097 = vmatpush3.bf16.msra.mxu0 %v2714_v11  ;;  %2167 = vmatpush3.bf16.msra.mxu1 %v2681_v5  ;;  %v2533_v42 = vld [vmem:[%s3591_s0 + $0x60] ss:$12 sps:$4 sm:$0xff]   ;;  %v2534_v43 = vld [vmem:[%s3591_s0 + $0x108] ss:$12 sps:$4 sm:$0xff]   ;;  %v2537_v45 = vld [vmem:[%s3591_s0 + $0x124] ss:$12 sps:$4 sm:$0xff]  }
  0x10   :  { %2098 = vmatprep.subr.bf16.mxu0 %v2726_v13  ;;  %2168 = vmatprep.subr.bf16.mxu1 %v2690_v7  ;;  %v2535_v44 = vld [vmem:[%s3591_s0 + $0x7c] ss:$12 sps:$4 sm:$0xff]   ;;  %v2539_v46 = vld [vmem:[%s3591_s0 + $0x78] ss:$12 sps:$4 sm:$0xff]   ;;  %v2540_v47 = vld [vmem:[%s3591_s0 + $0x120] ss:$12 sps:$4 sm:$0xff]  }
  0x11   :  { %v2541_v48 = vld [vmem:[%s3591_s0 + $0x94] ss:$12 sps:$4 sm:$0xff]   ;;  %v2543_v49 = vld [vmem:[%s3591_s0 + $0x13c] ss:$12 sps:$4 sm:$0xff]   ;;  %v2546_v51 = vld [vmem:[%s3591_s0 + $0x138] ss:$12 sps:$4 sm:$0xff]  }
  0x12   :  { %2395 = vmatmul.mubr.msk.bf16.gmra.mxu1 %vm311_vm0, %v2496_v14  ;;  %v2545_v50 = vld [vmem:[%s3591_s0 + $0x90] ss:$12 sps:$4 sm:$0xff]   ;;  %v2547_v52 = vld [vmem:[%s3591_s0 + $0xac] ss:$12 sps:$4 sm:$0xff]   ;;  %v2549_v53 = vld [vmem:[%s3591_s0 + $0x154] ss:$12 sps:$4 sm:$0xff]  }
  0x13   :  { %2099 = vmatpush3.bf16.msra.mxu0 %v2737_v15  ;;  %2169 = vmatpush3.bf16.msra.mxu1 %v2702_v9  ;;  %v2551_v54 = vld [vmem:[%s3591_s0 + $0xa8] ss:$12 sps:$4 sm:$0xff]   ;;  %v2552_v55 = vld [vmem:[%s3591_s0 + $0x150] ss:$12 sps:$4 sm:$0xff]   ;;  %v2553_v56 = vld [vmem:[%s3591_s0 + $0x16c] ss:$12 sps:$4 sm:$0xff]  }
  0x14   :  { %2100 = vmatprep.subr.bf16.mxu0 %v2744_v16  ;;  %2170 = vmatprep.subr.bf16.mxu1 %v2708_v10  ;;  %v2555_v57 = vld [vmem:[%s3591_s0 + $0xc8] ss:$12 sps:$4 sm:$0xff]   ;;  %v2557_v59 = vld [vmem:[%s3591_s0 + $0xe0] ss:$12 sps:$4 sm:$0xff]   ;;  %v2558_v60 = vld [vmem:[%s3591_s0 + $0xf8] ss:$12 sps:$4 sm:$0xff]  }
  0x15   :  { %2398 = vmatprep.mubr.msk.bf16.mxu1 %vm311_vm0, %v2500_v17  ;;  %v2556_v58 = vld [vmem:[%s3591_s0 + $0x168] ss:$12 sps:$4 sm:$0xff]   ;;  %v2561_v61 = vld [vmem:[%s3591_s0 + $0x184] ss:$12 sps:$4 sm:$0xff]   ;;  %v2559_v62 = vld [vmem:[%s3591_s0 + $0x180] ss:$12 sps:$4 sm:$0xff]  }
  0x16   :  { %v2562_v63 = vld [vmem:[%s3591_s0 + $0x110] ss:$12 sps:$4 sm:$0xff]   ;;  %v2563_v6 = vld [vmem:[%s3591_s0 + $0x128] ss:$12 sps:$4 sm:$0xff]   ;;  %v2566_v12 = vld [vmem:[%s3591_s0 + $0x140] ss:$12 sps:$4 sm:$0xff]  }
  0x17   :  { %2101 = vmatpush3.bf16.msra.mxu0 %v2755_v18  ;;  %2171 = vmatpush3.bf16.msra.mxu1 %v2714_v11  ;;  %v2564_v8 = vld [vmem:[%s3591_s0 + $0x19c] ss:$12 sps:$4 sm:$0xff]   ;;  %v2567_v14 = vld [vmem:[%s3591_s0 + $0x198] ss:$12 sps:$4 sm:$0xff]   ;;  %v2569_v17 = vld [vmem:[%s3591_s0 + $0x1b4] ss:$12 sps:$4 sm:$0xff]  }
  0x18   :  { %2102 = vmatprep.subr.bf16.mxu0 %v2762_v19  ;;  %2172 = vmatprep.subr.bf16.mxu1 %v2726_v13  ;;  %v2572_v23 = vld [vmem:[%s3591_s0 + $0x1b0] ss:$12 sps:$4 sm:$0xff]  }
  0x1a   :  { %2399 = vmatmul.mubr.msk.bf16.gmra.mxu1 %vm311_vm0, %v2502_v20  ;;  %v2571_v20 = vld [vmem:[%s3591_s0 + $0x170] ss:$12 sps:$4 sm:$0xff]  }
  0x1b   :  { %2103 = vmatpush3.bf16.msra.mxu0 %v2771_v21  ;;  %2173 = vmatpush3.bf16.msra.mxu1 %v2737_v15 }
  0x1c   :  { %2104 = vmatprep.subr.bf16.mxu0 %v2778_v22  ;;  %2174 = vmatprep.subr.bf16.mxu1 %v2744_v16 }
  0x1d   :  { %2402 = vmatprep.mubr.msk.bf16.mxu1 %vm311_vm0, %v2509_v24  ;;  %v2573_v24 = vld [vmem:[%s3591_s0 + $0x1cc] ss:$12 sps:$4 sm:$0xff]  }
  0x1f   :  { %2105 = vmatpush3.bf16.msra.mxu0 %v2794_v25  ;;  %2175 = vmatpush3.bf16.msra.mxu1 %v2755_v18 }
  0x20   :  { %2176 = vmatprep.subr.bf16.mxu1 %v2762_v19  ;;  %2406 = vmatprep.subr.bf16.mxu0 %v2656_v1 }
  0x22   :  { %369 = vmatmul.mubr.bf16.vlgmr.msra.gmra.mxu0 %v2506_v26  ;;  %2403 = vmatmul.mubr.msk.bf16.gmra.mxu1 %vm311_vm0, %v2510_v27  ;;  %v2575_v26 = vld [vmem:[%s3591_s0 + $0x188] ss:$12 sps:$4 sm:$0xff]  }
  0x23   :  { %2177 = vmatpush3.bf16.msra.mxu1 %v2771_v21  ;;  %2407 = vmatpush3.bf16.msra.mxu0 %v2656_v1  ;;  %v2576_v27 = vld [vmem:[%s3591_s0 + $0x1c8] ss:$12 sps:$4 sm:$0xff]  }
  0x24   :  { %2178 = vmatprep.subr.bf16.mxu1 %v2778_v22  ;;  %376 = vmatprep.mubr.bf16.mxu0 %v2511_v28  ;;  %v2577_v28 = vld [vmem:[%s3591_s0 + $0x1a0] ss:$12 sps:$4 sm:$0xff]  }
  0x25   :  { %739 = vmatprep.mubr.bf16.mxu1 %v2515_v29  ;;  %2408 = vmatprep.subr.bf16.mxu0 %v2675_v4  ;;  %v2578_v29 = vld [vmem:[%s3591_s0 + $0x1e4] ss:$12 sps:$4 sm:$0xff]  }
  0x27   :  { %2179 = vmatpush3.bf16.msra.mxu1 %v2794_v25  ;;  %2409 = vmatpush3.bf16.msra.mxu0 %v2675_v4 }
  0x28   :  { %2238 = vmatprep.subr.bf16.mxu1 %v2651_v0  ;;  %2426 = vmatprep.subr.bf16.mxu0 %v2656_v1 }
  0x2a   :  { %377 = vmatmul.mubr.bf16.gmra.mxu0 %v2516_v31  ;;  %740 = vmatmul.mubr.bf16.vlgmr.msra.gmra.mxu1 %v2513_v30  ;;  %v2580_v30 = vld [vmem:[%s3591_s0 + $0x1b8] ss:$12 sps:$4 sm:$0xff]   ;;  %v2581_v31 = vld [vmem:[%s3591_s0 + $0x1e0] ss:$12 sps:$4 sm:$0xff]  }
  0x2b   :  { %384 = vmatprep.mubr.bf16.mxu0 %v2517_v32  ;;  %747 = vmatprep.mubr.bf16.mxu1 %v2519_v33  ;;  %v2582_v32 = vld [vmem:[%s3591_s0 + $0x1d0] ss:$12 sps:$4 sm:$0xff]   ;;  %v2593_v33 = vld [vmem:[%s3591_s0 + $0x22c] ss:$12 sps:$4 sm:$0xff]  }
  0x2c   :  { %2239 = vmatpush3.bf16.msra.mxu1 %v2662_v2 }
  0x2d   :  { %2240 = vmatprep.subr.bf16.mxu1 %v2668_v3 }
  0x30   :  { %2241 = vmatpush3.bf16.msra.mxu1 %v2681_v5 }
  0x31   :  { %2242 = vmatprep.subr.bf16.mxu1 %v2690_v7 }
  0x32   :  { %385 = vmatmul.mubr.bf16.gmra.mxu0 %v2521_v34  ;;  %748 = vmatmul.mubr.bf16.gmra.mxu1 %v2522_v35  ;;  %v2605_v34 = vld [vmem:[%s3591_s0 + $0x274] ss:$12 sps:$4 sm:$0xff]  }
  0x33   :  { %392 = vmatprep.mubr.bf16.mxu0 %v2523_v36  ;;  %755 = vmatprep.mubr.bf16.mxu1 %v2525_v37  ;;  %v2607_v35 = vld [vmem:[%s3591_s0 + $0x248] ss:$12 sps:$4 sm:$0xff]   ;;  %v2608_v36 = vld [vmem:[%s3591_s0 + $0x270] ss:$12 sps:$4 sm:$0xff]   ;;  %v2609_v37 = vld [vmem:[%s3591_s0 + $0x260] ss:$12 sps:$4 sm:$0xff]  }
  0x34   :  { %2243 = vmatpush3.bf16.msra.mxu1 %v2702_v9 }
  0x35   :  { %2244 = vmatprep.subr.bf16.mxu1 %v2708_v10 }
  0x38   :  { %2245 = vmatpush3.bf16.msra.mxu1 %v2714_v11 }
  0x39   :  { %2246 = vmatprep.subr.bf16.mxu1 %v2726_v13 }
  0x3a   :  { %393 = vmatmul.mubr.bf16.gmra.mxu0 %v2527_v38  ;;  %756 = vmatmul.mubr.bf16.gmra.mxu1 %v2528_v39  ;;  %v2610_v38 = vld [vmem:[%s3591_s0 + $0x28c] ss:$12 sps:$4 sm:$0xff]   ;;  %v2613_v39 = vld [vmem:[%s3591_s0 + $0x288] ss:$12 sps:$4 sm:$0xff]  }
  0x3b   :  { %400 = vmatprep.mubr.bf16.mxu0 %v2529_v40  ;;  %763 = vmatprep.mubr.bf16.mxu1 %v2531_v41  ;;  %v2615_v40 = vld [vmem:[%s3591_s0 + $0x2a4] ss:$12 sps:$4 sm:$0xff]   ;;  %v2617_v41 = vld [vmem:[%s3591_s0 + $0x2a8] ss:$12 sps:$4 sm:$0xff]  }
  0x3c   :  { %2247 = vmatpush3.bf16.msra.mxu1 %v2737_v15 }
  0x3d   :  { %2248 = vmatprep.subr.bf16.mxu1 %v2744_v16 }
  0x40   :  { %2249 = vmatpush3.bf16.msra.mxu1 %v2755_v18 }
  0x41   :  { %2250 = vmatprep.subr.bf16.mxu1 %v2762_v19 }
  0x42   :  { %401 = vmatmul.mubr.bf16.gmra.mxu0 %v2533_v42  ;;  %764 = vmatmul.mubr.bf16.gmra.mxu1 %v2534_v43  ;;  %v2618_v42 = vld [vmem:[%s3591_s0 + $0x2a0] ss:$12 sps:$4 sm:$0xff]  }
  0x43   :  { %408 = vmatprep.mubr.bf16.mxu0 %v2535_v44  ;;  %771 = vmatprep.mubr.bf16.mxu1 %v2537_v45  ;;  %v2619_v43 = vld [vmem:[%s3591_s0 + $0x2c0] ss:$12 sps:$4 sm:$0xff]   ;;  %v2620_v44 = vld [vmem:[%s3591_s0 + $0x2bc] ss:$12 sps:$4 sm:$0xff]   ;;  %v2622_v45 = vld [vmem:[%s3591_s0 + $0x2d8] ss:$12 sps:$4 sm:$0xff]  }
  0x44   :  { %2251 = vmatpush3.bf16.msra.mxu1 %v2771_v21 }
  0x45   :  { %2252 = vmatprep.subr.bf16.mxu1 %v2778_v22 }
  0x48   :  { %2253 = vmatpush3.bf16.msra.mxu1 %v2794_v25 }
  0x49   :  { %2466 = vmatprep.subr.bf16.mxu1 %v2651_v0 }
  0x4a   :  { %409 = vmatmul.mubr.bf16.gmra.mxu0 %v2539_v46  ;;  %772 = vmatmul.mubr.bf16.gmra.mxu1 %v2540_v47  ;;  %v2623_v46 = vld [vmem:[%s3591_s0 + $0x2b8] ss:$12 sps:$4 sm:$0xff]   ;;  %v2624_v47 = vld [vmem:[%s3591_s0 + $0x2f0] ss:$12 sps:$4 sm:$0xff]  }
  0x4b   :  { %416 = vmatprep.mubr.bf16.mxu0 %v2541_v48  ;;  %779 = vmatprep.mubr.bf16.mxu1 %v2543_v49  ;;  %v2625_v48 = vld [vmem:[%s3591_s0 + $0x2d4] ss:$12 sps:$4 sm:$0xff]  }
  0x52   :  { %417 = vmatmul.mubr.bf16.gmra.mxu0 %v2545_v50  ;;  %780 = vmatmul.mubr.bf16.gmra.mxu1 %v2546_v51 }
  0x53   :  { %424 = vmatprep.mubr.bf16.mxu0 %v2547_v52  ;;  %787 = vmatprep.mubr.bf16.mxu1 %v2549_v53  ;;  %v2627_v52 = vld [vmem:[%s3591_s0 + $0x2d0] ss:$12 sps:$4 sm:$0xff]  }
  0x5a   :  { %425 = vmatmul.mubr.bf16.gmra.mxu0 %v2551_v54  ;;  %788 = vmatmul.mubr.bf16.gmra.mxu1 %v2552_v55 }
  0x5b   :  { %795 = vmatprep.mubr.bf16.mxu1 %v2553_v56  ;;  %2410 = vmatprep.mubr.msk.bf16.mxu0 %vm311_vm0, %v2555_v57 }
  0x62   :  { %796 = vmatmul.mubr.bf16.gmra.mxu1 %v2556_v58  ;;  %2411 = vmatmul.mubr.msk.bf16.vlgmr.msra.gmra.mxu0 %vm311_vm0, %v2557_v59 }
  0x63   :  { %2427 = vmatpush3.bf16.msra.mxu0 %v2656_v1  ;;  %2414 = vmatprep.mubr.msk.bf16.mxu0 %vm311_vm0, %v2558_v60 }
  0x64   :  { %1126 = vmatprep.mubr.bf16.mxu1 %v2561_v61  ;;  %2428 = vmatprep.subr.bf16.mxu0 %v2675_v4 }
  0x67   :  { %2429 = vmatpush3.bf16.msra.mxu0 %v2675_v4 }
  0x68   :  { %2312 = vmatprep.subr.bf16.mxu0 %v2651_v0  ;;  %v2568_v0 = vld [vmem:[%s3591_s0 + $0x158] ss:$12 sps:$4 sm:$0xff]  }
  0x6a   :  { %2415 = vmatmul.mubr.msk.bf16.gmra.mxu0 %vm311_vm0, %v2562_v63  ;;  %1127 = vmatmul.mubr.bf16.vlgmr.msra.gmra.mxu1 %v2559_v62 }
  0x6b   :  { %2418 = vmatprep.mubr.msk.bf16.mxu0 %vm311_vm0, %v2563_v6  ;;  %1134 = vmatprep.mubr.bf16.mxu1 %v2564_v8 }
  0x6c   :  { %2474 = vmatpush3.bf16.msra.mxu1 %v2662_v2 }
  0x6d   :  { %2467 = vmatprep.subr.bf16.mxu1 %v2668_v3 }
  0x70   :  { %2475 = vmatpush3.bf16.msra.mxu1 %v2681_v5 }
  0x71   :  { %2468 = vmatprep.subr.bf16.mxu1 %v2690_v7 }
  0x72   :  { %2419 = vmatmul.mubr.msk.bf16.gmra.mxu0 %vm311_vm0, %v2566_v12  ;;  %1135 = vmatmul.mubr.bf16.gmra.mxu1 %v2567_v14 }
  0x73   :  { %2422 = vmatprep.mubr.msk.bf16.mxu0 %vm311_vm0, %v2568_v0  ;;  %1142 = vmatprep.mubr.bf16.mxu1 %v2569_v17 }
  0x74   :  { %2476 = vmatpush3.bf16.msra.mxu1 %v2702_v9 }
  0x75   :  { %2469 = vmatprep.subr.bf16.mxu1 %v2708_v10 }
  0x78   :  { %2477 = vmatpush3.bf16.msra.mxu1 %v2714_v11 }
  0x79   :  { %2470 = vmatprep.subr.bf16.mxu1 %v2726_v13 }
  0x7a   :  { %2423 = vmatmul.mubr.msk.bf16.gmra.mxu0 %vm311_vm0, %v2571_v20  ;;  %1143 = vmatmul.mubr.bf16.gmra.mxu1 %v2572_v23 }
  0x7b   :  { %1150 = vmatprep.mubr.bf16.mxu1 %v2573_v24  ;;  %2430 = vmatprep.mubr.msk.bf16.mxu0 %vm311_vm0, %v2575_v26 }
  0x7c   :  { %2478 = vmatpush3.bf16.msra.mxu1 %v2737_v15 }
  0x7d   :  { %2471 = vmatprep.subr.bf16.mxu1 %v2744_v16 }
  0x80   :  { %2479 = vmatpush3.bf16.msra.mxu1 %v2755_v18 }
  0x81   :  { %2472 = vmatprep.subr.bf16.mxu1 %v2762_v19 }
  0x82   :  { %1151 = vmatmul.mubr.bf16.gmra.mxu1 %v2576_v27  ;;  %2431 = vmatmul.mubr.msk.bf16.vlgmr.msra.gmra.mxu0 %vm311_vm0, %v2577_v28 }
  0x83   :  { %2313 = vmatpush3.bf16.msra.mxu0 %v2662_v2  ;;  %1158 = vmatprep.mubr.bf16.mxu1 %v2578_v29  ;;  %v2583_v2 = vld [vmem:[%s3591_s0 + $0x1fc] ss:$12 sps:$4 sm:$0xff]  }
  0x84   :  { %2314 = vmatprep.subr.bf16.mxu0 %v2668_v3  ;;  %2434 = vmatprep.mubr.msk.bf16.mxu0 %vm311_vm0, %v2580_v30  ;;  %v2585_v3 = vld [vmem:[%s3591_s0 + $0x1e8] ss:$12 sps:$4 sm:$0xff]  }
  0x85   :  { %2480 = vmatpush3.bf16.msra.mxu1 %v2771_v21 }
  0x86   :  { %2473 = vmatprep.subr.bf16.mxu1 %v2778_v22 }
  0x87   :  { %2315 = vmatpush3.bf16.msra.mxu0 %v2681_v5  ;;  %v2586_v5 = vld [vmem:[%s3591_s0 + $0x1f8] ss:$12 sps:$4 sm:$0xff]  }
  0x88   :  { %2316 = vmatprep.subr.bf16.mxu0 %v2690_v7  ;;  %v2587_v7 = vld [vmem:[%s3591_s0 + $0x200] ss:$12 sps:$4 sm:$0xff]  }
  0x89   :  { %2481 = vmatpush3.bf16.msra.mxu1 %v2794_v25 }
  0x8a   :  { %1159 = vmatmul.mubr.bf16.gmra.mxu1 %v2581_v31  ;;  %2435 = vmatmul.mubr.msk.bf16.gmra.mxu0 %vm311_vm0, %v2582_v32 }
  0x8b   :  { %2317 = vmatpush3.bf16.msra.mxu0 %v2702_v9  ;;  %1166 = vmatprep.mubr.bf16.mxu1 %v2583_v2  ;;  %v2588_v9 = vld [vmem:[%s3591_s0 + $0x214] ss:$12 sps:$4 sm:$0xff]  }
  0x8c   :  { %2318 = vmatprep.subr.bf16.mxu0 %v2708_v10  ;;  %2438 = vmatprep.mubr.msk.bf16.mxu0 %vm311_vm0, %v2585_v3  ;;  %v2590_v10 = vld [vmem:[%s3591_s0 + $0x218] ss:$12 sps:$4 sm:$0xff]  }
  0x8d   :  { %2446 = vmatprep.subr.bf16.mxu1 %v2656_v1 }
  0x8f   :  { %2319 = vmatpush3.bf16.msra.mxu0 %v2714_v11  ;;  %v2591_v11 = vld [vmem:[%s3591_s0 + $0x210] ss:$12 sps:$4 sm:$0xff]  }
  0x90   :  { %2320 = vmatprep.subr.bf16.mxu0 %v2726_v13  ;;  %v2592_v13 = vld [vmem:[%s3591_s0 + $0x230] ss:$12 sps:$4 sm:$0xff]  }
  0x92   :  { %1167 = vmatmul.mubr.bf16.gmra.mxu1 %v2586_v5  ;;  %2439 = vmatmul.mubr.msk.bf16.gmra.mxu0 %vm311_vm0, %v2587_v7 }
  0x93   :  { %2321 = vmatpush3.bf16.msra.mxu0 %v2737_v15  ;;  %1174 = vmatprep.mubr.bf16.mxu1 %v2588_v9  ;;  %v2597_v15 = vld [vmem:[%s3591_s0 + $0x244] ss:$12 sps:$4 sm:$0xff]  }
  0x94   :  { %2322 = vmatprep.subr.bf16.mxu0 %v2744_v16  ;;  %2442 = vmatprep.mubr.msk.bf16.mxu0 %vm311_vm0, %v2590_v10  ;;  %v2595_v16 = vld [vmem:[%s3591_s0 + $0x240] ss:$12 sps:$4 sm:$0xff]  }
  0x97   :  { %2323 = vmatpush3.bf16.msra.mxu0 %v2755_v18  ;;  %v2598_v18 = vld [vmem:[%s3591_s0 + $0x228] ss:$12 sps:$4 sm:$0xff]  }
  0x98   :  { %2324 = vmatprep.subr.bf16.mxu0 %v2762_v19  ;;  %v2599_v19 = vld [vmem:[%s3591_s0 + $0x25c] ss:$12 sps:$4 sm:$0xff]  }
  0x9a   :  { %1175 = vmatmul.mubr.bf16.gmra.mxu1 %v2591_v11  ;;  %2443 = vmatmul.mubr.msk.bf16.gmra.mxu0 %vm311_vm0, %v2592_v13 }
  0x9b   :  { %2325 = vmatpush3.bf16.msra.mxu0 %v2771_v21  ;;  %1182 = vmatprep.mubr.bf16.mxu1 %v2593_v33  ;;  %v2603_v21 = vld [vmem:[%s3591_s0 + $0x2ec] ss:$12 sps:$4 sm:$0xff]  }
  0x9c   :  { %2326 = vmatprep.subr.bf16.mxu0 %v2778_v22  ;;  %1497 = vmatprep.mubr.bf16.mxu0 %v2597_v15  ;;  %v2601_v22 = vld [vmem:[%s3591_s0 + $0x2e8] ss:$12 sps:$4 sm:$0xff]  }
  0x9f   :  { %2327 = vmatpush3.bf16.msra.mxu0 %v2794_v25  ;;  %v2604_v25 = vld [vmem:[%s3591_s0 + $0x258] ss:$12 sps:$4 sm:$0xff]  }
  0xa2   :  { %1183 = vmatmul.mubr.bf16.gmra.mxu1 %v2598_v18  ;;  %1498 = vmatmul.mubr.bf16.vlgmr.msra.gmra.mxu0 %v2595_v16 }
  0xa3   :  { %1505 = vmatprep.mubr.bf16.mxu0 %v2599_v19  ;;  %1553 = vmatprep.mubr.bf16.mxu1 %v2603_v21 }
  0xaa   :  { %1506 = vmatmul.mubr.bf16.gmra.mxu0 %v2604_v25  ;;  %1554 = vmatmul.mubr.bf16.vlgmr.msra.gmra.mxu1 %v2601_v22 }
  0xab   :  { %2447 = vmatpush3.bf16.msra.mxu1 %v2656_v1  ;;  %1513 = vmatprep.mubr.bf16.mxu0 %v2605_v34  ;;  %v2612_v1 = vld [vmem:[%s3591_s0 + $0x278] ss:$12 sps:$4 sm:$0xff]  }
  0xac   :  { %2448 = vmatprep.subr.bf16.mxu1 %v2675_v4  ;;  %2450 = vmatprep.mubr.msk.bf16.mxu1 %vm311_vm0, %v2607_v35 }
  0xaf   :  { %2449 = vmatpush3.bf16.msra.mxu1 %v2675_v4  ;;  %v2614_v4 = vld [vmem:[%s3591_s0 + $0x290] ss:$12 sps:$4 sm:$0xff]  }
  0xb2   :  { %1514 = vmatmul.mubr.bf16.gmra.mxu0 %v2608_v36  ;;  %2451 = vmatmul.mubr.msk.bf16.vlgmr.msra.gmra.mxu1 %vm311_vm0, %v2609_v37 }
  0xb3   :  { %1521 = vmatprep.mubr.bf16.mxu0 %v2610_v38  ;;  %2454 = vmatprep.mubr.msk.bf16.mxu1 %vm311_vm0, %v2612_v1 }
  0xba   :  { %1522 = vmatmul.mubr.bf16.gmra.mxu0 %v2613_v39  ;;  %2455 = vmatmul.mubr.msk.bf16.gmra.mxu1 %vm311_vm0, %v2614_v4 }
  0xbb   :  { %1529 = vmatprep.mubr.bf16.mxu0 %v2615_v40  ;;  %2458 = vmatprep.mubr.msk.bf16.mxu1 %vm311_vm0, %v2617_v41 }
  0xc2   :  { %1530 = vmatmul.mubr.bf16.gmra.mxu0 %v2618_v42  ;;  %2459 = vmatmul.mubr.msk.bf16.gmra.mxu1 %vm311_vm0, %v2619_v43 }
  0xc3   :  { %1537 = vmatprep.mubr.bf16.mxu0 %v2620_v44  ;;  %2462 = vmatprep.mubr.msk.bf16.mxu1 %vm311_vm0, %v2622_v45 }
  0xca   :  { %v2392_v49 = vpop.f32.mrf.mxu1  ;;  %1538 = vmatmul.mubr.bf16.gmra.mxu0 %v2623_v46  ;;  %2463 = vmatmul.mubr.msk.bf16.gmra.mxu1 %vm311_vm0, %v2624_v47 }
  0xcb   :  { %1545 = vmatprep.mubr.bf16.mxu0 %v2625_v48 }
  0xcc   :  { %v467_v50 = vpop.f32.mrf.mxu1 }
  0xce   :  { %v2393_v51 = vpop.f32.mrf.mxu1 }
  0xd0   :  { %v470_v53 = vpop.f32.mrf.mxu1 }
  0xd2   :  { %v2396_v54 = vpop.f32.mrf.mxu1  ;;  %1546 = vmatmul.mubr.bf16.gmra.mxu0 %v2627_v52 }
  0xd4   :  { %v483_v55 = vpop.f32.mrf.mxu1 }
  0xd6   :  { %v2397_v56 = vpop.f32.mrf.mxu1 }
  0xd8   :  { %v486_v57 = vpop.f32.mrf.mxu1 }
  0xda   :  { %v3154_v58 = vpop.f32.mrf.mxu1 }
  0xdc   :  { %v3156_v59 = vpop.f32.mrf.mxu1 }
  0xde   :  { %v3158_v60 = vpop.f32.mrf.mxu1 }
  0xe0   :  { %v3160_v61 = vpop.f32.mrf.mxu1 }
  0xe2   :  { %v2106_v62 = vpop.f32.mrf.mxu0  ;;  %v3162_v63 = vpop.f32.mrf.mxu1 }
  0xe4   :  { %v2107_v6 = vpop.f32.mrf.mxu0  ;;  %v3164_v8 = vpop.f32.mrf.mxu1 }
  0xe5   :  { %v2108_v12 = vadd.f32 %v2107_v6, %v2106_v62 }
  0xe6   :  { %v2109_v14 = vpop.f32.mrf.mxu0  ;;  %v3166_v0 = vpop.f32.mrf.mxu1 }
  0xe7   :  { %v3168_v17 = vadd.f32 %v2108_v12, %v467_v50 }
  0xe8   :  { %v2110_v20 = vpop.f32.mrf.mxu0  ;;  %v3170_v23 = vpop.f32.mrf.mxu1 }
  0xe9   :  { %v2111_v24 = vadd.f32 %v2110_v20, %v2109_v14 }
  0xea   :  { %v2112_v26 = vpop.f32.mrf.mxu0  ;;  %v2180_v27 = vpop.f32.mrf.mxu1 }
  0xeb   :  { %v3172_v28 = vadd.f32 %v2111_v24, %v470_v53 }
  0xec   :  { %v2113_v29 = vpop.f32.mrf.mxu0  ;;  %v2181_v30 = vpop.f32.mrf.mxu1 }
  0xed   :  { %v2114_v31 = vadd.f32 %v2113_v29, %v2112_v26  ;;  %v3174_v32 = vadd.f32 %v2181_v30, %v2180_v27 }
  0xee   :  { %v2115_v2 = vpop.f32.mrf.mxu0  ;;  %v2183_v3 = vpop.f32.mrf.mxu1 }
  0xef   :  { %v3176_v5 = vadd.f32 %v2392_v49, %v2114_v31 }
  0xf0   :  { %v2116_v7 = vpop.f32.mrf.mxu0  ;;  %v2184_v9 = vpop.f32.mrf.mxu1 }
  0xf1   :  { %v2117_v10 = vadd.f32 %v2116_v7, %v2115_v2  ;;  %v3178_v11 = vadd.f32 %v2184_v9, %v2183_v3 }
  0xf2   :  { %v2118_v13 = vpop.f32.mrf.mxu0  ;;  %v2186_v33 = vpop.f32.mrf.mxu1 }
  0xf3   :  { %v3180_v15 = vadd.f32 %v2393_v51, %v2117_v10 }
  0xf4   :  { %v2119_v16 = vpop.f32.mrf.mxu0  ;;  %v2187_v18 = vpop.f32.mrf.mxu1 }
  0xf5   :  { %v2120_v19 = vadd.f32 %v2119_v16, %v2118_v13  ;;  %v3182_v21 = vadd.f32 %v2187_v18, %v2186_v33 }
  0xf6   :  { %v2121_v22 = vpop.f32.mrf.mxu0  ;;  %v2189_v25 = vpop.f32.mrf.mxu1 }
  0xf7   :  { %v3184_v34 = vadd.f32 %v2120_v19, %v483_v55 }
  0xf8   :  { %v2122_v35 = vpop.f32.mrf.mxu0  ;;  %v2190_v36 = vpop.f32.mrf.mxu1 }
  0xf9   :  { %v2123_v37 = vadd.f32 %v2122_v35, %v2121_v22  ;;  %v3186_v38 = vadd.f32 %v2190_v36, %v2189_v25 }
  0xfa   :  { %v2124_v1 = vpop.f32.mrf.mxu0  ;;  %v2192_v39 = vpop.f32.mrf.mxu1 }
  0xfb   :  { %v3188_v4 = vadd.f32 %v2123_v37, %v486_v57 }
  0xfc   :  { %v2125_v40 = vpop.f32.mrf.mxu0  ;;  %v2193_v41 = vpop.f32.mrf.mxu1 }
  0xfd   :  { %v2126_v42 = vadd.f32 %v2125_v40, %v2124_v1  ;;  %v3190_v43 = vadd.f32 %v2193_v41, %v2192_v39 }
  0xfe   :  { %v2127_v44 = vpop.f32.mrf.mxu0  ;;  %v2195_v45 = vpop.f32.mrf.mxu1 }
  0xff   :  { %v3192_v46 = vadd.f32 %v2396_v54, %v2126_v42 }
 0x100   :  { %v2128_v47 = vpop.f32.mrf.mxu0  ;;  %v2196_v48 = vpop.f32.mrf.mxu1 }
 0x101   :  { %v2129_v49 = vadd.f32 %v2128_v47, %v2127_v44  ;;  %v3194_v50 = vadd.f32 %v2196_v48, %v2195_v45 }
 0x102   :  { %v2130_v51 = vpop.f32.mrf.mxu0  ;;  %v2198_v52 = vpop.f32.mrf.mxu1 }
 0x103   :  { %v3196_v53 = vadd.f32 %v2397_v56, %v2129_v49 }
 0x104   :  { %v2131_v55 = vpop.f32.mrf.mxu0  ;;  %v2199_v57 = vpop.f32.mrf.mxu1 }
 0x105   :  { %3612 = vst [vmem:[#allocation2_spill] sm:$0xff] %v3196_v53  ;;  %v2132_v62 = vadd.f32 %v2131_v55, %v2130_v51  ;;  %v3198_v6 = vadd.f32 %v2199_v57, %v2198_v52 }
 0x106   :  { %v2133_v12 = vpop.f32.mrf.mxu0  ;;  %v2201_v14 = vpop.f32.mrf.mxu1 }
 0x107   :  { %v3201_v20 = vadd.f32 %v2132_v62, %v3156_v59 }
 0x108   :  { %v2134_v54 = vpop.f32.mrf.mxu0  ;;  %v2202_v24 = vpop.f32.mrf.mxu1 }
 0x109   :  { %3613 = vst [vmem:[#allocation3_spill] sm:$0xff] %v3201_v20  ;;  %v2135_v26 = vadd.f32 %v2134_v54, %v2133_v12  ;;  %v3203_v27 = vadd.f32 %v2202_v24, %v2201_v14 }
 0x10a   :  { %v2136_v29 = vpop.f32.mrf.mxu0  ;;  %v2204_v30 = vpop.f32.mrf.mxu1 }
 0x10b   :  { %v3206_v56 = vadd.f32 %v2135_v26, %v3160_v61 }
 0x10c   :  { %v2137_v31 = vpop.f32.mrf.mxu0  ;;  %v2205_v2 = vpop.f32.mrf.mxu1 }
 0x10d   :  { %3614 = vst [vmem:[#allocation4_spill] sm:$0xff] %v3206_v56  ;;  %v2138_v3 = vadd.f32 %v2137_v31, %v2136_v29  ;;  %v3208_v7 = vadd.f32 %v2205_v2, %v2204_v30 }
 0x10e   :  { %v2139_v9 = vpop.f32.mrf.mxu0  ;;  %v2207_v10 = vpop.f32.mrf.mxu1 }
 0x10f   :  { %v3211_v59 = vadd.f32 %v3154_v58, %v2138_v3 }
 0x110   :  { %v2140_v13 = vpop.f32.mrf.mxu0  ;;  %v2208_v33 = vpop.f32.mrf.mxu1 }
 0x111   :  { %3615 = vst [vmem:[#allocation5_spill] sm:$0xff] %v3211_v59  ;;  %v2141_v16 = vadd.f32 %v2140_v13, %v2139_v9  ;;  %v3213_v18 = vadd.f32 %v2208_v33, %v2207_v10 }
 0x112   :  { %v2142_v19 = vpop.f32.mrf.mxu0  ;;  %v2210_v22 = vpop.f32.mrf.mxu1 }
 0x113   :  { %v3216_v61 = vadd.f32 %v3158_v60, %v2141_v16 }
 0x114   :  { %v2143_v25 = vpop.f32.mrf.mxu0  ;;  %v2211_v35 = vpop.f32.mrf.mxu1 }
 0x115   :  { %3616 = vst [vmem:[#allocation6_spill] sm:$0xff] %v3216_v61  ;;  %v2144_v36 = vadd.f32 %v2143_v25, %v2142_v19  ;;  %v2212_v37 = vadd.f32 %v2211_v35, %v2210_v22 }
 0x116   :  { %v2145_v1 = vpop.f32.mrf.mxu0  ;;  %v2213_v39 = vpop.f32.mrf.mxu1 }
 0x117   :  { %v3219_v40 = vadd.f32 %v2144_v36, %v3164_v8 }
 0x118   :  { %v2146_v58 = vpop.f32.mrf.mxu0  ;;  %v2214_v41 = vpop.f32.mrf.mxu1 }
 0x119   :  { %3617 = vst [vmem:[#allocation7_spill] sm:$0xff] %v3219_v40  ;;  %v2147_v42 = vadd.f32 %v2146_v58, %v2145_v1  ;;  %v2215_v44 = vadd.f32 %v2214_v41, %v2213_v39 }
 0x11a   :  { %v2148_v45 = vpop.f32.mrf.mxu0  ;;  %v2216_v47 = vpop.f32.mrf.mxu1 }
 0x11b   :  { %v3222_v48 = vadd.f32 %v2147_v42, %v3170_v23 }
 0x11c   :  { %v2149_v60 = vpop.f32.mrf.mxu0  ;;  %v2217_v49 = vpop.f32.mrf.mxu1 }
 0x11d   :  { %3618 = vst [vmem:[#allocation8_spill] sm:$0xff] %v3222_v48  ;;  %v2150_v51 = vadd.f32 %v2149_v60, %v2148_v45  ;;  %v3224_v52 = vadd.f32 %v2217_v49, %v2216_v47 }
 0x11e   :  { %v2151_v55 = vpop.f32.mrf.mxu0  ;;  %v2219_v57 = vpop.f32.mrf.mxu1 }
 0x11f   :  { %v3227_v62 = vadd.f32 %v3162_v63, %v2150_v51 }
 0x120   :  { %v2152_v8 = vpop.f32.mrf.mxu0  ;;  %v2220_v12 = vpop.f32.mrf.mxu1 }
 0x121   :  { %3619 = vst [vmem:[#allocation9_spill] sm:$0xff] %v3227_v62  ;;  %v2153_v14 = vadd.f32 %v2152_v8, %v2151_v55  ;;  %v3229_v54 = vadd.f32 %v2220_v12, %v2219_v57 }
 0x122   :  { %v2222_v24 = vpop.f32.mrf.mxu1  ;;  %v2412_v26 = vpop.f32.mrf.mxu0 }
 0x123   :  { %v3232_v23 = vadd.f32 %v3166_v0, %v2153_v14  ;;  %v3235_v29 = vadd.f32 %v2412_v26, %v3182_v21 }
 0x124   :  { %v2223_v30 = vpop.f32.mrf.mxu1  ;;  %v838_v31 = vpop.f32.mrf.mxu0 }
 0x125   :  { %3620 = vst [vmem:[#allocation10_spill] sm:$0xff] %v3232_v23  ;;  %v2224_v63 = vadd.f32 %v2223_v30, %v2222_v24  ;;  %v3240_v3 = vadd.f32 %v3174_v32, %v838_v31 }
 0x126   :  { %v2225_v9 = vpop.f32.mrf.mxu1  ;;  %v2413_v10 = vpop.f32.mrf.mxu0 }
 0x127   :  { %v3245_v0 = vadd.f32 %v2413_v10, %v3186_v38 }
 0x128   :  { %v2226_v33 = vpop.f32.mrf.mxu1  ;;  %v841_v21 = vpop.f32.mrf.mxu0 }
 0x129   :  { %v2227_v19 = vadd.f32 %v2226_v33, %v2225_v9  ;;  %v3250_v22 = vadd.f32 %v3178_v11, %v841_v21 }
 0x12a   :  { %v2416_v25 = vpop.f32.mrf.mxu0  ;;  %v2254_v32 = vpop.f32.mrf.mxu1 }
 0x12b   :  { %v3255_v36 = vadd.f32 %v2416_v25, %v3198_v6 }
 0x12c   :  { %v854_v1 = vpop.f32.mrf.mxu0  ;;  %v2255_v38 = vpop.f32.mrf.mxu1 }
 0x12d   :  { %v3260_v58 = vadd.f32 %v3190_v43, %v854_v1  ;;  %v3262_v41 = vadd.f32 %v2255_v38, %v2254_v32 }
 0x12e   :  { %v2417_v11 = vpop.f32.mrf.mxu0  ;;  %v2257_v42 = vpop.f32.mrf.mxu1 }
 0x12f   :  { %v3267_v47 = vadd.f32 %v2417_v11, %v3203_v27 }
 0x130   :  { %v857_v6 = vpop.f32.mrf.mxu0  ;;  %v2258_v60 = vpop.f32.mrf.mxu1 }
 0x131   :  { %3621 = vst [vmem:[#allocation11_spill] sm:$0xff] %v3267_v47  ;;  %v3272_v51 = vadd.f32 %v3194_v50, %v857_v6  ;;  %v3274_v43 = vadd.f32 %v2258_v60, %v2257_v42 }
 0x132   :  { %v2420_v55 = vpop.f32.mrf.mxu0  ;;  %v3276_v57 = vpop.f32.mrf.mxu1 }
 0x133   :  { %v3280_v12 = vadd.f32 %v2420_v55, %v2212_v37 }
 0x134   :  { %v870_v27 = vpop.f32.mrf.mxu0  ;;  %v3282_v14 = vpop.f32.mrf.mxu1 }
 0x135   :  { %3622 = vst [vmem:[#allocation12_spill] sm:$0xff] %v3280_v12  ;;  %v3287_v26 = vadd.f32 %v3208_v7, %v870_v27 }
 0x136   :  { %v2421_v50 = vpop.f32.mrf.mxu0  ;;  %v3289_v30 = vpop.f32.mrf.mxu1 }
 0x137   :  { %3623 = vst [vmem:[#allocation13_spill] sm:$0xff] %v3287_v26  ;;  %v3293_v9 = vadd.f32 %v2421_v50, %v2215_v44  ;;  %v2262_v26 = vadd.f32 %v3282_v14, %v3276_v57  ;;  %v3412_v57 = vld [vmem:[%s3592_s2] ss:$0 sm:$0xff] }
 0x138   :  { %v873_v10 = vpop.f32.mrf.mxu0  ;;  %v3295_v37 = vpop.f32.mrf.mxu1 }
 0x139   :  { %3624 = vst [vmem:[#allocation14_spill] sm:$0xff] %v3293_v9  ;;  %v3300_v21 = vadd.f32 %v3213_v18, %v873_v10 }
 0x13a   :  { %v2424_v25 = vpop.f32.mrf.mxu0  ;;  %v3302_v7 = vpop.f32.mrf.mxu1 }
 0x13b   :  { %3625 = vst [vmem:[#allocation15_spill] sm:$0xff] %v3300_v21  ;;  %v3306_v1 = vadd.f32 %v2424_v25, %v2224_v63 }
 0x13c   :  { %v886_v38 = vpop.f32.mrf.mxu0  ;;  %v3308_v44 = vpop.f32.mrf.mxu1 }
 0x13d   :  { %3626 = vst [vmem:[#allocation16_spill] sm:$0xff] %v3306_v1  ;;  %v3313_v42 = vadd.f32 %v3224_v52, %v886_v38 }
 0x13e   :  { %v2425_v6 = vpop.f32.mrf.mxu0  ;;  %v3315_v18 = vpop.f32.mrf.mxu1 }
 0x13f   :  { %3627 = vst [vmem:[#allocation17_spill] sm:$0xff] %v3313_v42  ;;  %v3319_v55 = vadd.f32 %v2425_v6, %v2227_v19 }
 0x140   :  { %v889_v27 = vpop.f32.mrf.mxu0  ;;  %v3321_v63 = vpop.f32.mrf.mxu1 }
 0x141   :  { %3628 = vst [vmem:[#allocation18_spill] sm:$0xff] %v3319_v55  ;;  %v3326_v10 = vadd.f32 %v3229_v54, %v889_v27 }
 0x142   :  { %v3328_v25 = vpop.f32.mrf.mxu1  ;;  %v2432_v52 = vpop.f32.mrf.mxu0 }
 0x143   :  { %3629 = vst [vmem:[#allocation19_spill] sm:$0xff] %v3326_v10 }
 0x144   :  { %v3332_v33 = vpop.f32.mrf.mxu1  ;;  %v1225_v60 = vpop.f32.mrf.mxu0 }
 0x146   :  { %v3334_v19 = vpop.f32.mrf.mxu1  ;;  %v2433_v6 = vpop.f32.mrf.mxu0 }
 0x148   :  { %v3336_v24 = vpop.f32.mrf.mxu1  ;;  %v3338_v32 = vpop.f32.mrf.mxu0 }
 0x14a   :  { %v3340_v50 = vpop.f32.mrf.mxu1  ;;  %v3342_v54 = vpop.f32.mrf.mxu0 }
 0x14c   :  { %v3344_v27 = vpop.f32.mrf.mxu1  ;;  %v3346_v11 = vpop.f32.mrf.mxu0 }
 0x14e   :  { %v3348_v31 = vpop.f32.mrf.mxu1  ;;  %v3350_v38 = vpop.f32.mrf.mxu0 }
 0x14f   :  { %3630 = vst [vmem:[#allocation20_spill] sm:$0xff] %v3348_v31  ;;  %v1226_v31 = vadd.f32 %v3262_v41, %v1225_v60 }
 0x150   :  { %v3352_v49 = vpop.f32.mrf.mxu1  ;;  %v3354_v8 = vpop.f32.mrf.mxu0 }
 0x151   :  { %3631 = vst [vmem:[#allocation21_spill] sm:$0xff] %v3352_v49 }
 0x152   :  { %v3356_v39 = vpop.f32.mrf.mxu1  ;;  %v3358_v45 = vpop.f32.mrf.mxu0 }
 0x153   :  { %3632 = vst [vmem:[#allocation22_spill] sm:$0xff] %v3356_v39  ;;  %3633 = vst [vmem:[#allocation23_spill] sm:$0xff] %v3358_v45 }
 0x154   :  { %v3360_v35 = vpop.f32.mrf.mxu1  ;;  %v3362_v16 = vpop.f32.mrf.mxu0 }
 0x155   :  { %3634 = vst [vmem:[#allocation24_spill] sm:$0xff] %v3360_v35 }
 0x156   :  { %v3364_v13 = vpop.f32.mrf.mxu1  ;;  %v3366_v2 = vpop.f32.mrf.mxu0 }
 0x157   :  { %3635 = vst [vmem:[#allocation25_spill] sm:$0xff] %v3364_v13  ;;  %3636 = vst [vmem:[#allocation26_spill] sm:$0xff] %v3366_v2 }
 0x158   :  { %v3368_v10 = vpop.f32.mrf.mxu1  ;;  %v3370_v48 = vpop.f32.mrf.mxu0 }
 0x159   :  { %3637 = vst [vmem:[#allocation27_spill] sm:$0xff] %v3368_v10  ;;  %3638 = vst [vmem:[#allocation28_spill] sm:$0xff] %v3370_v48 }
 0x15a   :  { %v3372_v42 = vpop.f32.mrf.mxu1  ;;  %v3374_v40 = vpop.f32.mrf.mxu0 }
 0x15b   :  { %3639 = vst [vmem:[#allocation29_spill] sm:$0xff] %v3372_v42  ;;  %3640 = vst [vmem:[#allocation30_spill] sm:$0xff] %v3374_v40 }
 0x15c   :  { %v3376_v9 = vpop.f32.mrf.mxu1  ;;  %v3378_v61 = vpop.f32.mrf.mxu0 }
 0x15d   :  { %3641 = vst [vmem:[#allocation31_spill] sm:$0xff] %v3376_v9  ;;  %3642 = vst [vmem:[#allocation32_spill] sm:$0xff] %v3378_v61 }
 0x15e   :  { %v3380_v55 = vpop.f32.mrf.mxu1  ;;  %v3382_v23 = vpop.f32.mrf.mxu0 }
 0x15f   :  { %3643 = vst [vmem:[#allocation33_spill] sm:$0xff] %v3380_v55  ;;  %3644 = vst [vmem:[#allocation34_spill] sm:$0xff] %v3382_v23 }
 0x160   :  { %v3384_v12 = vpop.f32.mrf.mxu1  ;;  %v3386_v59 = vpop.f32.mrf.mxu0 }
 0x161   :  { %3645 = vst [vmem:[#allocation35_spill] sm:$0xff] %v3384_v12  ;;  %3646 = vst [vmem:[#allocation36_spill] sm:$0xff] %v3386_v59 }
 0x162   :  { %v3388_v2 = vpop.f32.mrf.mxu1  ;;  %v2328_v21 = vpop.f32.mrf.mxu0 }
 0x164   :  { %v3390_v56 = vpop.f32.mrf.mxu1  ;;  %v2329_v42 = vpop.f32.mrf.mxu0 }
 0x165   :  { %v2330_v35 = vadd.f32 %v2329_v42, %v2328_v21 }
 0x166   :  { %v3392_v10 = vpop.f32.mrf.mxu1  ;;  %v2331_v13 = vpop.f32.mrf.mxu0 }
 0x167   :  { %3647 = vst [vmem:[#allocation37_spill] sm:$0xff] %v3392_v10 }
 0x168   :  { %v3394_v9 = vpop.f32.mrf.mxu1  ;;  %v2332_v61 = vpop.f32.mrf.mxu0 }
 0x169   :  { %3648 = vst [vmem:[#allocation38_spill] sm:$0xff] %v3394_v9  ;;  %v1234_v9 = vadd.f32 %v2432_v52, %v2262_v26  ;;  %v2333_v21 = vadd.f32 %v2332_v61, %v2331_v13  ;;  %v2268_v61 = vadd.f32 %v3308_v44, %v3302_v7 }
 0x16a   :  { %v2334_v1 = vpop.f32.mrf.mxu0  ;;  %v3396_v55 = vpop.f32.mrf.mxu1 }
 0x16b   :  { %3649 = vst [vmem:[#allocation39_spill] sm:$0xff] %v3396_v55  ;;  %v2265_v55 = vadd.f32 %v3295_v37, %v3289_v30 }
 0x16c   :  { %v2335_v62 = vpop.f32.mrf.mxu0  ;;  %v3398_v23 = vpop.f32.mrf.mxu1 }
 0x16d   :  { %3650 = vst [vmem:[#allocation40_spill] sm:$0xff] %v3398_v23  ;;  %v2336_v20 = vadd.f32 %v2335_v62, %v2334_v1  ;;  %v1237_v26 = vadd.f32 %v2433_v6, %v2265_v55 }
 0x16e   :  { %v2337_v12 = vpop.f32.mrf.mxu0  ;;  %v3400_v59 = vpop.f32.mrf.mxu1 }
 0x16f   :  { %3651 = vst [vmem:[#allocation41_spill] sm:$0xff] %v3400_v59 }
 0x170   :  { %v2338_v45 = vpop.f32.mrf.mxu0  ;;  %v3402_v48 = vpop.f32.mrf.mxu1 }
 0x171   :  { %v2339_v59 = vadd.f32 %v2338_v45, %v2337_v12  ;;  %v2274_v12 = vadd.f32 %v3332_v33, %v3328_v25 }
 0x172   :  { %v2340_v10 = vpop.f32.mrf.mxu0  ;;  %v2452_v40 = vpop.f32.mrf.mxu1 }
 0x173   :  { %v1605_v39 = vadd.f32 %v2452_v40, %v2336_v20  ;;  %v3652_v20 = vmax.f32 %v3176_v5, %v3235_v29  ;;  %v1250_v25 = vadd.f32 %v3342_v54, %v2274_v12 }
 0x174   :  { %v2341_v49 = vpop.f32.mrf.mxu0  ;;  %v1596_v23 = vpop.f32.mrf.mxu1 }
 0x175   :  { %v1661_v47 = vmax.f32 %v1234_v9, %v1605_v39  ;;  %v1597_v53 = vadd.f32 %v2330_v35, %v1596_v23  ;;  %v3653_v23 = vmax.f32 %v3168_v17, %v3240_v3  ;;  %v1229_v9 = vadd.f32 %v3274_v43, %v3338_v32 }
 0x176   :  { %v2343_v62 = vpop.f32.mrf.mxu0  ;;  %v2453_v14 = vpop.f32.mrf.mxu1  ;;  %v3654_v17 = vmax.f32 %v3180_v15, %v3245_v0  ;;  %v2277_v43 = vadd.f32 %v3336_v24, %v3334_v19  ;;  %v1242_v15 = vadd.f32 %v2268_v61, %v3346_v11  ;;  %v3655_v0 = vmax.f32 %v3172_v28, %v3250_v22 }
 0x177   :  { %v1677_v40 = vmax.f32 %v3652_v20, %v1661_v47  ;;  %v1659_v30 = vmax.f32 %v1226_v31, %v1597_v53  ;;  %v1608_v37 = vadd.f32 %v2453_v14, %v2339_v59  ;;  %v2271_v47 = vadd.f32 %v3321_v63, %v3315_v18 }
 0x178   :  { %v2344_v1 = vpop.f32.mrf.mxu0  ;;  %v1599_v41 = vpop.f32.mrf.mxu1  ;;  %v2342_v31 = vadd.f32 %v2341_v49, %v2340_v10 }
 0x179   :  { %v1700_v39 = vadd.f32 %v3412_v57, %v1677_v40  ;;  %v1675_v35 = vmax.f32 %v3653_v23, %v1659_v30  ;;  %v1662_v45 = vmax.f32 %v1237_v26, %v1608_v37  ;;  %v1600_v5 = vadd.f32 %v2333_v21, %v1599_v41 }
 0x17a   :  { %v2346_v53 = vpop.f32.mrf.mxu0  ;;  %v2456_v59 = vpop.f32.mrf.mxu1  ;;  %v2345_v19 = vadd.f32 %v2344_v1, %v2343_v62  ;;  %v1245_v54 = vadd.f32 %v2271_v47, %v3354_v8  ;;  %v2280_v62 = vadd.f32 %v3344_v27, %v3340_v50  ;;  %v3656_v8 = vmax.f32 %v3184_v34, %v3260_v58  ;;  %v3660_v47 = vld [vmem:[#allocation11_spill] sm:$0xff] }
 0x17b   :  { %v1716_v29 = vmax.f32 %v1700_v39, 0.0  ;;  %v1698_v13 = vadd.f32 %v3412_v57, %v1675_v35  ;;  %v1678_v3 = vmax.f32 %v3654_v17, %v1662_v45  ;;  %v1660_v33 = vmax.f32 %v1229_v9, %v1600_v5 }
 0x17c   :  { %v2347_v32 = vpop.f32.mrf.mxu0  ;;  %v1612_v42 = vpop.f32.mrf.mxu1  ;;  %v1253_v39 = vadd.f32 %v3350_v38, %v2277_v43  ;;  %v3657_v23 = vmax.f32 %v3192_v46, %v3255_v36  ;;  %v3658_v38 = vmax.f32 %v3188_v4, %v3272_v51  ;;  %v1258_v61 = vadd.f32 %v2280_v62, %v3362_v16 }
 0x17d   :  { %v2076_v60 = vpack.c.bf16 %v1716_v29, %v1716_v29  ;;  %v1714_v55 = vmax.f32 %v1698_v13, 0.0  ;;  %v1701_v7 = vadd.f32 %v3412_v57, %v1678_v3  ;;  %v2348_v44 = vadd.f32 %v2347_v32, %v2346_v53  ;;  %v3659_v3 = vld [vmem:[#allocation2_spill] sm:$0xff]  ;;  %v3665_v32 = vld [vmem:[#allocation40_spill] sm:$0xff] }
 0x17e   :  { %v1676_v18 = vmax.f32 %v3655_v0, %v1660_v33  ;;  %v1613_v63 = vadd.f32 %v2342_v31, %v1612_v42  ;;  %v2349_v52 = vpop.f32.mrf.mxu0  ;;  %v2457_v24 = vpop.f32.mrf.mxu1  ;;  %v2298_v46 = vadd.f32 %v3390_v56, %v3388_v2  ;;  %v3661_v4 = vmax.f32 %v3659_v3, %v3660_v47  ;;  %v3662_v31 = vld [vmem:[#allocation20_spill] sm:$0xff]  ;;  %v3663_v33 = vld [vmem:[#allocation21_spill] sm:$0xff]  ;;  %v3664_v2 = vld [vmem:[#allocation39_spill] sm:$0xff] }
 0x17f   :  { %1797 = vst.msk [vmem:[%s3593_s3 + $0x8] sm:$0xf] %vm1794_vm1, %v2076_v60  ;;  %v2074_v49 = vpack.c.bf16 %v1714_v55, %v1714_v55  ;;  %v1717_v10 = vmax.f32 %v1701_v7, 0.0  ;;  %v1621_v6 = vadd.f32 %v2456_v59, %v2348_v44  ;;  %v2283_v56 = vadd.f32 %v3663_v33, %v3662_v31  ;;  %v3681_v47 = vld [vmem:[#allocation25_spill] sm:$0xff] }
 0x180   :  { %v1699_v11 = vadd.f32 %v3412_v57, %v1676_v18  ;;  %v1663_v14 = vmax.f32 %v1242_v15, %v1613_v63  ;;  %v2350_v26 = vpop.f32.mrf.mxu0  ;;  %v1615_v28 = vpop.f32.mrf.mxu1  ;;  %v2372_v42 = vadd.f32 %v3665_v32, %v3664_v2  ;;  %v3666_v18 = vld [vmem:[#allocation22_spill] sm:$0xff]  ;;  %v3667_v63 = vld [vmem:[#allocation24_spill] sm:$0xff] }
 0x181   :  { %1795 = vst.msk [vmem:[%s3593_s3] sm:$0xf] %vm1794_vm1, %v2074_v49  ;;  %v2077_v22 = vpack.c.bf16 %v1717_v10, %v1717_v10  ;;  %v1665_v20 = vmax.f32 %v1250_v25, %v1621_v6  ;;  %v2351_v40 = vadd.f32 %v2350_v26, %v2349_v52  ;;  %v1616_v30 = vadd.f32 %v2345_v19, %v1615_v28  ;;  %v3669_v10 = vld [vmem:[#allocation37_spill] sm:$0xff]  ;;  %v3670_v19 = vld [vmem:[#allocation38_spill] sm:$0xff] }
 0x182   :  { %v1715_v37 = vmax.f32 %v1699_v11, 0.0  ;;  %v1679_v21 = vmax.f32 %v3656_v8, %v1663_v14  ;;  %v2352_v1 = vpop.f32.mrf.mxu0  ;;  %v3456_v41 = vpop.f32.mrf.mxu1  ;;  %v2286_v52 = vadd.f32 %v3667_v63, %v3666_v18  ;;  %v2301_v6 = vadd.f32 %v3670_v19, %v3669_v10  ;;  %v3688_v18 = vld [vmem:[#allocation5_spill] sm:$0xff]  ;;  %v3689_v63 = vld [vmem:[#allocation12_spill] sm:$0xff]  ;;  %v3692_v10 = vld [vmem:[#allocation18_spill] sm:$0xff] }
 0x183   :  { %1798 = vst.msk [vmem:[%s3593_s3 + $0xc] sm:$0xf] %vm1794_vm1, %v2077_v22  ;;  %v1681_v35 = vmax.f32 %v3657_v23, %v1665_v20  ;;  %v1624_v50 = vadd.f32 %v2457_v24, %v2351_v40  ;;  %v1664_v27 = vmax.f32 %v1245_v54, %v1616_v30  ;;  %v3668_v24 = vld [vmem:[#allocation30_spill] sm:$0xff]  ;;  %v3671_v22 = vld [vmem:[#allocation3_spill] sm:$0xff]  ;;  %v3672_v20 = vld [vmem:[#allocation13_spill] sm:$0xff] }
 0x184   :  { %v2075_v45 = vpack.c.bf16 %v1715_v37, %v1715_v37  ;;  %v1702_v34 = vadd.f32 %v3412_v57, %v1679_v21  ;;  %v2353_v58 = vpop.f32.mrf.mxu0  ;;  %v1628_v12 = vpop.f32.mrf.mxu1  ;;  %v1282_v49 = vadd.f32 %v3668_v24, %v2298_v46  ;;  %v3673_v40 = vmax.f32 %v3671_v22, %v3672_v20  ;;  %v3674_v37 = vld [vmem:[#allocation28_spill] sm:$0xff]  ;;  %v3675_v21 = vld [vmem:[#allocation41_spill] sm:$0xff] }
 0x185   :  { %v1704_v9 = vadd.f32 %v3412_v57, %v1681_v35  ;;  %v1666_v5 = vmax.f32 %v1253_v39, %v1624_v50  ;;  %v1680_v53 = vmax.f32 %v3658_v38, %v1664_v27  ;;  %v2354_v59 = vadd.f32 %v2353_v58, %v2352_v1  ;;  %v3676_v58 = vld [vmem:[#allocation23_spill] sm:$0xff]  ;;  %v3679_v46 = vld [vmem:[#allocation16_spill] sm:$0xff] }
 0x186   :  { %1796 = vst.msk [vmem:[%s3593_s3 + $0x4] sm:$0xf] %vm1794_vm1, %v2075_v45  ;;  %v1718_v36 = vmax.f32 %v1702_v34, 0.0  ;;  %v2355_v29 = vpop.f32.mrf.mxu0  ;;  %v3478_v13 = vpop.f32.mrf.mxu1  ;;  %v1261_v8 = vadd.f32 %v2283_v56, %v3674_v37  ;;  %v2375_v1 = vadd.f32 %v3402_v48, %v3675_v21 }
 0x187   :  { %v1720_v17 = vmax.f32 %v1704_v9, 0.0  ;;  %v1682_v51 = vmax.f32 %v3661_v4, %v1666_v5  ;;  %v1703_v43 = vadd.f32 %v3412_v57, %v1680_v53  ;;  %v1629_v16 = vadd.f32 %v2354_v59, %v1628_v12  ;;  %v3677_v9 = vld [vmem:[#allocation34_spill] sm:$0xff]  ;;  %v3682_v4 = vld [vmem:[#allocation27_spill] sm:$0xff] }
 0x188   :  { %v2078_v60 = vpack.c.bf16 %v1718_v36, %v1718_v36  ;;  %v2356_v55 = vpop.f32.mrf.mxu0  ;;  %v1631_v7 = vpop.f32.mrf.mxu1  ;;  %v1266_v12 = vadd.f32 %v3676_v58, %v2286_v52  ;;  %v1285_v5 = vadd.f32 %v3677_v9, %v2301_v6  ;;  %v3690_v52 = vmax.f32 %v3688_v18, %v3689_v63  ;;  %v3699_v58 = vld [vmem:[#allocation14_spill] sm:$0xff] }
 0x189   :  { %v2080_v44 = vpack.c.bf16 %v1720_v17, %v1720_v17  ;;  %v1705_v25 = vadd.f32 %v3412_v57, %v1682_v51  ;;  %v1719_v15 = vmax.f32 %v1703_v43, 0.0  ;;  %v1667_v0 = vmax.f32 %v1258_v61, %v1629_v16  ;;  %v3678_v61 = vld [vmem:[#allocation9_spill] sm:$0xff]  ;;  %v3683_v43 = vld [vmem:[#allocation4_spill] sm:$0xff]  ;;  %v3684_v16 = vld [vmem:[#allocation15_spill] sm:$0xff] }
 0x18a   :  { %1799 = vst.msk [vmem:[%s3593_s3 + $0x10] sm:$0xf] %vm1794_vm1, %v2078_v60  ;;  %v2357_v54 = vadd.f32 %v2356_v55, %v2355_v29  ;;  %v2358_v11 = vpop.f32.mrf.mxu0  ;;  %v2464_v14 = vpop.f32.mrf.mxu1  ;;  %v3680_v36 = vmax.f32 %v3678_v61, %v3679_v46  ;;  %v2289_v51 = vadd.f32 %v3682_v4, %v3681_v47  ;;  %v3685_v31 = vmax.f32 %v3683_v43, %v3684_v16  ;;  %v3686_v55 = vld [vmem:[#allocation29_spill] sm:$0xff] }
 0x18b   :  { %1801 = vst.msk [vmem:[%s3593_s3 + $0x18] sm:$0xf] %vm1794_vm1, %v2080_v44  ;;  %v1721_v26 = vmax.f32 %v1705_v25, 0.0  ;;  %v2079_v28 = vpack.c.bf16 %v1719_v15, %v1719_v15  ;;  %v1683_v30 = vmax.f32 %v3673_v40, %v1667_v0  ;;  %v1653_v62 = vadd.f32 %v2464_v14, %v2372_v42 }
 0x18c   :  { %v1632_v39 = vadd.f32 %v2357_v54, %v1631_v7  ;;  %v2359_v23 = vpop.f32.mrf.mxu0  ;;  %v1644_v35 = vpop.f32.mrf.mxu1  ;;  %v3687_v7 = vld [vmem:[#allocation31_spill] sm:$0xff]  ;;  %v3694_v54 = vld [vmem:[#allocation26_spill] sm:$0xff] }
 0x18d   :  { %v2081_v50 = vpack.c.bf16 %v1721_v26, %v1721_v26  ;;  %1800 = vst.msk [vmem:[%s3593_s3 + $0x14] sm:$0xf] %vm1794_vm1, %v2079_v28  ;;  %v1706_v27 = vadd.f32 %v3412_v57, %v1683_v30  ;;  %v1673_v45 = vmax.f32 %v1282_v49, %v1653_v62  ;;  %v2360_v34 = vadd.f32 %v2359_v23, %v2358_v11  ;;  %v3691_v49 = vld [vmem:[#allocation10_spill] sm:$0xff]  ;;  %v3695_v62 = vld [vmem:[#allocation32_spill] sm:$0xff]  ;;  %v3697_v23 = vld [vmem:[#allocation35_spill] sm:$0xff] }
 0x18e   :  { %v1668_v38 = vmax.f32 %v1261_v8, %v1632_v39  ;;  %v2361_v53 = vpop.f32.mrf.mxu0  ;;  %v2465_v48 = vpop.f32.mrf.mxu1  ;;  %v2292_v44 = vadd.f32 %v3687_v7, %v3686_v55  ;;  %v3693_v19 = vmax.f32 %v3691_v49, %v3692_v10  ;;  %v1269_v11 = vadd.f32 %v3694_v54, %v2289_v51  ;;  %v3696_v39 = vld [vmem:[#allocation33_spill] sm:$0xff] }
 0x18f   :  { %1802 = vst.msk [vmem:[%s3593_s3 + $0x1c] sm:$0xf] %vm1794_vm1, %v2081_v50  ;;  %v1722_v59 = vmax.f32 %v1706_v27, 0.0  ;;  %v1689_v29 = vmax.f32 %v3680_v36, %v1673_v45  ;;  %v1637_v17 = vadd.f32 %v3456_v41, %v2360_v34  ;;  %v1656_v3 = vadd.f32 %v2465_v48, %v2375_v1  ;;  %v3698_v34 = vld [vmem:[#allocation6_spill] sm:$0xff]  ;;  %v3701_v36 = vld [vmem:[#allocation36_spill] sm:$0xff] }
 0x190   :  { %v1684_v33 = vmax.f32 %v3685_v31, %v1668_v38  ;;  %v2362_v56 = vpop.f32.mrf.mxu0  ;;  %v1274_v37 = vadd.f32 %v2292_v44, %v3695_v62  ;;  %v2295_v50 = vadd.f32 %v3697_v23, %v3696_v39  ;;  %v1647_v46 = vpop.f32.mrf.mxu1 }
 0x191   :  { %v2082_v2 = vpack.c.bf16 %v1722_v59, %v1722_v59  ;;  %v1712_v32 = vadd.f32 %v3412_v57, %v1689_v29  ;;  %v1669_v42 = vmax.f32 %v1266_v12, %v1637_v17  ;;  %v1674_v60 = vmax.f32 %v1285_v5, %v1656_v3  ;;  %v3703_v17 = vld [vmem:[#allocation17_spill] sm:$0xff] }
 0x192   :  { %v1707_v25 = vadd.f32 %v3412_v57, %v1684_v33  ;;  %v2363_v41 = vadd.f32 %v2362_v56, %v2361_v53  ;;  %v2364_v15 = vpop.f32.mrf.mxu0  ;;  %v3700_v12 = vmax.f32 %v3698_v34, %v3699_v58  ;;  %v1277_v29 = vadd.f32 %v2295_v50, %v3701_v36  ;;  %v3705_v56 = vld [vmem:[#allocation8_spill] sm:$0xff] }
 0x193   :  { %1803 = vst.msk [vmem:[%s3593_s3 + $0x20] sm:$0xf] %vm1794_vm1, %v2082_v2  ;;  %v1728_v0 = vmax.f32 %v1712_v32, 0.0  ;;  %v1685_v24 = vmax.f32 %v3690_v52, %v1669_v42  ;;  %v1690_v6 = vmax.f32 %v3693_v19, %v1674_v60  ;;  %v3706_v2 = vld [vmem:[#allocation19_spill] sm:$0xff] }
 0x194   :  { %v1723_v14 = vmax.f32 %v1707_v25, 0.0  ;;  %v1640_v26 = vadd.f32 %v3478_v13, %v2363_v41  ;;  %v2365_v28 = vpop.f32.mrf.mxu0  ;;  %v3707_v32 = vmax.f32 %v3705_v56, %v3706_v2 }
 0x195   :  { %v2088_v22 = vpack.c.bf16 %v1728_v0, %v1728_v0  ;;  %v1708_v20 = vadd.f32 %v3412_v57, %v1685_v24  ;;  %v1713_v40 = vadd.f32 %v3412_v57, %v1690_v6  ;;  %v2366_v30 = vadd.f32 %v2365_v28, %v2364_v15 }
 0x196   :  { %v2083_v8 = vpack.c.bf16 %v1723_v14, %v1723_v14  ;;  %v1670_v21 = vmax.f32 %v1269_v11, %v1640_v26  ;;  %v2367_v1 = vpop.f32.mrf.mxu0 }
 0x197   :  { %1809 = vst.msk [vmem:[%s3593_s3 + $0x38] sm:$0xf] %vm1794_vm1, %v2088_v22  ;;  %v1724_v13 = vmax.f32 %v1708_v20, 0.0  ;;  %v1729_v27 = vmax.f32 %v1713_v40, 0.0  ;;  %v1645_v45 = vadd.f32 %v2366_v30, %v1644_v35  ;;  %v3702_v35 = vld [vmem:[#allocation7_spill] sm:$0xff] }
 0x198   :  { %1804 = vst.msk [vmem:[%s3593_s3 + $0x24] sm:$0xf] %vm1794_vm1, %v2083_v8  ;;  %v1686_v9 = vmax.f32 %v3700_v12, %v1670_v21  ;;  %v2368_v5 = vpop.f32.mrf.mxu0  ;;  %v3704_v3 = vmax.f32 %v3702_v35, %v3703_v17 }
 0x199   :  { %v2084_v38 = vpack.c.bf16 %v1724_v13, %v1724_v13  ;;  %v2089_v53 = vpack.c.bf16 %v1729_v27, %v1729_v27  ;;  %v1671_v48 = vmax.f32 %v1274_v37, %v1645_v45  ;;  %v2369_v59 = vadd.f32 %v2368_v5, %v2367_v1 }
 0x19a   :  { %v1709_v61 = vadd.f32 %v3412_v57, %v1686_v9 }
 0x19b   :  { %1805 = vst.msk [vmem:[%s3593_s3 + $0x28] sm:$0xf] %vm1794_vm1, %v2084_v38  ;;  %1810 = vst.msk [vmem:[%s3593_s3 + $0x3c] sm:$0xf] %vm1794_vm1, %v2089_v53  ;;  %v1687_v47 = vmax.f32 %v3704_v3, %v1671_v48  ;;  %v1648_v4 = vadd.f32 %v2369_v59, %v1647_v46 }
 0x19c   :  { %v1725_v51 = vmax.f32 %v1709_v61, 0.0 }
 0x19d   :  { %v1710_v43 = vadd.f32 %v3412_v57, %v1687_v47  ;;  %v1672_v16 = vmax.f32 %v1277_v29, %v1648_v4 }
 0x19e   :  { %v2085_v31 = vpack.c.bf16 %v1725_v51, %v1725_v51 }
 0x19f   :  { %v1726_v33 = vmax.f32 %v1710_v43, 0.0  ;;  %v1688_v42 = vmax.f32 %v3707_v32, %v1672_v16 }
 0x1a0   :  { %1806 = vst.msk [vmem:[%s3593_s3 + $0x2c] sm:$0xf] %vm1794_vm1, %v2085_v31 }
 0x1a1   :  { %v2086_v60 = vpack.c.bf16 %v1726_v33, %v1726_v33  ;;  %v1711_v55 = vadd.f32 %v3412_v57, %v1688_v42 }
 0x1a3   :  { %1807 = vst.msk [vmem:[%s3593_s3 + $0x30] sm:$0xf] %vm1794_vm1, %v2086_v60  ;;  %v1727_v7 = vmax.f32 %v1711_v55, 0.0 }
 0x1a5   :  { %v2087_v44 = vpack.c.bf16 %v1727_v7, %v1727_v7 }
 0x1a7   :  { %1808 = vst.msk [vmem:[%s3593_s3 + $0x34] sm:$0xf] %vm1794_vm1, %v2087_v44 }

// kernel: custom_cnn_forward.6
= control target key start
LH: loop header
LB: loop body
LE: loop exit
PB: predicated region body
PF: predicated region fallthrough
CT: control target
= control target key end

     0   :  { %vm365_vm0 = vcmask 523264   ;;  %s2309_s1 = inlined_call_operand.vmem [shape: bf16[576,128], index: 1, kind: input, shape index: {}]   ;;  %s2310_s0 = inlined_call_operand.vmem [shape: bf16[4,32,576], index: 0, kind: input, shape index: {}]   ;;  %s2311_s2 = inlined_call_operand.vmem [shape: f32[1,128], index: 2, kind: input, shape index: {}]   ;;  %s2312_s3 = inlined_call_operand.vmem [shape: bf16[32,128], index: 3, kind: output, shape index: {}]  }
   0x1   :  { %v1769_v0 = vld [vmem:[%s2309_s1 + $0x78] sm:$0xff]   ;;  %v1792_v4 = vld [vmem:[%s2309_s1 + $0x70] sm:$0xff]   ;;  %v1816_v8 = vld [vmem:[%s2309_s1 + $0x68] sm:$0xff]  }
   0x2   :  { %v1774_v1 = vld [vmem:[%s2309_s1 + $0xf8] sm:$0xff]   ;;  %1358 = vmatprep.subr.bf16.mxu0 %v1769_v0  ;;  %v1798_v5 = vld [vmem:[%s2309_s1 + $0xf0] sm:$0xff]   ;;  %v1822_v9 = vld [vmem:[%s2309_s1 + $0xe8] sm:$0xff]  }
   0x3   :  { %v1780_v2 = vld [vmem:[%s2309_s1 + $0x38] sm:$0xff]   ;;  %1386 = vmatprep.subr.bf16.mxu1 %v1774_v1  ;;  %v1804_v6 = vld [vmem:[%s2309_s1 + $0x30] sm:$0xff]   ;;  %v1828_v10 = vld [vmem:[%s2309_s1 + $0x28] sm:$0xff]  }
   0x4   :  { %v1786_v3 = vld [vmem:[%s2309_s1 + $0xb8] sm:$0xff]   ;;  %1359 = vmatpush3.bf16.msra.mxu0 %v1780_v2  ;;  %v1810_v7 = vld [vmem:[%s2309_s1 + $0xb0] sm:$0xff]   ;;  %v1834_v11 = vld [vmem:[%s2309_s1 + $0xa8] sm:$0xff]  }
   0x5   :  { %1387 = vmatpush3.bf16.msra.mxu1 %v1786_v3  ;;  %1360 = vmatprep.subr.bf16.mxu0 %v1792_v4  ;;  %v1840_v12 = vld [vmem:[%s2309_s1 + $0x60] sm:$0xff]   ;;  %v1864_v16 = vld [vmem:[%s2309_s1 + $0x58] sm:$0xff]   ;;  %v1888_v20 = vld [vmem:[%s2309_s1 + $0x50] sm:$0xff]  }
   0x6   :  { %1388 = vmatprep.subr.bf16.mxu1 %v1798_v5  ;;  %v1846_v13 = vld [vmem:[%s2309_s1 + $0xe0] sm:$0xff]   ;;  %v1870_v17 = vld [vmem:[%s2309_s1 + $0xd8] sm:$0xff]   ;;  %v1894_v21 = vld [vmem:[%s2309_s1 + $0xd0] sm:$0xff]  }
   0x7   :  { %v1852_v14 = vld [vmem:[%s2309_s1 + $0x20] sm:$0xff]   ;;  %v1876_v18 = vld [vmem:[%s2309_s1 + $0x18] sm:$0xff]   ;;  %v1900_v22 = vld [vmem:[%s2309_s1 + $0x10] sm:$0xff]  }
   0x8   :  { %1361 = vmatpush3.bf16.msra.mxu0 %v1804_v6  ;;  %v1858_v15 = vld [vmem:[%s2309_s1 + $0xa0] sm:$0xff]   ;;  %v1882_v19 = vld [vmem:[%s2309_s1 + $0x98] sm:$0xff]   ;;  %v1906_v23 = vld [vmem:[%s2309_s1 + $0x90] sm:$0xff]  }
   0x9   :  { %1389 = vmatpush3.bf16.msra.mxu1 %v1810_v7  ;;  %1362 = vmatprep.subr.bf16.mxu0 %v1816_v8  ;;  %v1912_v24 = vld [vmem:[%s2309_s1 + $0x48] sm:$0xff]   ;;  %v1936_v28 = vld [vmem:[%s2309_s1 + $0x40] sm:$0xff]   ;;  %v1974_v36 = vld [vmem:[%s2309_s1 + $0x118] sm:$0xff]  }
   0xa   :  { %1390 = vmatprep.subr.bf16.mxu1 %v1822_v9  ;;  %v1918_v25 = vld [vmem:[%s2309_s1 + $0xc8] sm:$0xff]   ;;  %v1942_v29 = vld [vmem:[%s2309_s1 + $0xc0] sm:$0xff]   ;;  %v1979_v37 = vld [vmem:[%s2309_s1 + $0x110] sm:$0xff]  }
   0xb   :  { %v1924_v26 = vld [vmem:[%s2309_s1 + $0x8] sm:$0xff]   ;;  %v1948_v30 = vld [vmem:[%s2309_s1] sm:$0xff]   ;;  %v1712_v47 = vld [vmem:[%s2310_s0 + $0x5c] ss:$20 sps:$4 sm:$0xff]  }
   0xc   :  { %1363 = vmatpush3.bf16.msra.mxu0 %v1828_v10  ;;  %v1930_v27 = vld [vmem:[%s2309_s1 + $0x88] sm:$0xff]   ;;  %v1954_v31 = vld [vmem:[%s2309_s1 + $0x80] sm:$0xff]   ;;  %v1707_v49 = vld [vmem:[%s2310_s0 + $0x7c] ss:$20 sps:$4 sm:$0xff]  }
   0xd   :  { %1391 = vmatpush3.bf16.msra.mxu1 %v1834_v11  ;;  %1364 = vmatprep.subr.bf16.mxu0 %v1840_v12  ;;  %v1686_v32 = vld [vmem:[%s2310_s0] ss:$20 sps:$4 sm:$0xff]   ;;  %v1688_v33 = vld [vmem:[%s2310_s0 + $0x4] ss:$20 sps:$4 sm:$0xff]   ;;  %v1689_v34 = vld [vmem:[%s2310_s0 + $0x8] ss:$20 sps:$4 sm:$0xff]  }
   0xe   :  { %1392 = vmatprep.subr.bf16.mxu1 %v1846_v13  ;;  %v1691_v35 = vld [vmem:[%s2310_s0 + $0xc] ss:$20 sps:$4 sm:$0xff]   ;;  %404 = vmatprep.mubr.bf16.mxu0 %v1688_v33  ;;  %v1696_v39 = vld [vmem:[%s2310_s0 + $0x34] ss:$20 sps:$4 sm:$0xff]   ;;  %v1699_v42 = vld [vmem:[%s2310_s0 + $0x30] ss:$20 sps:$4 sm:$0xff]  }
   0xf   :  { %453 = vmatprep.mubr.bf16.mxu1 %v1691_v35  ;;  %v1694_v38 = vld [vmem:[%s2310_s0 + $0x2c] ss:$20 sps:$4 sm:$0xff]   ;;  %v1698_v40 = vld [vmem:[%s2310_s0 + $0x28] ss:$20 sps:$4 sm:$0xff]   ;;  %v1702_v43 = vld [vmem:[%s2310_s0 + $0x10] ss:$20 sps:$4 sm:$0xff]  }
  0x10   :  { %1365 = vmatpush3.bf16.msra.mxu0 %v1852_v14  ;;  %v1998_v41 = vld [vmem:[%s2309_s1 + $0x108] sm:$0xff]   ;;  %v2013_v44 = vld [vmem:[%s2309_s1 + $0x100] sm:$0xff]  }
  0x11   :  { %1393 = vmatpush3.bf16.msra.mxu1 %v1858_v15  ;;  %1366 = vmatprep.subr.bf16.mxu0 %v1864_v16  ;;  %v1706_v45 = vld [vmem:[%s2310_s0 + $0x54] ss:$20 sps:$4 sm:$0xff]   ;;  %v1703_v46 = vld [vmem:[%s2310_s0 + $0x38] ss:$20 sps:$4 sm:$0xff]   ;;  %v1704_v48 = vld [vmem:[%s2310_s0 + $0x50] ss:$20 sps:$4 sm:$0xff]  }
  0x12   :  { %1394 = vmatprep.subr.bf16.mxu1 %v1870_v17  ;;  %v1709_v50 = vld [vmem:[%s2310_s0 + $0x78] ss:$20 sps:$4 sm:$0xff]   ;;  %v1713_v51 = vld [vmem:[%s2310_s0 + $0x60] ss:$20 sps:$4 sm:$0xff]   ;;  %v1714_v53 = vld [vmem:[%s2310_s0 + $0x88] ss:$20 sps:$4 sm:$0xff]  }
  0x13   :  { %v1710_v52 = vld [vmem:[%s2310_s0 + $0x58] ss:$20 sps:$4 sm:$0xff]   ;;  %v1717_v56 = vld [vmem:[%s2310_s0 + $0x80] ss:$20 sps:$4 sm:$0xff]   ;;  %v1721_v59 = vld [vmem:[%s2310_s0 + $0xa8] ss:$20 sps:$4 sm:$0xff]  }
  0x14   :  { %1367 = vmatpush3.bf16.msra.mxu0 %v1876_v18  ;;  %v1715_v54 = vld [vmem:[%s2310_s0 + $0x84] ss:$20 sps:$4 sm:$0xff]   ;;  %v1723_v55 = vld [vmem:[%s2310_s0 + $0xac] ss:$20 sps:$4 sm:$0xff]   ;;  %v1726_v61 = vld [vmem:[%s2310_s0 + $0xd4] ss:$20 sps:$4 sm:$0xff]  }
  0x15   :  { %1395 = vmatpush3.bf16.msra.mxu1 %v1882_v19  ;;  %1368 = vmatprep.subr.bf16.mxu0 %v1888_v20  ;;  %v1720_v57 = vld [vmem:[%s2310_s0 + $0xa4] ss:$20 sps:$4 sm:$0xff]   ;;  %v1718_v58 = vld [vmem:[%s2310_s0 + $0xa0] ss:$20 sps:$4 sm:$0xff]   ;;  %v1728_v62 = vld [vmem:[%s2310_s0 + $0xc8] ss:$20 sps:$4 sm:$0xff]  }
  0x16   :  { %1396 = vmatprep.subr.bf16.mxu1 %v1894_v21  ;;  %v1724_v60 = vld [vmem:[%s2310_s0 + $0xcc] ss:$20 sps:$4 sm:$0xff]   ;;  %v1729_v63 = vld [vmem:[%s2310_s0 + $0xd0] ss:$20 sps:$4 sm:$0xff]  }
  0x18   :  { %1369 = vmatpush3.bf16.msra.mxu0 %v1900_v22 }
  0x19   :  { %1397 = vmatpush3.bf16.msra.mxu1 %v1906_v23  ;;  %1370 = vmatprep.subr.bf16.mxu0 %v1912_v24 }
  0x1a   :  { %1398 = vmatprep.subr.bf16.mxu1 %v1918_v25 }
  0x1c   :  { %1371 = vmatpush3.bf16.msra.mxu0 %v1924_v26 }
  0x1d   :  { %1399 = vmatpush3.bf16.msra.mxu1 %v1930_v27  ;;  %1372 = vmatprep.subr.bf16.mxu0 %v1936_v28 }
  0x1e   :  { %1400 = vmatprep.subr.bf16.mxu1 %v1942_v29 }
  0x20   :  { %1373 = vmatpush3.bf16.msra.mxu0 %v1948_v30 }
  0x21   :  { %1401 = vmatpush3.bf16.msra.mxu1 %v1954_v31  ;;  %1606 = vmatprep.subr.bf16.mxu0 %v1974_v36 }
  0x22   :  { %1420 = vmatprep.subr.bf16.mxu1 %v1769_v0 }
  0x23   :  { %405 = vmatmul.mubr.bf16.vlgmr.msra.gmra.mxu0 %v1686_v32 }
  0x24   :  { %454 = vmatmul.mubr.bf16.vlgmr.msra.gmra.mxu1 %v1689_v34  ;;  %1607 = vmatpush3.bf16.msra.mxu0 %v1974_v36 }
  0x25   :  { %1421 = vmatpush3.bf16.msra.mxu1 %v1780_v2  ;;  %1608 = vmatprep.subr.bf16.mxu0 %v1979_v37 }
  0x26   :  { %1422 = vmatprep.subr.bf16.mxu1 %v1792_v4  ;;  %412 = vmatprep.mubr.bf16.mxu0 %v1694_v38 }
  0x27   :  { %461 = vmatprep.mubr.bf16.mxu1 %v1696_v39 }
  0x28   :  { %1609 = vmatpush3.bf16.msra.mxu0 %v1979_v37 }
  0x29   :  { %1423 = vmatpush3.bf16.msra.mxu1 %v1804_v6  ;;  %1610 = vmatprep.subr.bf16.mxu0 %v1998_v41 }
  0x2a   :  { %1424 = vmatprep.subr.bf16.mxu1 %v1816_v8 }
  0x2b   :  { %413 = vmatmul.mubr.bf16.gmra.mxu0 %v1698_v40 }
  0x2c   :  { %462 = vmatmul.mubr.bf16.gmra.mxu1 %v1699_v42  ;;  %1614 = vmatprep.mubr.msk.bf16.mxu0 %vm365_vm0, %v1702_v43 }
  0x2d   :  { %1611 = vmatpush3.bf16.msra.mxu0 %v1998_v41  ;;  %1425 = vmatpush3.bf16.msra.mxu1 %v1828_v10 }
  0x2e   :  { %1612 = vmatprep.subr.bf16.mxu0 %v2013_v44  ;;  %1426 = vmatprep.subr.bf16.mxu1 %v1840_v12 }
  0x2f   :  { %620 = vmatprep.mubr.bf16.mxu1 %v1706_v45 }
  0x31   :  { %1613 = vmatpush3.bf16.msra.mxu0 %v2013_v44  ;;  %1427 = vmatpush3.bf16.msra.mxu1 %v1852_v14 }
  0x32   :  { %1428 = vmatprep.subr.bf16.mxu1 %v1864_v16  ;;  %1448 = vmatprep.subr.bf16.mxu0 %v1774_v1 }
  0x34   :  { %1615 = vmatmul.mubr.msk.bf16.vlgmr.msra.gmra.mxu0 %vm365_vm0, %v1703_v46 }
  0x35   :  { %1429 = vmatpush3.bf16.msra.mxu1 %v1876_v18  ;;  %1449 = vmatpush3.bf16.msra.mxu0 %v1786_v3 }
  0x36   :  { %1430 = vmatprep.subr.bf16.mxu1 %v1888_v20  ;;  %1450 = vmatprep.subr.bf16.mxu0 %v1798_v5 }
  0x37   :  { %669 = vmatprep.mubr.bf16.mxu0 %v1712_v47 }
  0x39   :  { %1431 = vmatpush3.bf16.msra.mxu1 %v1900_v22  ;;  %1451 = vmatpush3.bf16.msra.mxu0 %v1810_v7 }
  0x3a   :  { %1432 = vmatprep.subr.bf16.mxu1 %v1912_v24  ;;  %1452 = vmatprep.subr.bf16.mxu0 %v1822_v9 }
  0x3d   :  { %1433 = vmatpush3.bf16.msra.mxu1 %v1924_v26  ;;  %1453 = vmatpush3.bf16.msra.mxu0 %v1834_v11 }
  0x3e   :  { %1434 = vmatprep.subr.bf16.mxu1 %v1936_v28  ;;  %1454 = vmatprep.subr.bf16.mxu0 %v1846_v13 }
  0x41   :  { %1435 = vmatpush3.bf16.msra.mxu1 %v1948_v30  ;;  %1455 = vmatpush3.bf16.msra.mxu0 %v1858_v15 }
  0x42   :  { %1456 = vmatprep.subr.bf16.mxu0 %v1870_v17  ;;  %1618 = vmatprep.subr.bf16.mxu1 %v1974_v36 }
  0x44   :  { %621 = vmatmul.mubr.bf16.vlgmr.msra.gmra.mxu1 %v1704_v48 }
  0x45   :  { %1457 = vmatpush3.bf16.msra.mxu0 %v1882_v19  ;;  %1619 = vmatpush3.bf16.msra.mxu1 %v1974_v36 }
  0x46   :  { %1458 = vmatprep.subr.bf16.mxu0 %v1894_v21  ;;  %1620 = vmatprep.subr.bf16.mxu1 %v1979_v37 }
  0x47   :  { %628 = vmatprep.mubr.bf16.mxu1 %v1707_v49 }
  0x49   :  { %1459 = vmatpush3.bf16.msra.mxu0 %v1906_v23  ;;  %1621 = vmatpush3.bf16.msra.mxu1 %v1979_v37 }
  0x4a   :  { %1460 = vmatprep.subr.bf16.mxu0 %v1918_v25  ;;  %1622 = vmatprep.subr.bf16.mxu1 %v1998_v41 }
  0x4c   :  { %629 = vmatmul.mubr.bf16.gmra.mxu1 %v1709_v50 }
  0x4d   :  { %1461 = vmatpush3.bf16.msra.mxu0 %v1930_v27  ;;  %1623 = vmatpush3.bf16.msra.mxu1 %v1998_v41 }
  0x4e   :  { %1462 = vmatprep.subr.bf16.mxu0 %v1942_v29  ;;  %1624 = vmatprep.subr.bf16.mxu1 %v2013_v44 }
  0x4f   :  { %1626 = vmatprep.mubr.msk.bf16.mxu1 %vm365_vm0, %v1713_v51 }
  0x51   :  { %1463 = vmatpush3.bf16.msra.mxu0 %v1954_v31  ;;  %1625 = vmatpush3.bf16.msra.mxu1 %v2013_v44 }
  0x52   :  { %1482 = vmatprep.subr.bf16.mxu0 %v1769_v0  ;;  %1510 = vmatprep.subr.bf16.mxu1 %v1774_v1 }
  0x54   :  { %670 = vmatmul.mubr.bf16.vlgmr.msra.gmra.mxu0 %v1710_v52  ;;  %1627 = vmatmul.mubr.msk.bf16.vlgmr.msra.gmra.mxu1 %vm365_vm0, %v1714_v53 }
  0x55   :  { %1483 = vmatpush3.bf16.msra.mxu0 %v1780_v2  ;;  %1511 = vmatpush3.bf16.msra.mxu1 %v1786_v3 }
  0x56   :  { %1484 = vmatprep.subr.bf16.mxu0 %v1792_v4  ;;  %1512 = vmatprep.subr.bf16.mxu1 %v1798_v5 }
  0x57   :  { %677 = vmatprep.mubr.bf16.mxu0 %v1715_v54  ;;  %889 = vmatprep.mubr.bf16.mxu1 %v1723_v55 }
  0x59   :  { %1485 = vmatpush3.bf16.msra.mxu0 %v1804_v6  ;;  %1513 = vmatpush3.bf16.msra.mxu1 %v1810_v7 }
  0x5a   :  { %1486 = vmatprep.subr.bf16.mxu0 %v1816_v8  ;;  %1514 = vmatprep.subr.bf16.mxu1 %v1822_v9 }
  0x5c   :  { %678 = vmatmul.mubr.bf16.gmra.mxu0 %v1717_v56 }
  0x5d   :  { %1487 = vmatpush3.bf16.msra.mxu0 %v1828_v10  ;;  %1515 = vmatpush3.bf16.msra.mxu1 %v1834_v11 }
  0x5e   :  { %1488 = vmatprep.subr.bf16.mxu0 %v1840_v12  ;;  %1516 = vmatprep.subr.bf16.mxu1 %v1846_v13 }
  0x5f   :  { %840 = vmatprep.mubr.bf16.mxu0 %v1720_v57 }
  0x61   :  { %1489 = vmatpush3.bf16.msra.mxu0 %v1852_v14  ;;  %1517 = vmatpush3.bf16.msra.mxu1 %v1858_v15 }
  0x62   :  { %1490 = vmatprep.subr.bf16.mxu0 %v1864_v16  ;;  %1518 = vmatprep.subr.bf16.mxu1 %v1870_v17 }
  0x65   :  { %1491 = vmatpush3.bf16.msra.mxu0 %v1876_v18  ;;  %1519 = vmatpush3.bf16.msra.mxu1 %v1882_v19 }
  0x66   :  { %1492 = vmatprep.subr.bf16.mxu0 %v1888_v20  ;;  %1520 = vmatprep.subr.bf16.mxu1 %v1894_v21 }
  0x69   :  { %1493 = vmatpush3.bf16.msra.mxu0 %v1900_v22  ;;  %1521 = vmatpush3.bf16.msra.mxu1 %v1906_v23 }
  0x6a   :  { %1494 = vmatprep.subr.bf16.mxu0 %v1912_v24  ;;  %1522 = vmatprep.subr.bf16.mxu1 %v1918_v25 }
  0x6d   :  { %1495 = vmatpush3.bf16.msra.mxu0 %v1924_v26  ;;  %1523 = vmatpush3.bf16.msra.mxu1 %v1930_v27 }
  0x6e   :  { %1496 = vmatprep.subr.bf16.mxu0 %v1936_v28  ;;  %1524 = vmatprep.subr.bf16.mxu1 %v1942_v29 }
  0x71   :  { %1497 = vmatpush3.bf16.msra.mxu0 %v1948_v30  ;;  %1525 = vmatpush3.bf16.msra.mxu1 %v1954_v31 }
  0x72   :  { %1630 = vmatprep.subr.bf16.mxu0 %v1974_v36  ;;  %1544 = vmatprep.subr.bf16.mxu1 %v1769_v0  ;;  %v1730_v0 = vld [vmem:[%s2310_s0 + $0xb0] ss:$20 sps:$4 sm:$0xff]  }
  0x74   :  { %841 = vmatmul.mubr.bf16.vlgmr.msra.gmra.mxu0 %v1718_v58  ;;  %890 = vmatmul.mubr.bf16.vlgmr.msra.gmra.mxu1 %v1721_v59 }
  0x75   :  { %1631 = vmatpush3.bf16.msra.mxu0 %v1974_v36  ;;  %1545 = vmatpush3.bf16.msra.mxu1 %v1780_v2  ;;  %v1734_v2 = vld [vmem:[%s2310_s0 + $0xf4] ss:$20 sps:$4 sm:$0xff]  }
  0x76   :  { %1632 = vmatprep.subr.bf16.mxu0 %v1979_v37  ;;  %848 = vmatprep.mubr.bf16.mxu0 %v1724_v60 }
  0x77   :  { %897 = vmatprep.mubr.bf16.mxu1 %v1726_v61  ;;  %1546 = vmatprep.subr.bf16.mxu1 %v1792_v4  ;;  %v1731_v4 = vld [vmem:[%s2310_s0 + $0xd8] ss:$20 sps:$4 sm:$0xff]  }
  0x79   :  { %1633 = vmatpush3.bf16.msra.mxu0 %v1979_v37  ;;  %1547 = vmatpush3.bf16.msra.mxu1 %v1804_v6  ;;  %v1740_v6 = vld [vmem:[%s2310_s0 + $0xfc] ss:$20 sps:$4 sm:$0xff]  }
  0x7a   :  { %1634 = vmatprep.subr.bf16.mxu0 %v1998_v41  ;;  %1548 = vmatprep.subr.bf16.mxu1 %v1816_v8  ;;  %v1738_v8 = vld [vmem:[%s2310_s0 + $0xf8] ss:$20 sps:$4 sm:$0xff]  }
  0x7c   :  { %849 = vmatmul.mubr.bf16.gmra.mxu0 %v1728_v62  ;;  %898 = vmatmul.mubr.bf16.gmra.mxu1 %v1729_v63 }
  0x7d   :  { %1635 = vmatpush3.bf16.msra.mxu0 %v1998_v41  ;;  %1549 = vmatpush3.bf16.msra.mxu1 %v1828_v10  ;;  %v1743_v10 = vld [vmem:[%s2310_s0 + $0x124] ss:$20 sps:$4 sm:$0xff]  }
  0x7e   :  { %1636 = vmatprep.subr.bf16.mxu0 %v2013_v44  ;;  %1638 = vmatprep.mubr.msk.bf16.mxu0 %vm365_vm0, %v1730_v0 }
  0x7f   :  { %1550 = vmatprep.subr.bf16.mxu1 %v1840_v12  ;;  %1056 = vmatprep.mubr.bf16.mxu1 %v1734_v2 }
  0x81   :  { %1637 = vmatpush3.bf16.msra.mxu0 %v2013_v44  ;;  %1551 = vmatpush3.bf16.msra.mxu1 %v1852_v14 }
  0x82   :  { %1572 = vmatprep.subr.bf16.mxu0 %v1774_v1  ;;  %1552 = vmatprep.subr.bf16.mxu1 %v1864_v16  ;;  %v1732_v1 = vld [vmem:[%s2310_s0 + $0xf0] ss:$20 sps:$4 sm:$0xff]  }
  0x84   :  { %1639 = vmatmul.mubr.msk.bf16.vlgmr.msra.gmra.mxu0 %vm365_vm0, %v1731_v4 }
  0x85   :  { %1573 = vmatpush3.bf16.msra.mxu0 %v1786_v3  ;;  %1553 = vmatpush3.bf16.msra.mxu1 %v1876_v18  ;;  %v1735_v3 = vld [vmem:[%s2310_s0 + $0x11c] ss:$20 sps:$4 sm:$0xff]  }
  0x86   :  { %1574 = vmatprep.subr.bf16.mxu0 %v1798_v5  ;;  %1554 = vmatprep.subr.bf16.mxu1 %v1888_v20  ;;  %v1737_v5 = vld [vmem:[%s2310_s0 + $0x118] ss:$20 sps:$4 sm:$0xff]  }
  0x87   :  { %1105 = vmatprep.mubr.bf16.mxu0 %v1740_v6 }
  0x89   :  { %1575 = vmatpush3.bf16.msra.mxu0 %v1810_v7  ;;  %1555 = vmatpush3.bf16.msra.mxu1 %v1900_v22  ;;  %v1741_v7 = vld [vmem:[%s2310_s0 + $0x100] ss:$20 sps:$4 sm:$0xff]  }
  0x8a   :  { %1576 = vmatprep.subr.bf16.mxu0 %v1822_v9  ;;  %1556 = vmatprep.subr.bf16.mxu1 %v1912_v24  ;;  %v1742_v9 = vld [vmem:[%s2310_s0 + $0x128] ss:$20 sps:$4 sm:$0xff]  }
  0x8d   :  { %1577 = vmatpush3.bf16.msra.mxu0 %v1834_v11  ;;  %1557 = vmatpush3.bf16.msra.mxu1 %v1924_v26  ;;  %v1745_v11 = vld [vmem:[%s2310_s0 + $0x120] ss:$20 sps:$4 sm:$0xff]  }
  0x8e   :  { %1578 = vmatprep.subr.bf16.mxu0 %v1846_v13  ;;  %1558 = vmatprep.subr.bf16.mxu1 %v1936_v28 }
  0x91   :  { %1579 = vmatpush3.bf16.msra.mxu0 %v1858_v15  ;;  %1559 = vmatpush3.bf16.msra.mxu1 %v1948_v30 }
  0x92   :  { %1580 = vmatprep.subr.bf16.mxu0 %v1870_v17  ;;  %1642 = vmatprep.subr.bf16.mxu1 %v1974_v36 }
  0x94   :  { %1057 = vmatmul.mubr.bf16.vlgmr.msra.gmra.mxu1 %v1732_v1 }
  0x95   :  { %1581 = vmatpush3.bf16.msra.mxu0 %v1882_v19  ;;  %1643 = vmatpush3.bf16.msra.mxu1 %v1974_v36 }
  0x96   :  { %1582 = vmatprep.subr.bf16.mxu0 %v1894_v21  ;;  %1644 = vmatprep.subr.bf16.mxu1 %v1979_v37 }
  0x97   :  { %1064 = vmatprep.mubr.bf16.mxu1 %v1735_v3 }
  0x99   :  { %1583 = vmatpush3.bf16.msra.mxu0 %v1906_v23  ;;  %1645 = vmatpush3.bf16.msra.mxu1 %v1979_v37 }
  0x9a   :  { %1584 = vmatprep.subr.bf16.mxu0 %v1918_v25  ;;  %1646 = vmatprep.subr.bf16.mxu1 %v1998_v41 }
  0x9c   :  { %1065 = vmatmul.mubr.bf16.gmra.mxu1 %v1737_v5 }
  0x9d   :  { %1585 = vmatpush3.bf16.msra.mxu0 %v1930_v27  ;;  %1647 = vmatpush3.bf16.msra.mxu1 %v1998_v41 }
  0x9e   :  { %1586 = vmatprep.subr.bf16.mxu0 %v1942_v29  ;;  %1648 = vmatprep.subr.bf16.mxu1 %v2013_v44 }
  0x9f   :  { %1650 = vmatprep.mubr.msk.bf16.mxu1 %vm365_vm0, %v1741_v7 }
  0xa1   :  { %1587 = vmatpush3.bf16.msra.mxu0 %v1954_v31  ;;  %1649 = vmatpush3.bf16.msra.mxu1 %v2013_v44 }
  0xa4   :  { %1106 = vmatmul.mubr.bf16.vlgmr.msra.gmra.mxu0 %v1738_v8  ;;  %1651 = vmatmul.mubr.msk.bf16.vlgmr.msra.gmra.mxu1 %vm365_vm0, %v1742_v9 }
  0xa5   :  { %1113 = vmatprep.mubr.bf16.mxu0 %v1743_v10 }
  0xac   :  { %1114 = vmatmul.mubr.bf16.gmra.mxu0 %v1745_v11 }
  0xe3   :  { %v1374_v12 = vpop.f32.mrf.mxu0 }
  0xe4   :  { %v1402_v13 = vpop.f32.mrf.mxu1 }
  0xe5   :  { %v1375_v14 = vpop.f32.mrf.mxu0 }
  0xe6   :  { %v1376_v15 = vadd.f32 %v1375_v14, %v1374_v12  ;;  %v1403_v16 = vpop.f32.mrf.mxu1 }
  0xe7   :  { %v1404_v17 = vadd.f32 %v1403_v16, %v1402_v13  ;;  %v1377_v18 = vpop.f32.mrf.mxu0 }
  0xe8   :  { %v1405_v19 = vpop.f32.mrf.mxu1 }
  0xe9   :  { %v1378_v20 = vpop.f32.mrf.mxu0  ;;  %v2234_v21 = vadd.f32 %v1404_v17, %v1376_v15 }
  0xea   :  { %v1379_v22 = vadd.f32 %v1378_v20, %v1377_v18  ;;  %v1406_v23 = vpop.f32.mrf.mxu1 }
  0xeb   :  { %v1407_v24 = vadd.f32 %v1406_v23, %v1405_v19  ;;  %v1380_v25 = vpop.f32.mrf.mxu0 }
  0xec   :  { %v1408_v26 = vpop.f32.mrf.mxu1 }
  0xed   :  { %v1381_v27 = vpop.f32.mrf.mxu0  ;;  %v2236_v28 = vadd.f32 %v1407_v24, %v1379_v22 }
  0xee   :  { %v1382_v29 = vadd.f32 %v1381_v27, %v1380_v25  ;;  %v1409_v30 = vpop.f32.mrf.mxu1 }
  0xef   :  { %v1410_v31 = vadd.f32 %v1409_v30, %v1408_v26  ;;  %v1383_v32 = vpop.f32.mrf.mxu0 }
  0xf0   :  { %v1411_v33 = vpop.f32.mrf.mxu1 }
  0xf1   :  { %v1384_v34 = vpop.f32.mrf.mxu0  ;;  %v464_v35 = vadd.f32 %v1410_v31, %v1382_v29 }
  0xf2   :  { %v1385_v36 = vadd.f32 %v1384_v34, %v1383_v32  ;;  %v1412_v37 = vpop.f32.mrf.mxu1 }
  0xf3   :  { %v1413_v38 = vadd.f32 %v1412_v37, %v1411_v33 }
  0xf4   :  { %v1616_v39 = vpop.f32.mrf.mxu0 }
  0xf5   :  { %v2238_v40 = vadd.f32 %v1616_v39, %v464_v35  ;;  %v2240_v41 = vadd.f32 %v1413_v38, %v1385_v36 }
  0xf6   :  { %v2242_v44 = vpop.f32.mrf.mxu0 }
  0xf7   :  { %2313 = vst [vmem:[#allocation2_spill] sm:$0xff] %v2238_v40  ;;  %2314 = vst [vmem:[#allocation3_spill] sm:$0xff] %v2240_v41 }
  0xf8   :  { %v2244_v46 = vpop.f32.mrf.mxu0 }
  0xf9   :  { %2315 = vst [vmem:[#allocation4_spill] sm:$0xff] %v2244_v46 }
  0xfa   :  { %v2246_v48 = vpop.f32.mrf.mxu0 }
 0x104   :  { %v1436_v42 = vpop.f32.mrf.mxu1 }
 0x106   :  { %v1437_v43 = vpop.f32.mrf.mxu1 }
 0x107   :  { %v1438_v29 = vadd.f32 %v1437_v43, %v1436_v42 }
 0x108   :  { %v1439_v45 = vpop.f32.mrf.mxu1 }
 0x10a   :  { %v1440_v47 = vpop.f32.mrf.mxu1 }
 0x10c   :  { %v2248_v49 = vpop.f32.mrf.mxu1 }
 0x10e   :  { %v2250_v51 = vpop.f32.mrf.mxu1 }
 0x110   :  { %v2252_v53 = vpop.f32.mrf.mxu1 }
 0x112   :  { %v2254_v55 = vpop.f32.mrf.mxu1 }
 0x114   :  { %v1464_v50 = vpop.f32.mrf.mxu0  ;;  %v2256_v57 = vpop.f32.mrf.mxu1 }
 0x116   :  { %v1465_v52 = vpop.f32.mrf.mxu0  ;;  %v720_v59 = vpop.f32.mrf.mxu1 }
 0x117   :  { %v1466_v25 = vadd.f32 %v1465_v52, %v1464_v50  ;;  %v505_v50 = vadd.f32 %v2242_v44, %v2234_v21 }
 0x118   :  { %v1467_v54 = vpop.f32.mrf.mxu0  ;;  %v2258_v61 = vpop.f32.mrf.mxu1 }
 0x119   :  { %2316 = vst [vmem:[#allocation5_spill] sm:$0xff] %v2258_v61  ;;  %v672_v31 = vadd.f32 %v1466_v25, %v1438_v29  ;;  %v1441_v61 = vadd.f32 %v1440_v47, %v1439_v45 }
 0x11a   :  { %v1468_v56 = vpop.f32.mrf.mxu0  ;;  %v2262_v63 = vpop.f32.mrf.mxu1 }
 0x11b   :  { %v1469_v36 = vadd.f32 %v1468_v56, %v1467_v54  ;;  %v721_v39 = vadd.f32 %v720_v59, %v672_v31  ;;  %v1444_v54 = vadd.f32 %v2250_v51, %v2248_v49  ;;  %v508_v49 = vadd.f32 %v2246_v48, %v2236_v28  ;;  %v1338_v28 = vld [vmem:[%s2311_s2] ss:$0 sm:$0xff] }
 0x11c   :  { %v1470_v58 = vpop.f32.mrf.mxu0  ;;  %v1447_v51 = vadd.f32 %v2254_v55, %v2252_v53 }
 0x11d   :  { %v735_v56 = vmax.f32 %v505_v50, %v721_v39  ;;  %v2327_v39 = vld [vmem:[#allocation4_spill] sm:$0xff] }
 0x11e   :  { %v1471_v60 = vpop.f32.mrf.mxu0 }
 0x11f   :  { %v1472_v52 = vadd.f32 %v1471_v60, %v1470_v58 }
 0x120   :  { %v2260_v62 = vpop.f32.mrf.mxu0  ;;  %v2325_v31 = vld [vmem:[#allocation5_spill] sm:$0xff] }
 0x122   :  { %v2264_v0 = vpop.f32.mrf.mxu0 }
 0x134   :  { %v1498_v2 = vpop.f32.mrf.mxu0  ;;  %v1526_v4 = vpop.f32.mrf.mxu1 }
 0x136   :  { %v1499_v6 = vpop.f32.mrf.mxu0  ;;  %v1527_v1 = vpop.f32.mrf.mxu1 }
 0x137   :  { %v1500_v37 = vadd.f32 %v1499_v6, %v1498_v2  ;;  %v1528_v38 = vadd.f32 %v1527_v1, %v1526_v4  ;;  %v680_v4 = vadd.f32 %v1472_v52, %v1444_v54 }
 0x138   :  { %v1501_v3 = vpop.f32.mrf.mxu0  ;;  %v1529_v5 = vpop.f32.mrf.mxu1 }
 0x13a   :  { %v1502_v7 = vpop.f32.mrf.mxu0  ;;  %v1530_v8 = vpop.f32.mrf.mxu1 }
 0x13b   :  { %v1503_v42 = vadd.f32 %v1502_v7, %v1501_v3  ;;  %v1531_v43 = vadd.f32 %v1530_v8, %v1529_v5 }
 0x13c   :  { %v1504_v9 = vpop.f32.mrf.mxu0  ;;  %v1532_v10 = vpop.f32.mrf.mxu1 }
 0x13d   :  { %v895_v44 = vadd.f32 %v1531_v43, %v1503_v42 }
 0x13e   :  { %v1505_v11 = vpop.f32.mrf.mxu0  ;;  %v1533_v12 = vpop.f32.mrf.mxu1 }
 0x13f   :  { %v1506_v6 = vadd.f32 %v1505_v11, %v1504_v9  ;;  %v1534_v21 = vadd.f32 %v1533_v12, %v1532_v10  ;;  %v729_v11 = vadd.f32 %v2256_v57, %v680_v4 }
 0x140   :  { %v2266_v13 = vpop.f32.mrf.mxu0  ;;  %v2268_v14 = vpop.f32.mrf.mxu1 }
 0x141   :  { %2317 = vst [vmem:[#allocation6_spill] sm:$0xff] %v2268_v14 }
 0x142   :  { %v2270_v15 = vpop.f32.mrf.mxu0  ;;  %v2272_v16 = vpop.f32.mrf.mxu1 }
 0x143   :  { %2318 = vst [vmem:[#allocation7_spill] sm:$0xff] %v2272_v16  ;;  %v892_v16 = vadd.f32 %v1528_v38, %v1500_v37  ;;  %v2326_v38 = vld [vmem:[#allocation3_spill] sm:$0xff] }
 0x144   :  { %v2274_v18 = vpop.f32.mrf.mxu0  ;;  %v516_v50 = vadd.f32 %v2327_v39, %v2326_v38 }
 0x145   :  { %2319 = vst [vmem:[#allocation8_spill] sm:$0xff] %v2274_v18 }
 0x146   :  { %v940_v22 = vpop.f32.mrf.mxu0 }
 0x147   :  { %v941_v2 = vadd.f32 %v940_v22, %v892_v16 }
 0x148   :  { %v2276_v26 = vpop.f32.mrf.mxu0 }
 0x149   :  { %2320 = vst [vmem:[#allocation9_spill] sm:$0xff] %v2276_v26  ;;  %v675_v26 = vadd.f32 %v1469_v36, %v1441_v61 }
 0x14a   :  { %v943_v32 = vpop.f32.mrf.mxu0 }
 0x14b   :  { %v724_v1 = vadd.f32 %v2262_v63, %v675_v26  ;;  %v1509_v63 = vadd.f32 %v2270_v15, %v2266_v13 }
 0x14d   :  { %v736_v53 = vmax.f32 %v508_v49, %v724_v1 }
 0x150   :  { %v2328_v52 = vld [vmem:[#allocation9_spill] sm:$0xff] }
 0x154   :  { %v1560_v17 = vpop.f32.mrf.mxu1 }
 0x156   :  { %v1561_v19 = vpop.f32.mrf.mxu1 }
 0x157   :  { %v1562_v40 = vadd.f32 %v1561_v19, %v1560_v17 }
 0x158   :  { %v1563_v20 = vpop.f32.mrf.mxu1 }
 0x15a   :  { %v1564_v23 = vpop.f32.mrf.mxu1 }
 0x15b   :  { %v1565_v45 = vadd.f32 %v1564_v23, %v1563_v20 }
 0x15c   :  { %v1566_v24 = vpop.f32.mrf.mxu1 }
 0x15e   :  { %v1567_v27 = vpop.f32.mrf.mxu1 }
 0x15f   :  { %v1568_v7 = vadd.f32 %v1567_v27, %v1566_v24  ;;  %v2324_v24 = vld [vmem:[#allocation2_spill] sm:$0xff] }
 0x160   :  { %v1569_v30 = vpop.f32.mrf.mxu1  ;;  %v737_v26 = vmax.f32 %v2324_v24, %v729_v11 }
 0x162   :  { %v1570_v33 = vpop.f32.mrf.mxu1 }
 0x163   :  { %v1571_v20 = vadd.f32 %v1570_v33, %v1569_v30 }
 0x164   :  { %v1588_v34 = vpop.f32.mrf.mxu0  ;;  %v1652_v35 = vpop.f32.mrf.mxu1 }
 0x166   :  { %v1589_v46 = vpop.f32.mrf.mxu0  ;;  %v1156_v41 = vpop.f32.mrf.mxu1 }
 0x167   :  { %v1590_v18 = vadd.f32 %v1589_v46, %v1588_v34 }
 0x168   :  { %v1591_v25 = vpop.f32.mrf.mxu0  ;;  %v1653_v29 = vpop.f32.mrf.mxu1 }
 0x169   :  { %v1108_v14 = vadd.f32 %v1590_v18, %v1562_v40  ;;  %v1475_v40 = vadd.f32 %v2264_v0, %v2260_v62  ;;  %v2321_v62 = vld [vmem:[#allocation6_spill] sm:$0xff]  ;;  %v2322_v0 = vld [vmem:[#allocation7_spill] sm:$0xff]  ;;  %v2323_v18 = vld [vmem:[#allocation8_spill] sm:$0xff] }
 0x16a   :  { %v1592_v59 = vpop.f32.mrf.mxu0  ;;  %v1159_v60 = vpop.f32.mrf.mxu1  ;;  %v1537_v12 = vadd.f32 %v2322_v0, %v2321_v62 }
 0x16b   :  { %v1593_v47 = vadd.f32 %v1592_v59, %v1591_v25  ;;  %v1157_v46 = vadd.f32 %v1156_v41, %v1108_v14  ;;  %v944_v41 = vadd.f32 %v943_v32, %v895_v44  ;;  %v900_v14 = vadd.f32 %v1534_v21, %v1506_v6 }
 0x16c   :  { %v1594_v58 = vpop.f32.mrf.mxu0  ;;  %v683_v55 = vadd.f32 %v1475_v40, %v1447_v51  ;;  %v903_v27 = vadd.f32 %v1537_v12, %v1509_v63 }
 0x16d   :  { %v1171_v61 = vmax.f32 %v941_v2, %v1157_v46  ;;  %v1111_v3 = vadd.f32 %v1593_v47, %v1565_v45  ;;  %v949_v19 = vadd.f32 %v2323_v18, %v900_v14 }
 0x16e   :  { %v1595_v5 = vpop.f32.mrf.mxu0  ;;  %v732_v32 = vadd.f32 %v2325_v31, %v683_v55  ;;  %v952_v42 = vadd.f32 %v2328_v52, %v903_v27 }
 0x16f   :  { %v1175_v8 = vmax.f32 %v735_v56, %v1171_v61  ;;  %v1596_v9 = vadd.f32 %v1595_v5, %v1594_v58  ;;  %v1160_v10 = vadd.f32 %v1159_v60, %v1111_v3 }
 0x170   :  { %v1597_v48 = vpop.f32.mrf.mxu0 }
 0x171   :  { %v1116_v16 = vadd.f32 %v1596_v9, %v1568_v7  ;;  %v1172_v17 = vmax.f32 %v944_v41, %v1160_v10  ;;  %v1186_v22 = vadd.f32 %v1338_v28, %v1175_v8 }
 0x172   :  { %v1598_v57 = vpop.f32.mrf.mxu0 }
 0x173   :  { %v1165_v23 = vadd.f32 %v1652_v35, %v1116_v16  ;;  %v1176_v13 = vmax.f32 %v736_v53, %v1172_v17  ;;  %v1599_v15 = vadd.f32 %v1598_v57, %v1597_v48  ;;  %v1190_v43 = vmax.f32 %v1186_v22, 0.0 }
 0x174   :  { %v738_v35 = vmax.f32 %v516_v50, %v732_v32 }
 0x175   :  { %v1173_v34 = vmax.f32 %v949_v19, %v1165_v23  ;;  %v1187_v36 = vadd.f32 %v1338_v28, %v1176_v13  ;;  %v1119_v37 = vadd.f32 %v1599_v15, %v1571_v20 }
 0x177   :  { %v1177_v30 = vmax.f32 %v737_v26, %v1173_v34  ;;  %v1191_v33 = vmax.f32 %v1187_v36, 0.0  ;;  %v1168_v25 = vadd.f32 %v1653_v29, %v1119_v37 }
 0x179   :  { %v1350_v54 = vpack.c.bf16 %v1191_v33, %v1190_v43  ;;  %v1174_v56 = vmax.f32 %v952_v42, %v1168_v25  ;;  %v1188_v59 = vadd.f32 %v1338_v28, %v1177_v30 }
 0x17b   :  { %1351 = vst [vmem:[%s2312_s3] sm:$0xff] %v1350_v54   ;;  %v1178_v2 = vmax.f32 %v738_v35, %v1174_v56  ;;  %v1192_v47 = vmax.f32 %v1188_v59, 0.0 }
 0x17d   :  { %v1189_v45 = vadd.f32 %v1338_v28, %v1178_v2 }
 0x17f   :  { %v1193_v46 = vmax.f32 %v1189_v45, 0.0 }
 0x181   :  { %v1355_v4 = vpack.c.bf16 %v1193_v46, %v1192_v47 }
 0x183   :  { %1357 = vst [vmem:[%s2312_s3 + $0x8] sm:$0xff] %v1355_v4  }

// kernel: custom_cnn_forward.7
= control target key start
LH: loop header
LB: loop body
LE: loop exit
PB: predicated region body
PF: predicated region fallthrough
CT: control target
= control target key end

     0   :  { %v293_v28 = vlaneseq  ;;  %v2126_v36 = vmov 1966171168   ;;  %s2607_s0 = inlined_call_operand.vmem [shape: bf16[2,2048], index: 0, kind: input, shape index: {}]   ;;  %s2608_s1 = inlined_call_operand.vmem [shape: bf16[2048,128], index: 1, kind: input, shape index: {}]   ;;  %s2609_s2 = inlined_call_operand.vmem [shape: f32[1,128], index: 2, kind: input, shape index: {}]   ;;  %s2610_s3 = inlined_call_operand.vmem [shape: bf16[128,128], index: 3, kind: input, shape index: {}]   ;;  %s2611_s4 = inlined_call_operand.vmem [shape: f32[1,128], index: 4, kind: input, shape index: {}]   ;;  %s2612_s5 = inlined_call_operand.hbm [shape: f32[2,128], index: 5, kind: output, shape index: {}]  }
   0x1   :  { %v1966_v0 = vld [vmem:[%s2608_s1 + $0x78] sm:$0xff]   ;;  %v1970_v4 = vld [vmem:[%s2608_s1 + $0x70] sm:$0xff]   ;;  %v1974_v8 = vld [vmem:[%s2608_s1 + $0x68] sm:$0xff]   ;;  %v291_v37 = vunpack.c.l.s4 %v2126_v36 }
   0x2   :  { %v1967_v1 = vld [vmem:[%s2608_s1 + $0xf8] sm:$0xff]   ;;  %1757 = vmatprep.subr.bf16.mxu0 %v1966_v0  ;;  %v1971_v5 = vld [vmem:[%s2608_s1 + $0xf0] sm:$0xff]   ;;  %v1975_v9 = vld [vmem:[%s2608_s1 + $0xe8] sm:$0xff]   ;;  %v294_v33 = vshrl.u32 %v293_v28, 7 }
   0x3   :  { %v1968_v2 = vld [vmem:[%s2608_s1 + $0x38] sm:$0xff]   ;;  %1779 = vmatprep.subr.bf16.mxu1 %v1967_v1  ;;  %v1972_v6 = vld [vmem:[%s2608_s1 + $0x30] sm:$0xff]   ;;  %v1976_v10 = vld [vmem:[%s2608_s1 + $0x28] sm:$0xff]   ;;  %v292_v40 = vunpack.c.0.s8 %v291_v37 }
   0x4   :  { %v1969_v3 = vld [vmem:[%s2608_s1 + $0xb8] sm:$0xff]   ;;  %1758 = vmatpush3.bf16.msra.mxu0 %v1968_v2  ;;  %v1973_v7 = vld [vmem:[%s2608_s1 + $0xb0] sm:$0xff]   ;;  %v1977_v11 = vld [vmem:[%s2608_s1 + $0xa8] sm:$0xff]  }
   0x5   :  { %1780 = vmatpush3.bf16.msra.mxu1 %v1969_v3  ;;  %1759 = vmatprep.subr.bf16.mxu0 %v1970_v4  ;;  %v1978_v12 = vld [vmem:[%s2608_s1 + $0x60] sm:$0xff]   ;;  %v1982_v16 = vld [vmem:[%s2608_s1 + $0x58] sm:$0xff]   ;;  %v1986_v20 = vld [vmem:[%s2608_s1 + $0x50] sm:$0xff]   ;;  %v2265_v41 = vsub.s32 %v292_v40, %v294_v33 }
   0x6   :  { %1781 = vmatprep.subr.bf16.mxu1 %v1971_v5  ;;  %v1979_v13 = vld [vmem:[%s2608_s1 + $0xe0] sm:$0xff]   ;;  %v1983_v17 = vld [vmem:[%s2608_s1 + $0xd8] sm:$0xff]   ;;  %v1987_v21 = vld [vmem:[%s2608_s1 + $0xd0] sm:$0xff]  }
   0x7   :  { %v1980_v14 = vld [vmem:[%s2608_s1 + $0x20] sm:$0xff]   ;;  %v1984_v18 = vld [vmem:[%s2608_s1 + $0x18] sm:$0xff]   ;;  %v1988_v22 = vld [vmem:[%s2608_s1 + $0x10] sm:$0xff]  }
   0x8   :  { %1760 = vmatpush3.bf16.msra.mxu0 %v1972_v6  ;;  %v1981_v15 = vld [vmem:[%s2608_s1 + $0xa0] sm:$0xff]   ;;  %v1985_v19 = vld [vmem:[%s2608_s1 + $0x98] sm:$0xff]   ;;  %v1989_v23 = vld [vmem:[%s2608_s1 + $0x90] sm:$0xff]  }
   0x9   :  { %1782 = vmatpush3.bf16.msra.mxu1 %v1973_v7  ;;  %1761 = vmatprep.subr.bf16.mxu0 %v1974_v8  ;;  %v1990_v24 = vld [vmem:[%s2608_s1 + $0x48] sm:$0xff]   ;;  %v1994_v29 = vld [vmem:[%s2608_s1 + $0x40] sm:$0xff]   ;;  %v1999_v35 = vld [vmem:[%s2608_s1 + $0x178] sm:$0xff]  }
   0xa   :  { %1783 = vmatprep.subr.bf16.mxu1 %v1975_v9  ;;  %v1991_v25 = vld [vmem:[%s2608_s1 + $0xc8] sm:$0xff]   ;;  %v1995_v30 = vld [vmem:[%s2608_s1 + $0xc0] sm:$0xff]   ;;  %v2000_v38 = vld [vmem:[%s2608_s1 + $0x1f8] sm:$0xff]  }
   0xb   :  { %v1992_v26 = vld [vmem:[%s2608_s1 + $0x8] sm:$0xff]   ;;  %v1996_v31 = vld [vmem:[%s2608_s1] sm:$0xff]   ;;  %v2001_v47 = vld [vmem:[%s2608_s1 + $0x138] sm:$0xff]  }
   0xc   :  { %1762 = vmatpush3.bf16.msra.mxu0 %v1976_v10  ;;  %v1993_v27 = vld [vmem:[%s2608_s1 + $0x88] sm:$0xff]   ;;  %v1997_v32 = vld [vmem:[%s2608_s1 + $0x80] sm:$0xff]   ;;  %v2002_v49 = vld [vmem:[%s2608_s1 + $0x1b8] sm:$0xff]  }
   0xd   :  { %1784 = vmatpush3.bf16.msra.mxu1 %v1977_v11  ;;  %1763 = vmatprep.subr.bf16.mxu0 %v1978_v12  ;;  %v22_v34 = vld [vmem:[%s2607_s0] sm:$0xff]  ;;  %v2003_v52 = vld [vmem:[%s2608_s1 + $0x170] sm:$0xff]   ;;  %v2007_v58 = vld [vmem:[%s2608_s1 + $0x168] sm:$0xff]  }
   0xe   :  { %1785 = vmatprep.subr.bf16.mxu1 %v1979_v13  ;;  %v289_v39 = vcombine.high %v22_v34, %v22_v34  ;;  %v296_v42 = vrot.slane %v22_v34, %v2265_v41  ;;  %v2004_v54 = vld [vmem:[%s2608_s1 + $0x1f0] sm:$0xff]   ;;  %v2008_v59 = vld [vmem:[%s2608_s1 + $0x1e8] sm:$0xff]   ;;  %v2011_v62 = vld [vmem:[%s2608_s1 + $0x160] sm:$0xff]  }
   0xf   :  { %v2005_v55 = vld [vmem:[%s2608_s1 + $0x130] sm:$0xff]   ;;  %v2009_v60 = vld [vmem:[%s2608_s1 + $0x128] sm:$0xff]   ;;  %v2012_v63 = vld [vmem:[%s2608_s1 + $0x1e0] sm:$0xff]  }
  0x10   :  { %1764 = vmatpush3.bf16.msra.mxu0 %v1980_v14  ;;  %v2269_v43 = vrot.slane %v289_v39, %v2265_v41  ;;  %v304_v44 = vcombine.high %v296_v42, %v296_v42  ;;  %v312_v45 = vrot.slane %v296_v42, %v2265_v41  ;;  %v2006_v57 = vld [vmem:[%s2608_s1 + $0x1b0] sm:$0xff]   ;;  %v2010_v61 = vld [vmem:[%s2608_s1 + $0x1a8] sm:$0xff]   ;;  %v2013_v0 = vld [vmem:[%s2608_s1 + $0x120] sm:$0xff]  }
  0x11   :  { %1786 = vmatpush3.bf16.msra.mxu1 %v1981_v15  ;;  %1765 = vmatprep.subr.bf16.mxu0 %v1982_v16  ;;  %v2014_v1 = vld [vmem:[%s2608_s1 + $0x1a0] sm:$0xff]   ;;  %v2015_v2 = vld [vmem:[%s2608_s1 + $0x158] sm:$0xff]   ;;  %v2019_v6 = vld [vmem:[%s2608_s1 + $0x150] sm:$0xff]  }
  0x12   :  { %1787 = vmatprep.subr.bf16.mxu1 %v1983_v17  ;;  %v305_v46 = vcombine.high %v2269_v43, %v2269_v43  ;;  %v326_v48 = vrot.slane %v304_v44, %v2265_v41  ;;  %v334_v51 = vcombine.high %v312_v45, %v312_v45  ;;  %v2016_v3 = vld [vmem:[%s2608_s1 + $0x1d8] sm:$0xff]   ;;  %v2020_v7 = vld [vmem:[%s2608_s1 + $0x1d0] sm:$0xff]   ;;  %v2023_v10 = vld [vmem:[%s2608_s1 + $0x148] sm:$0xff]  }
  0x13   :  { %v2017_v4 = vld [vmem:[%s2608_s1 + $0x118] sm:$0xff]   ;;  %v2021_v8 = vld [vmem:[%s2608_s1 + $0x110] sm:$0xff]   ;;  %v2024_v11 = vld [vmem:[%s2608_s1 + $0x1c8] sm:$0xff]  }
  0x14   :  { %1766 = vmatpush3.bf16.msra.mxu0 %v1984_v18  ;;  %v333_v50 = vrot.slane %v305_v46, %v2265_v41  ;;  %1203 = vmatprep.mubr.bf16.mxu0 %v326_v48  ;;  %v336_v53 = vcombine.high %v326_v48, %v326_v48  ;;  %v2018_v5 = vld [vmem:[%s2608_s1 + $0x198] sm:$0xff]   ;;  %v2022_v9 = vld [vmem:[%s2608_s1 + $0x190] sm:$0xff]   ;;  %v2025_v12 = vld [vmem:[%s2608_s1 + $0x108] sm:$0xff]   ;;  %v319_v18 = vrot.slane %v2269_v43, %v2265_v41 }
  0x15   :  { %1788 = vmatpush3.bf16.msra.mxu1 %v1985_v19  ;;  %1767 = vmatprep.subr.bf16.mxu0 %v1986_v20  ;;  %v2026_v13 = vld [vmem:[%s2608_s1 + $0x188] sm:$0xff]   ;;  %v2027_v14 = vld [vmem:[%s2608_s1 + $0x140] sm:$0xff]   ;;  %v2031_v19 = vld [vmem:[%s2608_s1 + $0x278] sm:$0xff]  }
  0x16   :  { %1789 = vmatprep.subr.bf16.mxu1 %v1987_v21  ;;  %v337_v56 = vcombine.high %v333_v50, %v333_v50  ;;  %1243 = vmatprep.mubr.bf16.mxu1 %v336_v53  ;;  %v2028_v15 = vld [vmem:[%s2608_s1 + $0x1c0] sm:$0xff]   ;;  %v2032_v20 = vld [vmem:[%s2608_s1 + $0x2f8] sm:$0xff]   ;;  %v2039_v28 = vld [vmem:[%s2608_s1 + $0x268] sm:$0xff]  }
  0x17   :  { %v2029_v16 = vld [vmem:[%s2608_s1 + $0x100] sm:$0xff]   ;;  %v2033_v21 = vld [vmem:[%s2608_s1 + $0x238] sm:$0xff]   ;;  %v2051_v40 = vld [vmem:[%s2608_s1 + $0x250] sm:$0xff]  }
  0x18   :  { %1768 = vmatpush3.bf16.msra.mxu0 %v1988_v22  ;;  %v2030_v17 = vld [vmem:[%s2608_s1 + $0x180] sm:$0xff]   ;;  %v2034_v22 = vld [vmem:[%s2608_s1 + $0x2b8] sm:$0xff]   ;;  %v2052_v42 = vld [vmem:[%s2608_s1 + $0x2d0] sm:$0xff]  }
  0x19   :  { %1790 = vmatpush3.bf16.msra.mxu1 %v1989_v23  ;;  %1769 = vmatprep.subr.bf16.mxu0 %v1990_v24  ;;  %v335_v23 = vcombine.high %v319_v18, %v319_v18  ;;  %v2035_v24 = vld [vmem:[%s2608_s1 + $0x270] sm:$0xff]   ;;  %v2044_v33 = vld [vmem:[%s2608_s1 + $0x2e0] sm:$0xff]   ;;  %v2047_v36 = vld [vmem:[%s2608_s1 + $0x258] sm:$0xff]  }
  0x1a   :  { %1791 = vmatprep.subr.bf16.mxu1 %v1991_v25  ;;  %v2036_v25 = vld [vmem:[%s2608_s1 + $0x2f0] sm:$0xff]   ;;  %v2045_v34 = vld [vmem:[%s2608_s1 + $0x220] sm:$0xff]   ;;  %v2048_v37 = vld [vmem:[%s2608_s1 + $0x2d8] sm:$0xff]  }
  0x1b   :  { %v2050_v39 = vld [vmem:[%s2608_s1 + $0x298] sm:$0xff]   ;;  %v2053_v43 = vld [vmem:[%s2608_s1 + $0x210] sm:$0xff]   ;;  %v23_v46 = vld [vmem:[%s2607_s0 + $0x8] sm:$0xff] }
  0x1c   :  { %1770 = vmatpush3.bf16.msra.mxu0 %v1992_v26  ;;  %v2037_v26 = vld [vmem:[%s2608_s1 + $0x230] sm:$0xff]   ;;  %v345_v48 = vrot.slane %v23_v46, %v2265_v41 }
  0x1d   :  { %1792 = vmatpush3.bf16.msra.mxu1 %v1993_v27  ;;  %1771 = vmatprep.subr.bf16.mxu0 %v1994_v29  ;;  %v2038_v27 = vld [vmem:[%s2608_s1 + $0x2b0] sm:$0xff]   ;;  %v2040_v29 = vld [vmem:[%s2608_s1 + $0x2e8] sm:$0xff]  }
  0x1e   :  { %1793 = vmatprep.subr.bf16.mxu1 %v1995_v30  ;;  %v2041_v30 = vld [vmem:[%s2608_s1 + $0x228] sm:$0xff]   ;;  %v2054_v44 = vld [vmem:[%s2608_s1 + $0x290] sm:$0xff]  }
  0x20   :  { %1772 = vmatpush3.bf16.msra.mxu0 %v1996_v31  ;;  %v2042_v31 = vld [vmem:[%s2608_s1 + $0x2a8] sm:$0xff]  }
  0x21   :  { %1794 = vmatpush3.bf16.msra.mxu1 %v1997_v32  ;;  %1801 = vmatprep.subr.bf16.mxu0 %v1999_v35  ;;  %v2043_v32 = vld [vmem:[%s2608_s1 + $0x260] sm:$0xff]  }
  0x22   :  { %1823 = vmatprep.subr.bf16.mxu1 %v2000_v38  ;;  %v2046_v35 = vld [vmem:[%s2608_s1 + $0x2a0] sm:$0xff]   ;;  %v2049_v38 = vld [vmem:[%s2608_s1 + $0x218] sm:$0xff]  }
  0x23   :  { %1204 = vmatmul.mubr.bf16.vlgmr.msra.gmra.mxu0 %v312_v45  ;;  %v2055_v45 = vld [vmem:[%s2608_s1 + $0x248] sm:$0xff]  }
  0x24   :  { %1802 = vmatpush3.bf16.msra.mxu0 %v2001_v47  ;;  %1244 = vmatmul.mubr.bf16.vlgmr.msra.gmra.mxu1 %v334_v51  ;;  %v2056_v47 = vld [vmem:[%s2608_s1 + $0x2c8] sm:$0xff]  }
  0x25   :  { %1803 = vmatprep.subr.bf16.mxu0 %v2003_v52  ;;  %1824 = vmatpush3.bf16.msra.mxu1 %v2002_v49  ;;  %v338_v49 = vcombine.high %v23_v46, %v23_v46  ;;  %v2058_v51 = vld [vmem:[%s2608_s1 + $0x288] sm:$0xff]   ;;  %v353_v52 = vcombine.high %v345_v48, %v345_v48 }
  0x26   :  { %1283 = vmatprep.mubr.bf16.mxu0 %v333_v50  ;;  %1825 = vmatprep.subr.bf16.mxu1 %v2004_v54  ;;  %v2057_v50 = vld [vmem:[%s2608_s1 + $0x208] sm:$0xff]   ;;  %v2059_v54 = vld [vmem:[%s2608_s1 + $0x240] sm:$0xff]  }
  0x27   :  { %1323 = vmatprep.mubr.bf16.mxu1 %v337_v56  ;;  %v2457_v53 = vrot.slane %v338_v49, %v2265_v41  ;;  %v375_v56 = vrot.slane %v353_v52, %v2265_v41 }
  0x28   :  { %1804 = vmatpush3.bf16.msra.mxu0 %v2005_v55  ;;  %v2060_v55 = vld [vmem:[%s2608_s1 + $0x2c0] sm:$0xff]  }
  0x29   :  { %1805 = vmatprep.subr.bf16.mxu0 %v2007_v58  ;;  %1826 = vmatpush3.bf16.msra.mxu1 %v2006_v57  ;;  %v354_v57 = vcombine.high %v2457_v53, %v2457_v53  ;;  %v2061_v58 = vld [vmem:[%s2608_s1 + $0x200] sm:$0xff]  }
  0x2a   :  { %1827 = vmatprep.subr.bf16.mxu1 %v2008_v59  ;;  %v2062_v59 = vld [vmem:[%s2608_s1 + $0x280] sm:$0xff]  }
  0x2c   :  { %1806 = vmatpush3.bf16.msra.mxu0 %v2009_v60  ;;  %v385_v60 = vcombine.high %v375_v56, %v375_v56 }
  0x2d   :  { %1807 = vmatprep.subr.bf16.mxu0 %v2011_v62  ;;  %1828 = vmatpush3.bf16.msra.mxu1 %v2010_v61  ;;  %v361_v61 = vrot.slane %v345_v48, %v2265_v41  ;;  %v2063_v62 = vld [vmem:[%s2608_s1 + $0x378] sm:$0xff]  }
  0x2e   :  { %1829 = vmatprep.subr.bf16.mxu1 %v2012_v63  ;;  %v2064_v63 = vld [vmem:[%s2608_s1 + $0x3f8] sm:$0xff]  }
  0x30   :  { %1808 = vmatpush3.bf16.msra.mxu0 %v2013_v0  ;;  %v382_v0 = vrot.slane %v354_v57, %v2265_v41 }
  0x31   :  { %1809 = vmatprep.subr.bf16.mxu0 %v2015_v2  ;;  %1830 = vmatpush3.bf16.msra.mxu1 %v2014_v1  ;;  %v2065_v1 = vld [vmem:[%s2608_s1 + $0x338] sm:$0xff]  }
  0x32   :  { %1831 = vmatprep.subr.bf16.mxu1 %v2016_v3  ;;  %v2066_v2 = vld [vmem:[%s2608_s1 + $0x3b8] sm:$0xff]   ;;  %v383_v3 = vcombine.high %v361_v61, %v361_v61 }
  0x34   :  { %1810 = vmatpush3.bf16.msra.mxu0 %v2017_v4  ;;  %v2067_v4 = vld [vmem:[%s2608_s1 + $0x370] sm:$0xff]  }
  0x35   :  { %1811 = vmatprep.subr.bf16.mxu0 %v2019_v6  ;;  %1832 = vmatpush3.bf16.msra.mxu1 %v2018_v5  ;;  %v2068_v5 = vld [vmem:[%s2608_s1 + $0x3f0] sm:$0xff]   ;;  %v386_v6 = vcombine.high %v382_v0, %v382_v0 }
  0x36   :  { %1833 = vmatprep.subr.bf16.mxu1 %v2020_v7  ;;  %v2069_v7 = vld [vmem:[%s2608_s1 + $0x330] sm:$0xff]  }
  0x38   :  { %1812 = vmatpush3.bf16.msra.mxu0 %v2021_v8  ;;  %v2070_v8 = vld [vmem:[%s2608_s1 + $0x3b0] sm:$0xff]  }
  0x39   :  { %1813 = vmatprep.subr.bf16.mxu0 %v2023_v10  ;;  %1834 = vmatpush3.bf16.msra.mxu1 %v2022_v9  ;;  %v2071_v9 = vld [vmem:[%s2608_s1 + $0x368] sm:$0xff]  }
  0x3a   :  { %1835 = vmatprep.subr.bf16.mxu1 %v2024_v11  ;;  %v2072_v10 = vld [vmem:[%s2608_s1 + $0x3e8] sm:$0xff]  }
  0x3b   :  { %v2073_v11 = vld [vmem:[%s2608_s1 + $0x328] sm:$0xff]  }
  0x3c   :  { %1814 = vmatpush3.bf16.msra.mxu0 %v2025_v12  ;;  %v2074_v12 = vld [vmem:[%s2608_s1 + $0x3a8] sm:$0xff]  }
  0x3d   :  { %1815 = vmatprep.subr.bf16.mxu0 %v2027_v14  ;;  %1836 = vmatpush3.bf16.msra.mxu1 %v2026_v13  ;;  %v2075_v13 = vld [vmem:[%s2608_s1 + $0x360] sm:$0xff]  }
  0x3e   :  { %1837 = vmatprep.subr.bf16.mxu1 %v2028_v15  ;;  %v2076_v14 = vld [vmem:[%s2608_s1 + $0x3e0] sm:$0xff]  }
  0x3f   :  { %v2077_v15 = vld [vmem:[%s2608_s1 + $0x320] sm:$0xff]  }
  0x40   :  { %1816 = vmatpush3.bf16.msra.mxu0 %v2029_v16  ;;  %v2078_v16 = vld [vmem:[%s2608_s1 + $0x3a0] sm:$0xff]  }
  0x41   :  { %1845 = vmatprep.subr.bf16.mxu0 %v2031_v19  ;;  %1838 = vmatpush3.bf16.msra.mxu1 %v2030_v17  ;;  %v2079_v17 = vld [vmem:[%s2608_s1 + $0x358] sm:$0xff]  }
  0x42   :  { %1867 = vmatprep.subr.bf16.mxu1 %v2032_v20  ;;  %v2081_v19 = vld [vmem:[%s2608_s1 + $0x318] sm:$0xff]  }
  0x43   :  { %1284 = vmatmul.mubr.bf16.vlgmr.msra.gmra.mxu0 %v319_v18  ;;  %v2080_v18 = vld [vmem:[%s2608_s1 + $0x3d8] sm:$0xff]  }
  0x44   :  { %1846 = vmatpush3.bf16.msra.mxu0 %v2033_v21  ;;  %1324 = vmatmul.mubr.bf16.vlgmr.msra.gmra.mxu1 %v335_v23  ;;  %v2082_v20 = vld [vmem:[%s2608_s1 + $0x398] sm:$0xff]   ;;  %v2083_v21 = vld [vmem:[%s2608_s1 + $0x350] sm:$0xff]  }
  0x45   :  { %1847 = vmatprep.subr.bf16.mxu0 %v2035_v24  ;;  %1868 = vmatpush3.bf16.msra.mxu1 %v2034_v22  ;;  %v2084_v22 = vld [vmem:[%s2608_s1 + $0x3d0] sm:$0xff]  }
  0x46   :  { %1869 = vmatprep.subr.bf16.mxu1 %v2036_v25  ;;  %1363 = vmatprep.mubr.bf16.mxu0 %v375_v56  ;;  %v2085_v23 = vld [vmem:[%s2608_s1 + $0x310] sm:$0xff]   ;;  %v2087_v25 = vld [vmem:[%s2608_s1 + $0x348] sm:$0xff]  }
  0x47   :  { %1403 = vmatprep.mubr.bf16.mxu1 %v385_v60  ;;  %v2086_v24 = vld [vmem:[%s2608_s1 + $0x390] sm:$0xff]  }
  0x48   :  { %1848 = vmatpush3.bf16.msra.mxu0 %v2037_v26  ;;  %v2088_v26 = vld [vmem:[%s2608_s1 + $0x3c8] sm:$0xff]  }
  0x49   :  { %1849 = vmatprep.subr.bf16.mxu0 %v2039_v28  ;;  %1870 = vmatpush3.bf16.msra.mxu1 %v2038_v27  ;;  %v2089_v27 = vld [vmem:[%s2608_s1 + $0x308] sm:$0xff]   ;;  %v2091_v28 = vld [vmem:[%s2608_s1 + $0x340] sm:$0xff]  }
  0x4a   :  { %1871 = vmatprep.subr.bf16.mxu1 %v2040_v29  ;;  %v2090_v29 = vld [vmem:[%s2608_s1 + $0x388] sm:$0xff]  }
  0x4c   :  { %1850 = vmatpush3.bf16.msra.mxu0 %v2041_v30  ;;  %v2092_v30 = vld [vmem:[%s2608_s1 + $0x3c0] sm:$0xff]  }
  0x4d   :  { %1851 = vmatprep.subr.bf16.mxu0 %v2043_v32  ;;  %1872 = vmatpush3.bf16.msra.mxu1 %v2042_v31 }
  0x4e   :  { %1873 = vmatprep.subr.bf16.mxu1 %v2044_v33 }
  0x50   :  { %1852 = vmatpush3.bf16.msra.mxu0 %v2045_v34 }
  0x51   :  { %1853 = vmatprep.subr.bf16.mxu0 %v2047_v36  ;;  %1874 = vmatpush3.bf16.msra.mxu1 %v2046_v35 }
  0x52   :  { %1875 = vmatprep.subr.bf16.mxu1 %v2048_v37 }
  0x54   :  { %1854 = vmatpush3.bf16.msra.mxu0 %v2049_v38 }
  0x55   :  { %1855 = vmatprep.subr.bf16.mxu0 %v2051_v40  ;;  %1876 = vmatpush3.bf16.msra.mxu1 %v2050_v39 }
  0x56   :  { %1877 = vmatprep.subr.bf16.mxu1 %v2052_v42 }
  0x58   :  { %1856 = vmatpush3.bf16.msra.mxu0 %v2053_v43 }
  0x59   :  { %1857 = vmatprep.subr.bf16.mxu0 %v2055_v45  ;;  %1878 = vmatpush3.bf16.msra.mxu1 %v2054_v44 }
  0x5a   :  { %1879 = vmatprep.subr.bf16.mxu1 %v2056_v47 }
  0x5c   :  { %1858 = vmatpush3.bf16.msra.mxu0 %v2057_v50 }
  0x5d   :  { %1859 = vmatprep.subr.bf16.mxu0 %v2059_v54  ;;  %1880 = vmatpush3.bf16.msra.mxu1 %v2058_v51 }
  0x5e   :  { %1881 = vmatprep.subr.bf16.mxu1 %v2060_v55 }
  0x60   :  { %1860 = vmatpush3.bf16.msra.mxu0 %v2061_v58 }
  0x61   :  { %1889 = vmatprep.subr.bf16.mxu0 %v2063_v62  ;;  %1882 = vmatpush3.bf16.msra.mxu1 %v2062_v59 }
  0x62   :  { %1911 = vmatprep.subr.bf16.mxu1 %v2064_v63 }
  0x63   :  { %1364 = vmatmul.mubr.bf16.vlgmr.msra.gmra.mxu0 %v361_v61 }
  0x64   :  { %1890 = vmatpush3.bf16.msra.mxu0 %v2065_v1  ;;  %1443 = vmatprep.mubr.bf16.mxu0 %v382_v0 }
  0x65   :  { %1404 = vmatmul.mubr.bf16.vlgmr.msra.gmra.mxu1 %v383_v3  ;;  %1891 = vmatprep.subr.bf16.mxu0 %v2067_v4 }
  0x66   :  { %1912 = vmatpush3.bf16.msra.mxu1 %v2066_v2  ;;  %1483 = vmatprep.mubr.bf16.mxu1 %v386_v6 }
  0x67   :  { %1913 = vmatprep.subr.bf16.mxu1 %v2068_v5 }
  0x68   :  { %1892 = vmatpush3.bf16.msra.mxu0 %v2069_v7 }
  0x69   :  { %1893 = vmatprep.subr.bf16.mxu0 %v2071_v9 }
  0x6a   :  { %1914 = vmatpush3.bf16.msra.mxu1 %v2070_v8 }
  0x6b   :  { %1915 = vmatprep.subr.bf16.mxu1 %v2072_v10 }
  0x6c   :  { %1894 = vmatpush3.bf16.msra.mxu0 %v2073_v11 }
  0x6d   :  { %1895 = vmatprep.subr.bf16.mxu0 %v2075_v13 }
  0x6e   :  { %1916 = vmatpush3.bf16.msra.mxu1 %v2074_v12 }
  0x6f   :  { %1917 = vmatprep.subr.bf16.mxu1 %v2076_v14 }
  0x70   :  { %1896 = vmatpush3.bf16.msra.mxu0 %v2077_v15 }
  0x71   :  { %1897 = vmatprep.subr.bf16.mxu0 %v2079_v17 }
  0x72   :  { %1918 = vmatpush3.bf16.msra.mxu1 %v2078_v16 }
  0x73   :  { %1919 = vmatprep.subr.bf16.mxu1 %v2080_v18 }
  0x74   :  { %1898 = vmatpush3.bf16.msra.mxu0 %v2081_v19 }
  0x75   :  { %1899 = vmatprep.subr.bf16.mxu0 %v2083_v21 }
  0x76   :  { %1920 = vmatpush3.bf16.msra.mxu1 %v2082_v20 }
  0x77   :  { %1921 = vmatprep.subr.bf16.mxu1 %v2084_v22 }
  0x78   :  { %1900 = vmatpush3.bf16.msra.mxu0 %v2085_v23 }
  0x79   :  { %1901 = vmatprep.subr.bf16.mxu0 %v2087_v25 }
  0x7a   :  { %1922 = vmatpush3.bf16.msra.mxu1 %v2086_v24 }
  0x7b   :  { %1923 = vmatprep.subr.bf16.mxu1 %v2088_v26 }
  0x7c   :  { %10 = vsyncpa [#allocation3], 0  ;;  %1902 = vmatpush3.bf16.msra.mxu0 %v2089_v27  ;;  %v2093_v31 = vld [vmem:[%s2608_s1 + $0x300] sm:$0xff]   ;;  %v368_v32 = vrot.slane %v2457_v53, %v2265_v41  ;;  %v2096_v35 = vld [vmem:[%s2610_s3 + $0x38] sm:$0xff]   ;;  %v2127_v36 = vmov 0.0   ;;  %vm2128_vm0 = vmmov 0  }
  0x7d   :  { %1903 = vmatprep.subr.bf16.mxu0 %v2091_v28  ;;  %v2094_v33 = vld [vmem:[%s2608_s1 + $0x380] sm:$0xff]   ;;  %v2097_v41 = vld [vmem:[%s2610_s3 + $0x30] sm:$0xff]   ;;  %v2098_v37 = vld [vmem:[%s2610_s3 + $0x28] sm:$0xff]   ;;  %s2129_s16 = smov [#allocation2]  }
  0x7e   :  { %1924 = vmatpush3.bf16.msra.mxu1 %v2090_v29  ;;  %v384_v34 = vcombine.high %v368_v32, %v368_v32  ;;  %v2099_v38 = vld [vmem:[%s2610_s3 + $0x20] sm:$0xff]   ;;  %v2100_v39 = vld [vmem:[%s2610_s3 + $0x18] sm:$0xff]   ;;  %v2101_v40 = vld [vmem:[%s2610_s3 + $0x10] sm:$0xff]   ;;  %s1611_s17 = sshll.u32 %s2129_s16, 4  ;;  %s1612_s17 = int_to_ptr.vmem [resolvable:$true] %s1611_s17 }
  0x7f   :  { %1925 = vmatprep.subr.bf16.mxu1 %v2092_v30  ;;  %v2102_v42 = vld [vmem:[%s2610_s3 + $0x8] sm:$0xff]   ;;  %v2103_v43 = vld [vmem:[%s2610_s3] sm:$0xff]   ;;  %s2104_s18 = scalar_lea.vmem %s1612_s17, 32  ;;  %p2109_p1 = scmp.lt.s32.totalorder %s1612_s17, %s1612_s17 }
  0x80   :  { %1904 = vmatpush3.bf16.msra.mxu0 %v2093_v31  ;;  %v1619_v46 = vld [vmem:[%s2609_s2] ss:$0 sm:$0xff]  ;;  %p2105_p0 = scmp.ne.s32.totalorder %s1612_s17, %s2104_s18  ;;  %p2110_p2 = scmp.lt.s32.totalorder %s2104_s18, %s2104_s18 }
  0x81   :  { %1942 = vmatprep.subr.bf16.mxu0 %v2127_v36  ;;  %v1748_v31 = vld [vmem:[%s2611_s4] ss:$0 sm:$0xff] }
  0x82   :  { %1926 = vmatpush3.bf16.msra.mxu1 %v2094_v33  ;;  %p2111_p3 = por %p2110_p2, %p2109_p1 }
  0x83   :  { %1444 = vmatmul.mubr.bf16.vlgmr.msra.gmra.mxu0 %v368_v32 }
  0x84   :  { %1943 = vmatpush3.bf16.msra.mxu0 %v2096_v35  ;;  %1958 = vmatprep.mubr.msk.bf16.mxu0 %vm2128_vm0, %v2127_v36  ;;  %p2112_p4 = pnand %p2111_p3, %p2105_p0 }
  0x85   :  { %1484 = vmatmul.mubr.bf16.vlgmr.msra.gmra.mxu1 %v384_v34  ;;  %1944 = vmatprep.subr.bf16.mxu0 %v2127_v36 }
  0x88   :  { %1945 = vmatpush3.bf16.msra.mxu0 %v2097_v41 }
  0x89   :  { %1946 = vmatprep.subr.bf16.mxu0 %v2127_v36 }
  0x8c   :  { %1947 = vmatpush3.bf16.msra.mxu0 %v2098_v37 }
  0x8d   :  { %1948 = vmatprep.subr.bf16.mxu0 %v2127_v36 }
  0x90   :  { %1949 = vmatpush3.bf16.msra.mxu0 %v2099_v38 }
  0x91   :  { %1950 = vmatprep.subr.bf16.mxu0 %v2127_v36 }
  0x94   :  { %1951 = vmatpush3.bf16.msra.mxu0 %v2100_v39 }
  0x95   :  { %1952 = vmatprep.subr.bf16.mxu0 %v2127_v36 }
  0x98   :  { %1953 = vmatpush3.bf16.msra.mxu0 %v2101_v40 }
  0x99   :  { %1954 = vmatprep.subr.bf16.mxu0 %v2127_v36 }
  0x9c   :  { %1955 = vmatpush3.bf16.msra.mxu0 %v2102_v42 }
  0x9d   :  { %1956 = vmatprep.subr.bf16.mxu0 %v2127_v36 }
  0xa0   :  { %1957 = vmatpush3.bf16.msra.mxu0 %v2103_v43 }
  0xe3   :  { %v1773_v44 = vpop.f32.mrf.mxu0 }
  0xe4   :  { %v1795_v45 = vpop.f32.mrf.mxu1 }
  0xe5   :  { %v1774_v47 = vpop.f32.mrf.mxu0 }
  0xe6   :  { %v1775_v48 = vadd.f32 %v1774_v47, %v1773_v44  ;;  %v1796_v49 = vpop.f32.mrf.mxu1 }
  0xe7   :  { %v1776_v50 = vpop.f32.mrf.mxu0  ;;  %v1797_v52 = vadd.f32 %v1796_v49, %v1795_v45 }
  0xe8   :  { %v1206_v51 = vadd.f32 %v1775_v48, %v1619_v46  ;;  %v1798_v53 = vpop.f32.mrf.mxu1 }
  0xe9   :  { %v1777_v54 = vpop.f32.mrf.mxu0 }
  0xea   :  { %v1246_v55 = vadd.f32 %v1797_v52, %v1206_v51  ;;  %v1799_v56 = vpop.f32.mrf.mxu1 }
 0x103   :  { %v1817_v57 = vpop.f32.mrf.mxu0 }
 0x104   :  { %v1839_v58 = vpop.f32.mrf.mxu1 }
 0x105   :  { %v1818_v59 = vpop.f32.mrf.mxu0 }
 0x106   :  { %v1840_v60 = vpop.f32.mrf.mxu1  ;;  %v1819_v9 = vadd.f32 %v1818_v59, %v1817_v57 }
 0x107   :  { %v1820_v61 = vpop.f32.mrf.mxu0  ;;  %v1841_v11 = vadd.f32 %v1840_v60, %v1839_v58 }
 0x108   :  { %v1842_v62 = vpop.f32.mrf.mxu1  ;;  %v1286_v10 = vadd.f32 %v1819_v9, %v1246_v55 }
 0x109   :  { %v1821_v63 = vpop.f32.mrf.mxu0 }
 0x10a   :  { %v1843_v0 = vpop.f32.mrf.mxu1  ;;  %v1326_v13 = vadd.f32 %v1841_v11, %v1286_v10 }
 0x123   :  { %v1861_v1 = vpop.f32.mrf.mxu0 }
 0x125   :  { %v1883_v2 = vpop.f32.mrf.mxu1  ;;  %v1862_v3 = vpop.f32.mrf.mxu0 }
 0x126   :  { %v1863_v12 = vadd.f32 %v1862_v3, %v1861_v1 }
 0x127   :  { %v1884_v4 = vpop.f32.mrf.mxu1  ;;  %v1864_v5 = vpop.f32.mrf.mxu0 }
 0x128   :  { %v1366_v14 = vadd.f32 %v1863_v12, %v1326_v13  ;;  %v1885_v15 = vadd.f32 %v1884_v4, %v1883_v2 }
 0x129   :  { %v1886_v6 = vpop.f32.mrf.mxu1  ;;  %v1865_v7 = vpop.f32.mrf.mxu0 }
 0x12a   :  { %v1406_v19 = vadd.f32 %v1885_v15, %v1366_v14 }
 0x12b   :  { %v1887_v8 = vpop.f32.mrf.mxu1 }
 0x143   :  { %v1905_v16 = vpop.f32.mrf.mxu0 }
 0x145   :  { %v1927_v17 = vpop.f32.mrf.mxu1  ;;  %v1906_v18 = vpop.f32.mrf.mxu0 }
 0x146   :  { %v1907_v20 = vadd.f32 %v1906_v18, %v1905_v16 }
 0x147   :  { %v1928_v21 = vpop.f32.mrf.mxu1  ;;  %v1908_v22 = vpop.f32.mrf.mxu0 }
 0x148   :  { %v1446_v23 = vadd.f32 %v1907_v20, %v1406_v19  ;;  %v1929_v24 = vadd.f32 %v1928_v21, %v1927_v17 }
 0x149   :  { %v1930_v25 = vpop.f32.mrf.mxu1  ;;  %v1909_v26 = vpop.f32.mrf.mxu0 }
 0x14a   :  { %v1486_v27 = vadd.f32 %v1929_v24, %v1446_v23 }
 0x14b   :  { %v1931_v28 = vpop.f32.mrf.mxu1 }
 0x14c   :  { %v1491_v29 = vmax.f32 %v1486_v27, 0.0 }
 0x14e   :  { %v1492_v30 = vpack.c.bf16 %v1491_v29, %v1491_v29 }
 0x150   :  { %1959 = vmatmul.mubr.bf16.vlgmr.msra.gmra.mxu0 %v1492_v30 }
 0x210   :  { %v1598_v32 = vpop.f32.mrf.mxu0 }
 0x211   :  { %v1599_v33 = vadd.f32 %v1748_v31, %v1598_v32 }
 0x212   :  { %v1960_v34 = vpop.f32.mrf.mxu0 }
 0x213   :  { %1604 = vst [vmem:[#allocation2] sm:$0x3] %v1599_v33 }
 0x214   :  { %v1601_v35 = vpop.f32.mrf.mxu0 }
 0x215   :  { %2115 = shalt.err (!%p2112_p4)
}
 0x216   :  { %1614 = dma.vmem_to_hbm [thread:$0]  %s1612_s17, 32, %s2612_s5, [#allocation3]   ;;  %v1961_v36 = vpop.f32.mrf.mxu0 }
 0x217   :  { %2124 = dma.done.wait [#allocation3], 32  }
 0x218   :  { %2125 = vsyncadd [#allocation3], 4294967264 }
 0x219   :  { %1618 = vsyncpa [#allocation3], 1 }

</bundles_post_ra>
